<compile_context>
chip_gen: v7x
topology: tpu7x:2x2x1
jax: 0.10.0
libtpu: 0.0.40
codegen_flags: <defaults>
</compile_context>

<pallas_src>
import functools
import math

import jax
import jax.numpy as jnp
import numpy as np
from jax.experimental import pallas as pl
from jax.experimental.pallas import tpu as pltpu

NEG_SLOPE = 0.2
NUM_CLASSES = 13
EMB_DIMS = 1024  # conv7 expects 1216 = emb_dims + 3*64 input channels


def _leaky(v):
    # leaky_relu(v, 0.2) == max(v, 0.2*v) for 0 < slope < 1
    return jnp.maximum(v, NEG_SLOPE * v)


def _bdot(a, w):
    """bf16 MXU operands, f32 accumulation."""
    return jnp.dot(a.astype(jnp.bfloat16), w.astype(jnp.bfloat16),
                   preferred_element_type=jnp.float32)


# ----------------------------------------------------------------------------
# Kernels
# ----------------------------------------------------------------------------

def ga_conv_kernel(k, n, xs_ref, w_ref, b_ref, o_ref):
    """k-tap 'same' conv over the sorted point axis + folded BN + LeakyReLU."""
    x = xs_ref[0]                                       # (n + 2*(k//2), Cin) bf16
    acc = jnp.zeros((n, o_ref.shape[-1]), jnp.float32)
    for t in range(k):                                  # static unroll over taps
        acc = acc + _bdot(x[t:t + n, :], w_ref[t])
    o_ref[0] = _leaky(acc + b_ref[...])


def emb_kernel(x1_ref, x2_ref, x3_ref, w6_ref, b6_ref, emb_ref):
    """conv6 on cat(x1,x2,x3) + running max over point tiles (resident output)."""
    s = pl.program_id(1)
    h = (_bdot(x1_ref[0], w6_ref[0:64]) +
         _bdot(x2_ref[0], w6_ref[64:128]) +
         _bdot(x3_ref[0], w6_ref[128:192]) + b6_ref[...])          # (tn, E) f32
    tile_max = _leaky(h).max(axis=0)[None, None, :]                 # (1, 1, E)

    @pl.when(s == 0)
    def _init():
        emb_ref[...] = tile_max

    @pl.when(s > 0)
    def _accumulate():
        emb_ref[...] = jnp.maximum(emb_ref[...], tile_max)


def head_kernel(emb_ref, x1_ref, x2_ref, x3_ref,
                w7e_ref, w7x_ref, b7_ref, w8_ref, b8_ref, w9_ref, o_ref):
    """conv7 -> conv8 -> (dropout=id) -> conv9, per point tile."""
    # conv7 split: per-batch global-embedding contribution + per-point contribution.
    h7c = _bdot(emb_ref[0], w7e_ref[...])                           # (1, 512)
    h7 = (_bdot(x1_ref[0], w7x_ref[0:64]) +
          _bdot(x2_ref[0], w7x_ref[64:128]) +
          _bdot(x3_ref[0], w7x_ref[128:192]) + h7c + b7_ref[...])
    h7 = _leaky(h7)                                                 # (tn, 512) f32
    h8 = _leaky(_bdot(h7, w8_ref[...]) + b8_ref[...])               # (tn, 256) f32
    # dropout: inference-mode identity
    o_ref[0] = _bdot(h8, w9_ref[...])                               # (tn, 13)


# ----------------------------------------------------------------------------
# Wrapper-side data-dependent prep (no clean Pallas equivalent: sort / gather)
# ----------------------------------------------------------------------------

def _ga_prep(x_bnc, w_att, k):
    """Attention softmax, sort points by attention, scale, zero-pad for 'same' conv."""
    B, N, C = x_bnc.shape
    logits = jnp.dot(x_bnc, w_att) / math.sqrt(C)                   # (B, N)
    att = jax.nn.softmax(logits, axis=1)
    sort_idx = jnp.argsort(att, axis=1)                             # ascending (torch.sort)
    rev_idx = jnp.argsort(sort_idx, axis=1)
    sort_att = jnp.take_along_axis(att, sort_idx, axis=1)
    x_sort = jnp.take_along_axis(x_bnc, sort_idx[..., None], axis=1)
    xs = x_sort * sort_att[..., None]
    pad = k // 2
    xs_pad = jnp.pad(xs, ((0, 0), (pad, pad), (0, 0)))
    return xs_pad, rev_idx


def ga_forward(x_bnc, ga_params, k):
    """One GlobalAttention block: prep in JAX, conv+BN+leaky in Pallas, unsort in JAX."""
    w_att, W, b = ga_params
    xs_pad, rev_idx = _ga_prep(x_bnc, w_att, k)
    B, Npad, Cin = xs_pad.shape
    N = Npad - 2 * (k // 2)
    Cout = W.shape[-1]
    kernel = functools.partial(ga_conv_kernel, k, N)
    y_sorted = pl.pallas_call(
        kernel,
        out_shape=jax.ShapeDtypeStruct((B, N, Cout), jnp.float32),
        grid_spec=pltpu.PrefetchScalarGridSpec(
            num_scalar_prefetch=0,
            grid=(B,),
            in_specs=[
                pl.BlockSpec((1, Npad, Cin), lambda bi: (bi, 0, 0)),
                pl.BlockSpec((k, Cin, Cout), lambda bi: (0, 0, 0)),
                pl.BlockSpec((1, Cout), lambda bi: (0, 0)),
            ],
            out_specs=pl.BlockSpec((1, N, Cout), lambda bi: (bi, 0, 0)),
        ),
        compiler_params=pltpu.CompilerParams(dimension_semantics=("parallel",)),
    )(xs_pad.astype(jnp.bfloat16), W, b)
    # un-sort back to the original point order
    return jnp.take_along_axis(y_sorted, rev_idx[..., None], axis=1)


# ----------------------------------------------------------------------------
# Full forward pass
# ----------------------------------------------------------------------------

@functools.partial(jax.jit, static_argnames=("k", "tn"))
def dgcnn_semseg_forward(x_bcn, params, k, tn):
    """x_bcn: (B, num_features, N) channels-first (PyTorch layout) -> (B, 13, N)."""
    B, C, N = x_bcn.shape
    assert N % tn == 0 and tn % 8 == 0
    x = jnp.transpose(x_bcn, (0, 2, 1)).astype(jnp.float32)         # (B, N, C)

    x1 = ga_forward(x, params["ga1"], k)                            # (B, N, 64) f32
    x2 = ga_forward(x1, params["ga2"], k)
    x3 = ga_forward(x2, params["ga3"], k)

    # bf16 copies feed the trunk's MXU kernels (halves their DMA traffic)
    x1b = x1.astype(jnp.bfloat16)
    x2b = x2.astype(jnp.bfloat16)
    x3b = x3.astype(jnp.bfloat16)

    E = params["w6"].shape[-1]

    # conv6 + global max over points (point-tiled, running-max accumulator)
    emb = pl.pallas_call(
        emb_kernel,
        out_shape=jax.ShapeDtypeStruct((B, 1, E), jnp.float32),
        grid_spec=pltpu.PrefetchScalarGridSpec(
            num_scalar_prefetch=0,
            grid=(B, N // tn),
            in_specs=[
                pl.BlockSpec((1, tn, 64), lambda b, s: (b, s, 0)),
                pl.BlockSpec((1, tn, 64), lambda b, s: (b, s, 0)),
                pl.BlockSpec((1, tn, 64), lambda b, s: (b, s, 0)),
                pl.BlockSpec((192, E), lambda b, s: (0, 0)),
                pl.BlockSpec((1, E), lambda b, s: (0, 0)),
            ],
            out_specs=pl.BlockSpec((1, 1, E), lambda b, s: (b, 0, 0)),
        ),
        compiler_params=pltpu.CompilerParams(
            dimension_semantics=("parallel", "arbitrary")),
    )(x1b, x2b, x3b, params["w6"], params["b6"])

    # conv7 -> conv8 -> conv9 head (point-tiled, fully batched per point)
    out = pl.pallas_call(
        head_kernel,
        out_shape=jax.ShapeDtypeStruct((B, N, NUM_CLASSES), jnp.float32),
        grid_spec=pltpu.PrefetchScalarGridSpec(
            num_scalar_prefetch=0,
            grid=(B, N // tn),
            in_specs=[
                pl.BlockSpec((1, 1, E), lambda b, s: (b, 0, 0)),
                pl.BlockSpec((1, tn, 64), lambda b, s: (b, s, 0)),
                pl.BlockSpec((1, tn, 64), lambda b, s: (b, s, 0)),
                pl.BlockSpec((1, tn, 64), lambda b, s: (b, s, 0)),
                pl.BlockSpec((E, 512), lambda b, s: (0, 0)),
                pl.BlockSpec((192, 512), lambda b, s: (0, 0)),
                pl.BlockSpec((1, 512), lambda b, s: (0, 0)),
                pl.BlockSpec((512, 256), lambda b, s: (0, 0)),
                pl.BlockSpec((1, 256), lambda b, s: (0, 0)),
                pl.BlockSpec((256, NUM_CLASSES), lambda b, s: (0, 0)),
            ],
            out_specs=pl.BlockSpec((1, tn, NUM_CLASSES), lambda b, s: (b, s, 0)),
        ),
        compiler_params=pltpu.CompilerParams(
            dimension_semantics=("parallel", "parallel")),
    )(emb, x1b, x2b, x3b, params["w7e"], params["w7x"], params["b7"],
      params["w8"], params["b8"], params["w9"])

    return jnp.transpose(out, (0, 2, 1))                            # (B, 13, N)


# ----------------------------------------------------------------------------
# Parameters (BN folded in inference mode; weights stored bf16, shifts f32)
# ----------------------------------------------------------------------------

def make_params(key, num_features, k, emb_dims=EMB_DIMS):
    ks = iter(jax.random.split(key, 24))

    def bn_fold(kk, c):
        k1, k2, k3, k4 = jax.random.split(kk, 4)
        gamma = 1.0 + 0.1 * jax.random.normal(k1, (c,), jnp.float32)
        beta = 0.1 * jax.random.normal(k2, (c,), jnp.float32)
        mean = 0.1 * jax.random.normal(k3, (c,), jnp.float32)
        var = 1.0 + 0.5 * jax.random.uniform(k4, (c,), jnp.float32)
        scale = gamma * jax.lax.rsqrt(var + 1e-5)
        shift = beta - mean * scale
        return scale, shift

    def lin_fold(cin, cout):
        # PyTorch 1x1 conv weight (cout, cin, 1) stored transposed (cin, cout);
        # inference-mode BN scale folded in (all convs are bias-free).
        w = jax.random.normal(next(ks), (cin, cout), jnp.float32) / np.sqrt(cin)
        scale, shift = bn_fold(next(ks), cout)
        return ((w * scale[None, :]).astype(jnp.bfloat16),
                shift[None, :].astype(jnp.float32))

    def ga_params(cin, cout=64):
        # attention weight (1, cin, 1) -> (cin,)
        w_att = np.sqrt(2.0 / (cin + 1)) * jax.random.normal(
            next(ks), (cin,), jnp.float32)
        # conv weight (cout, cin, k) stored as (k, cin, cout), BN folded
        w = jax.random.normal(next(ks), (k, cin, cout), jnp.float32) / np.sqrt(cin * k)
        scale, shift = bn_fold(next(ks), cout)
        return (w_att, (w * scale[None, None, :]).astype(jnp.bfloat16),
                shift[None, :].astype(jnp.float32))

    ga1 = ga_params(num_features)
    ga2 = ga_params(64)
    ga3 = ga_params(64)
    w6, b6 = lin_fold(192, emb_dims)
    w7, b7 = lin_fold(emb_dims + 192, 512)
    w7e, w7x = w7[:emb_dims], w7[emb_dims:]
    w8, b8 = lin_fold(512, 256)
    w9 = (jax.random.normal(next(ks), (256, NUM_CLASSES), jnp.float32)
          / np.sqrt(256)).astype(jnp.bfloat16)          # conv9: no BN, no bias
    return dict(ga1=ga1, ga2=ga2, ga3=ga3, w6=w6, b6=b6,
                w7e=w7e, w7x=w7x, b7=b7, w8=w8, b8=b8, w9=w9)


# ----------------------------------------------------------------------------
# Pure-JAX reference (same bf16-matmul / f32-pointwise policy)
# ----------------------------------------------------------------------------

def reference_forward(x_bcn, params, k):
    B, C, N = x_bcn.shape
    x = jnp.transpose(x_bcn, (0, 2, 1)).astype(jnp.float32)

    def ga(v, ga_p):
        w_att, W, b = ga_p
        xs_pad, rev_idx = _ga_prep(v, w_att, k)
        cout = W.shape[-1]
        acc = jnp.zeros((B, N, cout), jnp.float32)
        for t in range(k):
            acc = acc + _bdot(xs_pad[:, t:t + N, :], W[t])
        y = _leaky(acc + b)
        return jnp.take_along_axis(y, rev_idx[..., None], axis=1)

    x1 = ga(x, params["ga1"])
    x2 = ga(x1, params["ga2"])
    x3 = ga(x2, params["ga3"])

    cat = jnp.concatenate([x1, x2, x3], axis=-1)                    # (B, N, 192)
    h6 = _leaky(_bdot(cat, params["w6"]) + params["b6"])            # (B, N, E)
    emb = h6.max(axis=1)                                            # (B, E)
    feat = jnp.concatenate(
        [jnp.broadcast_to(emb[:, None, :], (B, N, emb.shape[-1])), x1, x2, x3],
        axis=-1)                                                    # (B, N, 1216)
    w7 = jnp.concatenate([params["w7e"], params["w7x"]], axis=0)
    h7 = _leaky(_bdot(feat, w7) + params["b7"])
    h8 = _leaky(_bdot(h7, params["w8"]) + params["b8"])
    out = _bdot(h8, params["w9"])                                   # (B, N, 13)
    return jnp.transpose(out, (0, 2, 1))


if __name__ == "__main__":
    key = jax.random.PRNGKey(0)
    kx, kp = jax.random.split(key)

    # batch, input features, points, GA kernel size (odd)
    B, C, N, K_NEIGH = 2, 9, 64, 5
    x = jax.random.normal(kx, (B, C, N), dtype=jnp.float32)
    params = make_params(kp, num_features=C, k=K_NEIGH)

    out = dgcnn_semseg_forward(x, params, k=K_NEIGH, tn=32)
    out = jax.block_until_ready(out)

    ref = reference_forward(x, params, K_NEIGH)
    assert out.shape == (B, NUM_CLASSES, N)
    np.testing.assert_allclose(np.asarray(out), np.asarray(ref), atol=2e-2, rtol=2e-2)
    print("KERNEL_OK")
</pallas_src>

<mosaic_0001>
module attributes {stable_mosaic.version = 11 : i64} {
  func.func @ga_conv_kernel(%arg0: i32, %arg1: memref<1x68x9xbf16, #tpu.memory_space<vmem>>, %arg2: memref<5x9x64xbf16, #tpu.memory_space<vmem>>, %arg3: memref<1x64xf32, #tpu.memory_space<vmem>>, %arg4: memref<1x64x64xf32, #tpu.memory_space<vmem>>) attributes {dimension_semantics = [#tpu.dimension_semantics<parallel>], iteration_bounds = array<i64: 2>, scalar_prefetch = 0 : i64, scratch_operands = 0 : i64, tpu.core_type = #tpu.core_type<tc>, window_params = [{transform_indices = @transform_0, window_bounds = array<i64: 1, 68, 9>}, {pipeline_mode = #tpu.pipeline_mode<synchronous>, transform_indices = @transform_1, window_bounds = array<i64: 5, 9, 64>}, {pipeline_mode = #tpu.pipeline_mode<synchronous>, transform_indices = @transform_2, window_bounds = array<i64: 1, 64>}, {transform_indices = @transform_3, window_bounds = array<i64: 1, 64, 64>}]} {
    %c0 = arith.constant 0 : index
    %c0_0 = arith.constant 0 : index
    %c0_1 = arith.constant 0 : index
    %0 = vector.load %arg1[%c0, %c0_0, %c0_1] : memref<1x68x9xbf16, #tpu.memory_space<vmem>>, vector<1x68x9xbf16>
    %1 = vector.shape_cast %0 : vector<1x68x9xbf16> to vector<68x9xbf16>
    %cst = arith.constant 0.000000e+00 : f32
    %2 = vector.broadcast %cst : f32 to vector<64x64xf32>
    %3 = vector.extract_strided_slice %1 {offsets = [0, 0], sizes = [64, 9], strides = [1, 1]} : vector<68x9xbf16> to vector<64x9xbf16>
    %c0_2 = arith.constant 0 : index
    %c0_3 = arith.constant 0 : index
    %c0_4 = arith.constant 0 : index
    %4 = vector.load %arg2[%c0_2, %c0_3, %c0_4] : memref<5x9x64xbf16, #tpu.memory_space<vmem>>, vector<1x9x64xbf16>
    %5 = vector.shape_cast %4 : vector<1x9x64xbf16> to vector<9x64xbf16>
    %cst_5 = arith.constant dense<0.000000e+00> : vector<64x64xf32>
    %6 = tpu.matmul %3, %5, %cst_5 {dimension_numbers = #tpu.dot_dimension_numbers<[1], [0], [0], [1], [0, 0, 1, 1], [], []>} : vector<64x9xbf16>, vector<9x64xbf16>, vector<64x64xf32> -> vector<64x64xf32>
    %7 = arith.addf %2, %6 : vector<64x64xf32>
    %8 = vector.extract_strided_slice %1 {offsets = [1, 0], sizes = [64, 9], strides = [1, 1]} : vector<68x9xbf16> to vector<64x9xbf16>
    %c1 = arith.constant 1 : index
    %c0_6 = arith.constant 0 : index
    %c0_7 = arith.constant 0 : index
    %9 = vector.load %arg2[%c1, %c0_6, %c0_7] : memref<5x9x64xbf16, #tpu.memory_space<vmem>>, vector<1x9x64xbf16>
    %10 = vector.shape_cast %9 : vector<1x9x64xbf16> to vector<9x64xbf16>
    %cst_8 = arith.constant dense<0.000000e+00> : vector<64x64xf32>
    %11 = tpu.matmul %8, %10, %cst_8 {dimension_numbers = #tpu.dot_dimension_numbers<[1], [0], [0], [1], [0, 0, 1, 1], [], []>} : vector<64x9xbf16>, vector<9x64xbf16>, vector<64x64xf32> -> vector<64x64xf32>
    %12 = arith.addf %7, %11 : vector<64x64xf32>
    %13 = vector.extract_strided_slice %1 {offsets = [2, 0], sizes = [64, 9], strides = [1, 1]} : vector<68x9xbf16> to vector<64x9xbf16>
    %c2 = arith.constant 2 : index
    %c0_9 = arith.constant 0 : index
    %c0_10 = arith.constant 0 : index
    %14 = vector.load %arg2[%c2, %c0_9, %c0_10] : memref<5x9x64xbf16, #tpu.memory_space<vmem>>, vector<1x9x64xbf16>
    %15 = vector.shape_cast %14 : vector<1x9x64xbf16> to vector<9x64xbf16>
    %cst_11 = arith.constant dense<0.000000e+00> : vector<64x64xf32>
    %16 = tpu.matmul %13, %15, %cst_11 {dimension_numbers = #tpu.dot_dimension_numbers<[1], [0], [0], [1], [0, 0, 1, 1], [], []>} : vector<64x9xbf16>, vector<9x64xbf16>, vector<64x64xf32> -> vector<64x64xf32>
    %17 = arith.addf %12, %16 : vector<64x64xf32>
    %18 = vector.extract_strided_slice %1 {offsets = [3, 0], sizes = [64, 9], strides = [1, 1]} : vector<68x9xbf16> to vector<64x9xbf16>
    %c3 = arith.constant 3 : index
    %c0_12 = arith.constant 0 : index
    %c0_13 = arith.constant 0 : index
    %19 = vector.load %arg2[%c3, %c0_12, %c0_13] : memref<5x9x64xbf16, #tpu.memory_space<vmem>>, vector<1x9x64xbf16>
    %20 = vector.shape_cast %19 : vector<1x9x64xbf16> to vector<9x64xbf16>
    %cst_14 = arith.constant dense<0.000000e+00> : vector<64x64xf32>
    %21 = tpu.matmul %18, %20, %cst_14 {dimension_numbers = #tpu.dot_dimension_numbers<[1], [0], [0], [1], [0, 0, 1, 1], [], []>} : vector<64x9xbf16>, vector<9x64xbf16>, vector<64x64xf32> -> vector<64x64xf32>
    %22 = arith.addf %17, %21 : vector<64x64xf32>
    %23 = vector.extract_strided_slice %1 {offsets = [4, 0], sizes = [64, 9], strides = [1, 1]} : vector<68x9xbf16> to vector<64x9xbf16>
    %c4 = arith.constant 4 : index
    %c0_15 = arith.constant 0 : index
    %c0_16 = arith.constant 0 : index
    %24 = vector.load %arg2[%c4, %c0_15, %c0_16] : memref<5x9x64xbf16, #tpu.memory_space<vmem>>, vector<1x9x64xbf16>
    %25 = vector.shape_cast %24 : vector<1x9x64xbf16> to vector<9x64xbf16>
    %cst_17 = arith.constant dense<0.000000e+00> : vector<64x64xf32>
    %26 = tpu.matmul %23, %25, %cst_17 {dimension_numbers = #tpu.dot_dimension_numbers<[1], [0], [0], [1], [0, 0, 1, 1], [], []>} : vector<64x9xbf16>, vector<9x64xbf16>, vector<64x64xf32> -> vector<64x64xf32>
    %27 = arith.addf %22, %26 : vector<64x64xf32>
    %c0_18 = arith.constant 0 : index
    %c0_19 = arith.constant 0 : index
    %28 = vector.load %arg3[%c0_18, %c0_19] : memref<1x64xf32, #tpu.memory_space<vmem>>, vector<1x64xf32>
    %29 = vector.broadcast %28 : vector<1x64xf32> to vector<64x64xf32>
    %30 = arith.addf %27, %29 : vector<64x64xf32>
    %cst_20 = arith.constant 2.000000e-01 : f32
    %31 = vector.broadcast %cst_20 : f32 to vector<64x64xf32>
    %32 = arith.mulf %31, %30 : vector<64x64xf32>
    %33 = arith.maximumf %30, %32 : vector<64x64xf32>
    %c0_21 = arith.constant 0 : index
    %c0_22 = arith.constant 0 : index
    %c0_23 = arith.constant 0 : index
    %34 = vector.load %arg4[%c0_21, %c0_22, %c0_23] : memref<1x64x64xf32, #tpu.memory_space<vmem>>, vector<1x64x64xf32>
    %35 = vector.shape_cast %34 : vector<1x64x64xf32> to vector<64x64xf32>
    %36 = vector.shape_cast %33 : vector<64x64xf32> to vector<1x64x64xf32>
    tpu.vector_store %arg4[%c0_21, %c0_22, %c0_23], %36 {strides = array<i32>} : memref<1x64x64xf32, #tpu.memory_space<vmem>>, vector<1x64x64xf32>,
    return
  }
  func.func @transform_0(%arg0: i32) -> (i32, i32, i32) {
    %c0_i32 = arith.constant 0 : i32
    %c0_i32_0 = arith.constant 0 : i32
    %c0_i32_1 = arith.constant 0 : i32
    return %arg0, %c0_i32, %c0_i32_0 : i32, i32, i32
  }
  func.func @transform_1(%arg0: i32) -> (i32, i32, i32) {
    %c0_i32 = arith.constant 0 : i32
    %c0_i32_0 = arith.constant 0 : i32
    %c0_i32_1 = arith.constant 0 : i32
    %c0_i32_2 = arith.constant 0 : i32
    return %c0_i32, %c0_i32_0, %c0_i32_1 : i32, i32, i32
  }
  func.func @transform_2(%arg0: i32) -> (i32, i32) {
    %c0_i32 = arith.constant 0 : i32
    %c0_i32_0 = arith.constant 0 : i32
    %c0_i32_1 = arith.constant 0 : i32
    return %c0_i32, %c0_i32_0 : i32, i32
  }
  func.func @transform_3(%arg0: i32) -> (i32, i32, i32) {
    %c0_i32 = arith.constant 0 : i32
    %c0_i32_0 = arith.constant 0 : i32
    %c0_i32_1 = arith.constant 0 : i32
    return %arg0, %c0_i32, %c0_i32_0 : i32, i32, i32
  }
}

module attributes {stable_mosaic.version = 11 : i64} {
  func.func @ga_conv_kernel(%arg0: i32, %arg1: memref<1x68x64xbf16, #tpu.memory_space<vmem>>, %arg2: memref<5x64x64xbf16, #tpu.memory_space<vmem>>, %arg3: memref<1x64xf32, #tpu.memory_space<vmem>>, %arg4: memref<1x64x64xf32, #tpu.memory_space<vmem>>) attributes {dimension_semantics = [#tpu.dimension_semantics<parallel>], iteration_bounds = array<i64: 2>, scalar_prefetch = 0 : i64, scratch_operands = 0 : i64, tpu.core_type = #tpu.core_type<tc>, window_params = [{transform_indices = @transform_0, window_bounds = array<i64: 1, 68, 64>}, {pipeline_mode = #tpu.pipeline_mode<synchronous>, transform_indices = @transform_1, window_bounds = array<i64: 5, 64, 64>}, {pipeline_mode = #tpu.pipeline_mode<synchronous>, transform_indices = @transform_2, window_bounds = array<i64: 1, 64>}, {transform_indices = @transform_3, window_bounds = array<i64: 1, 64, 64>}]} {
    %c0 = arith.constant 0 : index
    %c0_0 = arith.constant 0 : index
    %c0_1 = arith.constant 0 : index
    %0 = vector.load %arg1[%c0, %c0_0, %c0_1] : memref<1x68x64xbf16, #tpu.memory_space<vmem>>, vector<1x68x64xbf16>
    %1 = vector.shape_cast %0 : vector<1x68x64xbf16> to vector<68x64xbf16>
    %cst = arith.constant 0.000000e+00 : f32
    %2 = vector.broadcast %cst : f32 to vector<64x64xf32>
    %3 = vector.extract_strided_slice %1 {offsets = [0, 0], sizes = [64, 64], strides = [1, 1]} : vector<68x64xbf16> to vector<64x64xbf16>
    %c0_2 = arith.constant 0 : index
    %c0_3 = arith.constant 0 : index
    %c0_4 = arith.constant 0 : index
    %4 = vector.load %arg2[%c0_2, %c0_3, %c0_4] : memref<5x64x64xbf16, #tpu.memory_space<vmem>>, vector<1x64x64xbf16>
    %5 = vector.shape_cast %4 : vector<1x64x64xbf16> to vector<64x64xbf16>
    %cst_5 = arith.constant dense<0.000000e+00> : vector<64x64xf32>
    %6 = tpu.matmul %3, %5, %cst_5 {dimension_numbers = #tpu.dot_dimension_numbers<[1], [0], [0], [1], [0, 0, 1, 1], [], []>} : vector<64x64xbf16>, vector<64x64xbf16>, vector<64x64xf32> -> vector<64x64xf32>
    %7 = arith.addf %2, %6 : vector<64x64xf32>
    %8 = vector.extract_strided_slice %1 {offsets = [1, 0], sizes = [64, 64], strides = [1, 1]} : vector<68x64xbf16> to vector<64x64xbf16>
    %c1 = arith.constant 1 : index
    %c0_6 = arith.constant 0 : index
    %c0_7 = arith.constant 0 : index
    %9 = vector.load %arg2[%c1, %c0_6, %c0_7] : memref<5x64x64xbf16, #tpu.memory_space<vmem>>, vector<1x64x64xbf16>
    %10 = vector.shape_cast %9 : vector<1x64x64xbf16> to vector<64x64xbf16>
    %cst_8 = arith.constant dense<0.000000e+00> : vector<64x64xf32>
    %11 = tpu.matmul %8, %10, %cst_8 {dimension_numbers = #tpu.dot_dimension_numbers<[1], [0], [0], [1], [0, 0, 1, 1], [], []>} : vector<64x64xbf16>, vector<64x64xbf16>, vector<64x64xf32> -> vector<64x64xf32>
    %12 = arith.addf %7, %11 : vector<64x64xf32>
    %13 = vector.extract_strided_slice %1 {offsets = [2, 0], sizes = [64, 64], strides = [1, 1]} : vector<68x64xbf16> to vector<64x64xbf16>
    %c2 = arith.constant 2 : index
    %c0_9 = arith.constant 0 : index
    %c0_10 = arith.constant 0 : index
    %14 = vector.load %arg2[%c2, %c0_9, %c0_10] : memref<5x64x64xbf16, #tpu.memory_space<vmem>>, vector<1x64x64xbf16>
    %15 = vector.shape_cast %14 : vector<1x64x64xbf16> to vector<64x64xbf16>
    %cst_11 = arith.constant dense<0.000000e+00> : vector<64x64xf32>
    %16 = tpu.matmul %13, %15, %cst_11 {dimension_numbers = #tpu.dot_dimension_numbers<[1], [0], [0], [1], [0, 0, 1, 1], [], []>} : vector<64x64xbf16>, vector<64x64xbf16>, vector<64x64xf32> -> vector<64x64xf32>
    %17 = arith.addf %12, %16 : vector<64x64xf32>
    %18 = vector.extract_strided_slice %1 {offsets = [3, 0], sizes = [64, 64], strides = [1, 1]} : vector<68x64xbf16> to vector<64x64xbf16>
    %c3 = arith.constant 3 : index
    %c0_12 = arith.constant 0 : index
    %c0_13 = arith.constant 0 : index
    %19 = vector.load %arg2[%c3, %c0_12, %c0_13] : memref<5x64x64xbf16, #tpu.memory_space<vmem>>, vector<1x64x64xbf16>
    %20 = vector.shape_cast %19 : vector<1x64x64xbf16> to vector<64x64xbf16>
    %cst_14 = arith.constant dense<0.000000e+00> : vector<64x64xf32>
    %21 = tpu.matmul %18, %20, %cst_14 {dimension_numbers = #tpu.dot_dimension_numbers<[1], [0], [0], [1], [0, 0, 1, 1], [], []>} : vector<64x64xbf16>, vector<64x64xbf16>, vector<64x64xf32> -> vector<64x64xf32>
    %22 = arith.addf %17, %21 : vector<64x64xf32>
    %23 = vector.extract_strided_slice %1 {offsets = [4, 0], sizes = [64, 64], strides = [1, 1]} : vector<68x64xbf16> to vector<64x64xbf16>
    %c4 = arith.constant 4 : index
    %c0_15 = arith.constant 0 : index
    %c0_16 = arith.constant 0 : index
    %24 = vector.load %arg2[%c4, %c0_15, %c0_16] : memref<5x64x64xbf16, #tpu.memory_space<vmem>>, vector<1x64x64xbf16>
    %25 = vector.shape_cast %24 : vector<1x64x64xbf16> to vector<64x64xbf16>
    %cst_17 = arith.constant dense<0.000000e+00> : vector<64x64xf32>
    %26 = tpu.matmul %23, %25, %cst_17 {dimension_numbers = #tpu.dot_dimension_numbers<[1], [0], [0], [1], [0, 0, 1, 1], [], []>} : vector<64x64xbf16>, vector<64x64xbf16>, vector<64x64xf32> -> vector<64x64xf32>
    %27 = arith.addf %22, %26 : vector<64x64xf32>
    %c0_18 = arith.constant 0 : index
    %c0_19 = arith.constant 0 : index
    %28 = vector.load %arg3[%c0_18, %c0_19] : memref<1x64xf32, #tpu.memory_space<vmem>>, vector<1x64xf32>
    %29 = vector.broadcast %28 : vector<1x64xf32> to vector<64x64xf32>
    %30 = arith.addf %27, %29 : vector<64x64xf32>
    %cst_20 = arith.constant 2.000000e-01 : f32
    %31 = vector.broadcast %cst_20 : f32 to vector<64x64xf32>
    %32 = arith.mulf %31, %30 : vector<64x64xf32>
    %33 = arith.maximumf %30, %32 : vector<64x64xf32>
    %c0_21 = arith.constant 0 : index
    %c0_22 = arith.constant 0 : index
    %c0_23 = arith.constant 0 : index
    %34 = vector.load %arg4[%c0_21, %c0_22, %c0_23] : memref<1x64x64xf32, #tpu.memory_space<vmem>>, vector<1x64x64xf32>
    %35 = vector.shape_cast %34 : vector<1x64x64xf32> to vector<64x64xf32>
    %36 = vector.shape_cast %33 : vector<64x64xf32> to vector<1x64x64xf32>
    tpu.vector_store %arg4[%c0_21, %c0_22, %c0_23], %36 {strides = array<i32>} : memref<1x64x64xf32, #tpu.memory_space<vmem>>, vector<1x64x64xf32>,
    return
  }
  func.func @transform_0(%arg0: i32) -> (i32, i32, i32) {
    %c0_i32 = arith.constant 0 : i32
    %c0_i32_0 = arith.constant 0 : i32
    %c0_i32_1 = arith.constant 0 : i32
    return %arg0, %c0_i32, %c0_i32_0 : i32, i32, i32
  }
  func.func @transform_1(%arg0: i32) -> (i32, i32, i32) {
    %c0_i32 = arith.constant 0 : i32
    %c0_i32_0 = arith.constant 0 : i32
    %c0_i32_1 = arith.constant 0 : i32
    %c0_i32_2 = arith.constant 0 : i32
    return %c0_i32, %c0_i32_0, %c0_i32_1 : i32, i32, i32
  }
  func.func @transform_2(%arg0: i32) -> (i32, i32) {
    %c0_i32 = arith.constant 0 : i32
    %c0_i32_0 = arith.constant 0 : i32
    %c0_i32_1 = arith.constant 0 : i32
    return %c0_i32, %c0_i32_0 : i32, i32
  }
  func.func @transform_3(%arg0: i32) -> (i32, i32, i32) {
    %c0_i32 = arith.constant 0 : i32
    %c0_i32_0 = arith.constant 0 : i32
    %c0_i32_1 = arith.constant 0 : i32
    return %arg0, %c0_i32, %c0_i32_0 : i32, i32, i32
  }
}

module attributes {stable_mosaic.version = 11 : i64} {
  func.func @emb_kernel(%arg0: i32, %arg1: i32, %arg2: memref<1x32x64xbf16, #tpu.memory_space<vmem>>, %arg3: memref<1x32x64xbf16, #tpu.memory_space<vmem>>, %arg4: memref<1x32x64xbf16, #tpu.memory_space<vmem>>, %arg5: memref<192x1024xbf16, #tpu.memory_space<vmem>>, %arg6: memref<1x1024xf32, #tpu.memory_space<vmem>>, %arg7: memref<1x1x1024xf32, #tpu.memory_space<vmem>>) attributes {dimension_semantics = [#tpu.dimension_semantics<parallel>, #tpu.dimension_semantics<arbitrary>], iteration_bounds = array<i64: 2, 2>, scalar_prefetch = 0 : i64, scratch_operands = 0 : i64, tpu.core_type = #tpu.core_type<tc>, window_params = [{transform_indices = @transform_0, window_bounds = array<i64: 1, 32, 64>}, {transform_indices = @transform_1, window_bounds = array<i64: 1, 32, 64>}, {transform_indices = @transform_2, window_bounds = array<i64: 1, 32, 64>}, {pipeline_mode = #tpu.pipeline_mode<synchronous>, transform_indices = @transform_3, window_bounds = array<i64: 192, 1024>}, {pipeline_mode = #tpu.pipeline_mode<synchronous>, transform_indices = @transform_4, window_bounds = array<i64: 1, 1024>}, {transform_indices = @transform_5, window_bounds = array<i64: 1, 1, 1024>}]} {
    %c0 = arith.constant 0 : index
    %c0_0 = arith.constant 0 : index
    %c0_1 = arith.constant 0 : index
    %0 = vector.load %arg2[%c0, %c0_0, %c0_1] : memref<1x32x64xbf16, #tpu.memory_space<vmem>>, vector<1x32x64xbf16>
    %1 = vector.shape_cast %0 : vector<1x32x64xbf16> to vector<32x64xbf16>
    %c0_2 = arith.constant 0 : index
    %c0_3 = arith.constant 0 : index
    %2 = vector.load %arg5[%c0_2, %c0_3] : memref<192x1024xbf16, #tpu.memory_space<vmem>>, vector<64x1024xbf16>
    %cst = arith.constant dense<0.000000e+00> : vector<32x1024xf32>
    %3 = tpu.matmul %1, %2, %cst {dimension_numbers = #tpu.dot_dimension_numbers<[1], [0], [0], [1], [0, 0, 1, 1], [], []>} : vector<32x64xbf16>, vector<64x1024xbf16>, vector<32x1024xf32> -> vector<32x1024xf32>
    %c0_4 = arith.constant 0 : index
    %c0_5 = arith.constant 0 : index
    %c0_6 = arith.constant 0 : index
    %4 = vector.load %arg3[%c0_4, %c0_5, %c0_6] : memref<1x32x64xbf16, #tpu.memory_space<vmem>>, vector<1x32x64xbf16>
    %5 = vector.shape_cast %4 : vector<1x32x64xbf16> to vector<32x64xbf16>
    %c64 = arith.constant 64 : index
    %c0_7 = arith.constant 0 : index
    %6 = vector.load %arg5[%c64, %c0_7] : memref<192x1024xbf16, #tpu.memory_space<vmem>>, vector<64x1024xbf16>
    %cst_8 = arith.constant dense<0.000000e+00> : vector<32x1024xf32>
    %7 = tpu.matmul %5, %6, %cst_8 {dimension_numbers = #tpu.dot_dimension_numbers<[1], [0], [0], [1], [0, 0, 1, 1], [], []>} : vector<32x64xbf16>, vector<64x1024xbf16>, vector<32x1024xf32> -> vector<32x1024xf32>
    %8 = arith.addf %3, %7 : vector<32x1024xf32>
    %c0_9 = arith.constant 0 : index
    %c0_10 = arith.constant 0 : index
    %c0_11 = arith.constant 0 : index
    %9 = vector.load %arg4[%c0_9, %c0_10, %c0_11] : memref<1x32x64xbf16, #tpu.memory_space<vmem>>, vector<1x32x64xbf16>
    %10 = vector.shape_cast %9 : vector<1x32x64xbf16> to vector<32x64xbf16>
    %c128 = arith.constant 128 : index
    %c0_12 = arith.constant 0 : index
    %11 = vector.load %arg5[%c128, %c0_12] : memref<192x1024xbf16, #tpu.memory_space<vmem>>, vector<64x1024xbf16>
    %cst_13 = arith.constant dense<0.000000e+00> : vector<32x1024xf32>
    %12 = tpu.matmul %10, %11, %cst_13 {dimension_numbers = #tpu.dot_dimension_numbers<[1], [0], [0], [1], [0, 0, 1, 1], [], []>} : vector<32x64xbf16>, vector<64x1024xbf16>, vector<32x1024xf32> -> vector<32x1024xf32>
    %13 = arith.addf %8, %12 : vector<32x1024xf32>
    %c0_14 = arith.constant 0 : index
    %c0_15 = arith.constant 0 : index
    %14 = vector.load %arg6[%c0_14, %c0_15] : memref<1x1024xf32, #tpu.memory_space<vmem>>, vector<1x1024xf32>
    %15 = vector.broadcast %14 : vector<1x1024xf32> to vector<32x1024xf32>
    %16 = arith.addf %13, %15 : vector<32x1024xf32>
    %cst_16 = arith.constant 2.000000e-01 : f32
    %17 = vector.broadcast %cst_16 : f32 to vector<32x1024xf32>
    %18 = arith.mulf %17, %16 : vector<32x1024xf32>
    %19 = arith.maximumf %16, %18 : vector<32x1024xf32>
    %cst_17 = arith.constant dense<0xFF800000> : vector<1024xf32>
    %20 = vector.multi_reduction <maximumf>, %19, %cst_17 [0] : vector<32x1024xf32> to vector<1024xf32>
    %21 = vector.shape_cast %20 : vector<1024xf32> to vector<1x1x1024xf32>
    %c0_i32 = arith.constant 0 : i32
    %22 = arith.cmpi eq, %arg1, %c0_i32 : i32
    %23 = arith.extui %22 : i1 to i32
    %c0_i32_18 = arith.constant 0 : i32
    %24 = arith.cmpi ne, %23, %c0_i32_18 : i32
    scf.if %24 {
      %c0_21 = arith.constant 0 : index
      %c0_22 = arith.constant 0 : index
      %c0_23 = arith.constant 0 : index
      %28 = vector.load %arg7[%c0_21, %c0_22, %c0_23] : memref<1x1x1024xf32, #tpu.memory_space<vmem>>, vector<1x1x1024xf32>
      tpu.vector_store %arg7[%c0_21, %c0_22, %c0_23], %21 {strides = array<i32>} : memref<1x1x1024xf32, #tpu.memory_space<vmem>>, vector<1x1x1024xf32>,
    } else {
    }
    %c0_i32_19 = arith.constant 0 : i32
    %25 = arith.cmpi sgt, %arg1, %c0_i32_19 : i32
    %26 = arith.extui %25 : i1 to i32
    %c0_i32_20 = arith.constant 0 : i32
    %27 = arith.cmpi ne, %26, %c0_i32_20 : i32
    scf.if %27 {
      %c0_21 = arith.constant 0 : index
      %c0_22 = arith.constant 0 : index
      %c0_23 = arith.constant 0 : index
      %28 = vector.load %arg7[%c0_21, %c0_22, %c0_23] : memref<1x1x1024xf32, #tpu.memory_space<vmem>>, vector<1x1x1024xf32>
      %29 = arith.maximumf %28, %21 : vector<1x1x1024xf32>
      %c0_24 = arith.constant 0 : index
      %c0_25 = arith.constant 0 : index
      %c0_26 = arith.constant 0 : index
      %30 = vector.load %arg7[%c0_24, %c0_25, %c0_26] : memref<1x1x1024xf32, #tpu.memory_space<vmem>>, vector<1x1x1024xf32>
      tpu.vector_store %arg7[%c0_24, %c0_25, %c0_26], %29 {strides = array<i32>} : memref<1x1x1024xf32, #tpu.memory_space<vmem>>, vector<1x1x1024xf32>,
    } else {
    }
    return
  }
  func.func @transform_0(%arg0: i32, %arg1: i32) -> (i32, i32, i32) {
    %c0_i32 = arith.constant 0 : i32
    %c0_i32_0 = arith.constant 0 : i32
    return %arg0, %arg1, %c0_i32 : i32, i32, i32
  }
  func.func @transform_1(%arg0: i32, %arg1: i32) -> (i32, i32, i32) {
    %c0_i32 = arith.constant 0 : i32
    %c0_i32_0 = arith.constant 0 : i32
    return %arg0, %arg1, %c0_i32 : i32, i32, i32
  }
  func.func @transform_2(%arg0: i32, %arg1: i32) -> (i32, i32, i32) {
    %c0_i32 = arith.constant 0 : i32
    %c0_i32_0 = arith.constant 0 : i32
    return %arg0, %arg1, %c0_i32 : i32, i32, i32
  }
  func.func @transform_3(%arg0: i32, %arg1: i32) -> (i32, i32) {
    %c0_i32 = arith.constant 0 : i32
    %c0_i32_0 = arith.constant 0 : i32
    %c0_i32_1 = arith.constant 0 : i32
    return %c0_i32, %c0_i32_0 : i32, i32
  }
  func.func @transform_4(%arg0: i32, %arg1: i32) -> (i32, i32) {
    %c0_i32 = arith.constant 0 : i32
    %c0_i32_0 = arith.constant 0 : i32
    %c0_i32_1 = arith.constant 0 : i32
    return %c0_i32, %c0_i32_0 : i32, i32
  }
  func.func @transform_5(%arg0: i32, %arg1: i32) -> (i32, i32, i32) {
    %c0_i32 = arith.constant 0 : i32
    %c0_i32_0 = arith.constant 0 : i32
    %c0_i32_1 = arith.constant 0 : i32
    return %arg0, %c0_i32, %c0_i32_0 : i32, i32, i32
  }
}

module attributes {stable_mosaic.version = 11 : i64} {
  func.func @head_kernel(%arg0: i32, %arg1: i32, %arg2: memref<1x1x1024xf32, #tpu.memory_space<vmem>>, %arg3: memref<1x32x64xbf16, #tpu.memory_space<vmem>>, %arg4: memref<1x32x64xbf16, #tpu.memory_space<vmem>>, %arg5: memref<1x32x64xbf16, #tpu.memory_space<vmem>>, %arg6: memref<1024x512xbf16, #tpu.memory_space<vmem>>, %arg7: memref<192x512xbf16, #tpu.memory_space<vmem>>, %arg8: memref<1x512xf32, #tpu.memory_space<vmem>>, %arg9: memref<512x256xbf16, #tpu.memory_space<vmem>>, %arg10: memref<1x256xf32, #tpu.memory_space<vmem>>, %arg11: memref<256x13xbf16, #tpu.memory_space<vmem>>, %arg12: memref<1x32x13xf32, #tpu.memory_space<vmem>>) attributes {dimension_semantics = [#tpu.dimension_semantics<parallel>, #tpu.dimension_semantics<parallel>], iteration_bounds = array<i64: 2, 2>, scalar_prefetch = 0 : i64, scratch_operands = 0 : i64, tpu.core_type = #tpu.core_type<tc>, window_params = [{transform_indices = @transform_0, window_bounds = array<i64: 1, 1, 1024>}, {transform_indices = @transform_1, window_bounds = array<i64: 1, 32, 64>}, {transform_indices = @transform_2, window_bounds = array<i64: 1, 32, 64>}, {transform_indices = @transform_3, window_bounds = array<i64: 1, 32, 64>}, {pipeline_mode = #tpu.pipeline_mode<synchronous>, transform_indices = @transform_4, window_bounds = array<i64: 1024, 512>}, {pipeline_mode = #tpu.pipeline_mode<synchronous>, transform_indices = @transform_5, window_bounds = array<i64: 192, 512>}, {pipeline_mode = #tpu.pipeline_mode<synchronous>, transform_indices = @transform_6, window_bounds = array<i64: 1, 512>}, {pipeline_mode = #tpu.pipeline_mode<synchronous>, transform_indices = @transform_7, window_bounds = array<i64: 512, 256>}, {pipeline_mode = #tpu.pipeline_mode<synchronous>, transform_indices = @transform_8, window_bounds = array<i64: 1, 256>}, {pipeline_mode = #tpu.pipeline_mode<synchronous>, transform_indices = @transform_9, window_bounds = array<i64: 256, 13>}, {transform_indices = @transform_10, window_bounds = array<i64: 1, 32, 13>}]} {
    %c0 = arith.constant 0 : index
    %c0_0 = arith.constant 0 : index
    %c0_1 = arith.constant 0 : index
    %0 = vector.load %arg2[%c0, %c0_0, %c0_1] : memref<1x1x1024xf32, #tpu.memory_space<vmem>>, vector<1x1x1024xf32>
    %1 = vector.shape_cast %0 : vector<1x1x1024xf32> to vector<1x1024xf32>
    %c0_2 = arith.constant 0 : index
    %c0_3 = arith.constant 0 : index
    %2 = vector.load %arg6[%c0_2, %c0_3] : memref<1024x512xbf16, #tpu.memory_space<vmem>>, vector<1024x512xbf16>
    %3 = arith.truncf %1 : vector<1x1024xf32> to vector<1x1024xbf16>
    %cst = arith.constant dense<0.000000e+00> : vector<1x512xf32>
    %4 = tpu.matmul %3, %2, %cst {dimension_numbers = #tpu.dot_dimension_numbers<[1], [0], [0], [1], [0, 0, 1, 1], [], []>} : vector<1x1024xbf16>, vector<1024x512xbf16>, vector<1x512xf32> -> vector<1x512xf32>
    %c0_4 = arith.constant 0 : index
    %c0_5 = arith.constant 0 : index
    %c0_6 = arith.constant 0 : index
    %5 = vector.load %arg3[%c0_4, %c0_5, %c0_6] : memref<1x32x64xbf16, #tpu.memory_space<vmem>>, vector<1x32x64xbf16>
    %6 = vector.shape_cast %5 : vector<1x32x64xbf16> to vector<32x64xbf16>
    %c0_7 = arith.constant 0 : index
    %c0_8 = arith.constant 0 : index
    %7 = vector.load %arg7[%c0_7, %c0_8] : memref<192x512xbf16, #tpu.memory_space<vmem>>, vector<64x512xbf16>
    %cst_9 = arith.constant dense<0.000000e+00> : vector<32x512xf32>
    %8 = tpu.matmul %6, %7, %cst_9 {dimension_numbers = #tpu.dot_dimension_numbers<[1], [0], [0], [1], [0, 0, 1, 1], [], []>} : vector<32x64xbf16>, vector<64x512xbf16>, vector<32x512xf32> -> vector<32x512xf32>
    %c0_10 = arith.constant 0 : index
    %c0_11 = arith.constant 0 : index
    %c0_12 = arith.constant 0 : index
    %9 = vector.load %arg4[%c0_10, %c0_11, %c0_12] : memref<1x32x64xbf16, #tpu.memory_space<vmem>>, vector<1x32x64xbf16>
    %10 = vector.shape_cast %9 : vector<1x32x64xbf16> to vector<32x64xbf16>
    %c64 = arith.constant 64 : index
    %c0_13 = arith.constant 0 : index
    %11 = vector.load %arg7[%c64, %c0_13] : memref<192x512xbf16, #tpu.memory_space<vmem>>, vector<64x512xbf16>
    %cst_14 = arith.constant dense<0.000000e+00> : vector<32x512xf32>
    %12 = tpu.matmul %10, %11, %cst_14 {dimension_numbers = #tpu.dot_dimension_numbers<[1], [0], [0], [1], [0, 0, 1, 1], [], []>} : vector<32x64xbf16>, vector<64x512xbf16>, vector<32x512xf32> -> vector<32x512xf32>
    %13 = arith.addf %8, %12 : vector<32x512xf32>
    %c0_15 = arith.constant 0 : index
    %c0_16 = arith.constant 0 : index
    %c0_17 = arith.constant 0 : index
    %14 = vector.load %arg5[%c0_15, %c0_16, %c0_17] : memref<1x32x64xbf16, #tpu.memory_space<vmem>>, vector<1x32x64xbf16>
    %15 = vector.shape_cast %14 : vector<1x32x64xbf16> to vector<32x64xbf16>
    %c128 = arith.constant 128 : index
    %c0_18 = arith.constant 0 : index
    %16 = vector.load %arg7[%c128, %c0_18] : memref<192x512xbf16, #tpu.memory_space<vmem>>, vector<64x512xbf16>
    %cst_19 = arith.constant dense<0.000000e+00> : vector<32x512xf32>
    %17 = tpu.matmul %15, %16, %cst_19 {dimension_numbers = #tpu.dot_dimension_numbers<[1], [0], [0], [1], [0, 0, 1, 1], [], []>} : vector<32x64xbf16>, vector<64x512xbf16>, vector<32x512xf32> -> vector<32x512xf32>
    %18 = arith.addf %13, %17 : vector<32x512xf32>
    %19 = vector.broadcast %4 : vector<1x512xf32> to vector<32x512xf32>
    %20 = arith.addf %18, %19 : vector<32x512xf32>
    %c0_20 = arith.constant 0 : index
    %c0_21 = arith.constant 0 : index
    %21 = vector.load %arg8[%c0_20, %c0_21] : memref<1x512xf32, #tpu.memory_space<vmem>>, vector<1x512xf32>
    %22 = vector.broadcast %21 : vector<1x512xf32> to vector<32x512xf32>
    %23 = arith.addf %20, %22 : vector<32x512xf32>
    %cst_22 = arith.constant 2.000000e-01 : f32
    %24 = vector.broadcast %cst_22 : f32 to vector<32x512xf32>
    %25 = arith.mulf %24, %23 : vector<32x512xf32>
    %26 = arith.maximumf %23, %25 : vector<32x512xf32>
    %c0_23 = arith.constant 0 : index
    %c0_24 = arith.constant 0 : index
    %27 = vector.load %arg9[%c0_23, %c0_24] : memref<512x256xbf16, #tpu.memory_space<vmem>>, vector<512x256xbf16>
    %28 = arith.truncf %26 : vector<32x512xf32> to vector<32x512xbf16>
    %cst_25 = arith.constant dense<0.000000e+00> : vector<32x256xf32>
    %29 = tpu.matmul %28, %27, %cst_25 {dimension_numbers = #tpu.dot_dimension_numbers<[1], [0], [0], [1], [0, 0, 1, 1], [], []>} : vector<32x512xbf16>, vector<512x256xbf16>, vector<32x256xf32> -> vector<32x256xf32>
    %c0_26 = arith.constant 0 : index
    %c0_27 = arith.constant 0 : index
    %30 = vector.load %arg10[%c0_26, %c0_27] : memref<1x256xf32, #tpu.memory_space<vmem>>, vector<1x256xf32>
    %31 = vector.broadcast %30 : vector<1x256xf32> to vector<32x256xf32>
    %32 = arith.addf %29, %31 : vector<32x256xf32>
    %cst_28 = arith.constant 2.000000e-01 : f32
    %33 = vector.broadcast %cst_28 : f32 to vector<32x256xf32>
    %34 = arith.mulf %33, %32 : vector<32x256xf32>
    %35 = arith.maximumf %32, %34 : vector<32x256xf32>
    %c0_29 = arith.constant 0 : index
    %c0_30 = arith.constant 0 : index
    %36 = vector.load %arg11[%c0_29, %c0_30] : memref<256x13xbf16, #tpu.memory_space<vmem>>, vector<256x13xbf16>
    %37 = arith.truncf %35 : vector<32x256xf32> to vector<32x256xbf16>
    %cst_31 = arith.constant dense<0.000000e+00> : vector<32x13xf32>
    %38 = tpu.matmul %37, %36, %cst_31 {dimension_numbers = #tpu.dot_dimension_numbers<[1], [0], [0], [1], [0, 0, 1, 1], [], []>} : vector<32x256xbf16>, vector<256x13xbf16>, vector<32x13xf32> -> vector<32x13xf32>
    %c0_32 = arith.constant 0 : index
    %c0_33 = arith.constant 0 : index
    %c0_34 = arith.constant 0 : index
    %39 = vector.load %arg12[%c0_32, %c0_33, %c0_34] : memref<1x32x13xf32, #tpu.memory_space<vmem>>, vector<1x32x13xf32>
    %40 = vector.shape_cast %39 : vector<1x32x13xf32> to vector<32x13xf32>
    %41 = vector.shape_cast %38 : vector<32x13xf32> to vector<1x32x13xf32>
    tpu.vector_store %arg12[%c0_32, %c0_33, %c0_34], %41 {strides = array<i32>} : memref<1x32x13xf32, #tpu.memory_space<vmem>>, vector<1x32x13xf32>,
    return
  }
  func.func @transform_0(%arg0: i32, %arg1: i32) -> (i32, i32, i32) {
    %c0_i32 = arith.constant 0 : i32
    %c0_i32_0 = arith.constant 0 : i32
    %c0_i32_1 = arith.constant 0 : i32
    return %arg0, %c0_i32, %c0_i32_0 : i32, i32, i32
  }
  func.func @transform_1(%arg0: i32, %arg1: i32) -> (i32, i32, i32) {
    %c0_i32 = arith.constant 0 : i32
    %c0_i32_0 = arith.constant 0 : i32
    return %arg0, %arg1, %c0_i32 : i32, i32, i32
  }
  func.func @transform_2(%arg0: i32, %arg1: i32) -> (i32, i32, i32) {
    %c0_i32 = arith.constant 0 : i32
    %c0_i32_0 = arith.constant 0 : i32
    return %arg0, %arg1, %c0_i32 : i32, i32, i32
  }
  func.func @transform_3(%arg0: i32, %arg1: i32) -> (i32, i32, i32) {
    %c0_i32 = arith.constant 0 : i32
    %c0_i32_0 = arith.constant 0 : i32
    return %arg0, %arg1, %c0_i32 : i32, i32, i32
  }
  func.func @transform_4(%arg0: i32, %arg1: i32) -> (i32, i32) {
    %c0_i32 = arith.constant 0 : i32
    %c0_i32_0 = arith.constant 0 : i32
    %c0_i32_1 = arith.constant 0 : i32
    return %c0_i32, %c0_i32_0 : i32, i32
  }
  func.func @transform_5(%arg0: i32, %arg1: i32) -> (i32, i32) {
    %c0_i32 = arith.constant 0 : i32
    %c0_i32_0 = arith.constant 0 : i32
    %c0_i32_1 = arith.constant 0 : i32
    return %c0_i32, %c0_i32_0 : i32, i32
  }
  func.func @transform_6(%arg0: i32, %arg1: i32) -> (i32, i32) {
    %c0_i32 = arith.constant 0 : i32
    %c0_i32_0 = arith.constant 0 : i32
    %c0_i32_1 = arith.constant 0 : i32
    return %c0_i32, %c0_i32_0 : i32, i32
  }
  func.func @transform_7(%arg0: i32, %arg1: i32) -> (i32, i32) {
    %c0_i32 = arith.constant 0 : i32
    %c0_i32_0 = arith.constant 0 : i32
    %c0_i32_1 = arith.constant 0 : i32
    return %c0_i32, %c0_i32_0 : i32, i32
  }
  func.func @transform_8(%arg0: i32, %arg1: i32) -> (i32, i32) {
    %c0_i32 = arith.constant 0 : i32
    %c0_i32_0 = arith.constant 0 : i32
    %c0_i32_1 = arith.constant 0 : i32
    return %c0_i32, %c0_i32_0 : i32, i32
  }
  func.func @transform_9(%arg0: i32, %arg1: i32) -> (i32, i32) {
    %c0_i32 = arith.constant 0 : i32
    %c0_i32_0 = arith.constant 0 : i32
    %c0_i32_1 = arith.constant 0 : i32
    return %c0_i32, %c0_i32_0 : i32, i32
  }
  func.func @transform_10(%arg0: i32, %arg1: i32) -> (i32, i32, i32) {
    %c0_i32 = arith.constant 0 : i32
    %c0_i32_0 = arith.constant 0 : i32
    return %arg0, %arg1, %c0_i32 : i32, i32, i32
  }
}

</mosaic_0001>

<bundles_post_ra>
// kernel: dgcnn_semseg_forward.5
= control target key start
LH: loop header
LB: loop body
LE: loop exit
PB: predicated region body
PF: predicated region fallthrough
CT: control target
= control target key end

     0   :  { %s1050_s12 = smov 0   ;;  %s1201_s0 = inlined_call_operand.vmem [shape: bf16[2,68,9], index: 0, kind: input, shape index: {}]   ;;  %s1202_s1 = inlined_call_operand.vmem [shape: bf16[5,9,64], index: 1, kind: input, shape index: {}]   ;;  %s1203_s2 = inlined_call_operand.vmem [shape: f32[1,64], index: 2, kind: input, shape index: {}]   ;;  %s1204_s3 = inlined_call_operand.vmem [shape: f32[2,64,64], index: 3, kind: output, shape index: {}]  }
   0x1 LB: > { %s842_s13 = sadd.s32 4294967295, %s1027_s12   ;;  %p846_p0 = scmp.ge.s32.totalorder %s1027_s12, 1  ;;  %s1027_s12 = sphi %s1050_s12, %s13_s12  }
   0x2   : > { %p137_p1 = scmp.lt.s32.totalorder %s1027_s12, 3 }
   0x4   : > { %p138_p2 = pnand %p846_p0, %p137_p1 }
   0x5   : > { %vm264_vm0 = vcmask (!%p138_p2), 1043456   ;;  %vm265_vm1 = vcmask (!%p138_p2), 1044480   ;;  %p161_p3 = scmp.lt.s32.totalorder (!%p138_p2), %s842_s13, 1  ;;  %v1029_v0 = vmov (!%p138_p2), 65535   ;;  %v1011_v2 = vld [vmem:[%s1202_s1 + $0x10] sm:$0x1f] (!%p138_p2)  }
   0x6   : > { %141 = sbr.rel (%p138_p2) target bundleno = 286 (0x11e), region = 32  ;;  %v266_v1 = vsel (!%p138_p2), %vm264_vm0, 4294967295, %v1029_v0  ;;  %v1012_v5 = vld [vmem:[%s1202_s1 + $0x8] sm:$0x1f] (!%p138_p2)   ;;  %vm251_vm2 = vcmask (!%p138_p2), 72704   ;;  %vm420_vm5 = vcmask (!%p138_p2), 1046528  }
   0x7   : > { %v1061_v3 = vsel (!%p138_p2), %vm265_vm1, %v266_v1, 0  ;;  %v1016_v7 = vld [vmem:[%s1202_s1] sm:$0x1f] (!%p138_p2)   ;;  %vm209_vm3 = vsmask.f32 (!%p138_p2), 7424  ;;  %vm644_vm6 = vcmask (!%p138_p2), 1045504  }
   0x8   : > { %v1066_v4 = vand.u32 (!%p138_p2), %v1011_v2, %v1061_v3  ;;  %v269_v6 = vand.u32 (!%p138_p2), %v1012_v5, %v1061_v3  ;;  %v1017_v8 = vld [vmem:[%s1202_s1 + $0x18] sm:$0x1f] (!%p138_p2)   ;;  %v350_v9 = vand.u32 (!%p138_p2), %v1016_v7, %v1061_v3  ;;  %vm526_vm4 = vsmask.f32 (!%p138_p2), 6400  ;;  %v1020_v40 = vld [vmem:[%s1202_s1 + $0x20] sm:$0x1f] (!%p138_p2)  }
   0x9   : > { %v566_v12 = vand.u32 (!%p138_p2), %v1017_v8, %v1061_v3  ;;  %v672_v51 = vand.u32 (!%p138_p2), %v1020_v40, %v1061_v3  ;;  %vm778_vm7 = vcmask (!%p138_p2), 523264  }
   0xa   : > { %937 = vmatprep.subr.bf16.mxu0 (!%p138_p2), %v1066_v4  ;;  %917 = vmatprep.subr.bf16.mxu1 (!%p138_p2), %v269_v6 }
   0xb   : > { %938 = vmatpush3.bf16.msra.mxu0 (!%p138_p2), %v1066_v4  ;;  %918 = vmatpush3.bf16.msra.mxu1 (!%p138_p2), %v269_v6 }
   0xc   : > { %927 = vmatprep.subr.bf16.mxu1 (!%p138_p2), %v350_v9  ;;  %947 = vmatprep.subr.bf16.mxu0 (!%p138_p2), %v566_v12 }
   0xd   : > { %s1206_s13 = smov (!%p161_p3, %s842_s13), 1 }
   0xe   : > { %s1001_s18 = smul.u32 36, %s1206_s13  ;;  %s891_s30 = sshll.u32 %s1206_s13, 6 }
   0xf   : > { %s1180_s6 = scalar_lea.vmem %s1204_s3, %s891_s30 }
  0x10   : > { %s1081_s23 = scalar_lea.vmem %s1201_s0, %s1001_s18 }
  0x11   : > { %v1088_v10 = vld [vmem:[%s1081_s23] sm:$0xff]   ;;  %v1091_v11 = vld [vmem:[%s1081_s23 + $0x8] sm:$0xff]   ;;  %v1095_v13 = vld [vmem:[%s1081_s23 + $0x10] sm:$0xff]  }
  0x12   : > { %v421_v14 = vrot.slane %v1088_v10, 1  ;;  %v422_v15 = vrot.slane %v1091_v11, 1  ;;  %v211_v16 = vshrl.u32 %v1088_v10, 16  ;;  %v213_v17 = vshll.u32 %v1088_v10, 16  ;;  %v1107_v25 = vld [vmem:[%s1081_s23 + $0x18] sm:$0xff]  }
  0x13   : > { %v424_v18 = vrot.slane %v1095_v13, 1  ;;  %v218_v19 = vshll.u32 %v1091_v11, 16  ;;  %v222_v20 = vshrl.u32 %v1091_v11, 16  ;;  %v226_v21 = vshll.u32 %v1095_v13, 16 }
  0x14   : > { %v423_v22 = vsel %vm420_vm5, %v421_v14, %v422_v15  ;;  %v215_v23 = vrot.slane %v213_v17, 1  ;;  %v527_v24 = vrot.slane %v211_v16, 1  ;;  %v230_v26 = vshrl.u32 %v1095_v13, 16  ;;  %v1115_v31 = vld [vmem:[%s1081_s23 + $0x20] ss:$0 sps:$4 sm:$0x33]  }
  0x15   : > { %939 = vmatprep.mubr.msk.bf16.mxu0 %vm251_vm2, %v423_v22  ;;  %v425_v27 = vsel %vm420_vm5, %v422_v15, %v424_v18  ;;  %v220_v28 = vrot.slane %v218_v19, 1  ;;  %v531_v29 = vrot.slane %v218_v19, 2  ;;  %v228_v30 = vrot.slane %v226_v21, 1  ;;  %v888_v19 = vld [vmem:[%s1203_s2] ss:$0 sm:$0xff] }
  0x16   : > { %940 = vmatmul.mubr.msk.bf16.vlgmr.msra.gmra.mrb[0].mxu0 %vm251_vm2, %v425_v27  ;;  %v216_v32 = vor.u32 %v215_v23, %v211_v16  ;;  %v535_v33 = vrot.slane %v226_v21, 2  ;;  %v234_v34 = vshll.u32 %v1107_v25, 16  ;;  %v534_v35 = vrot.slane %v230_v26, 1 }
  0x17   : > { %v224_v36 = vor.u32 %v222_v20, %v220_v28  ;;  %948 = vmatpush3.bf16.msra.mxu0 %v566_v12  ;;  %v232_v37 = vor.u32 %v230_v26, %v228_v30  ;;  %v528_v38 = vrot.slane %v213_v17, 2  ;;  %v530_v39 = vrot.slane %v222_v20, 1 }
  0x18   : > { %v221_v41 = vsel %vm209_vm3, %v216_v32, %v220_v28  ;;  %v236_v42 = vrot.slane %v234_v34, 1  ;;  %v238_v43 = vshrl.u32 %v1107_v25, 16  ;;  %v242_v44 = vshll.u32 %v1115_v31, 16  ;;  %957 = vmatprep.subr.bf16.mxu0 %v672_v51 }
  0x19   : > { %919 = vmatprep.mubr.msk.bf16.mxu1 %vm251_vm2, %v221_v41  ;;  %v229_v45 = vsel %vm209_vm3, %v224_v36, %v228_v30  ;;  %v529_v46 = vor.u32 %v528_v38, %v527_v24  ;;  %v532_v47 = vor.u32 %v531_v29, %v530_v39  ;;  %v536_v50 = vor.u32 %v535_v33, %v534_v35 }
  0x1a   : > { %920 = vmatmul.mubr.msk.bf16.vlgmr.msra.gmra.mrb[0].mxu1 %vm251_vm2, %v229_v45  ;;  %v237_v48 = vsel %vm209_vm3, %v232_v37, %v236_v42  ;;  %v240_v49 = vor.u32 %v238_v43, %v236_v42  ;;  %v244_v53 = vrot.slane %v242_v44, 1  ;;  %v538_v54 = vrot.slane %v238_v43, 1 }
  0x1b   : > { %928 = vmatpush3.bf16.msra.mxu1 %v350_v9  ;;  %923 = vmatprep.mubr.msk.bf16.mxu1 %vm251_vm2, %v237_v48  ;;  %v533_v52 = vsel %vm526_vm4, %v529_v46, %v532_v47  ;;  %v539_v55 = vrot.slane %v234_v34, 2  ;;  %v542_v56 = vshrl.u32 %v1115_v31, 16  ;;  %v537_v59 = vsel %vm526_vm4, %v532_v47, %v536_v50 }
  0x1c   : > { %949 = vmatprep.mubr.msk.bf16.mxu0 %vm251_vm2, %v533_v52  ;;  %967 = vmatprep.subr.bf16.mxu1 %v1066_v4  ;;  %v245_v58 = vsel %vm209_vm3, %v240_v49, %v244_v53  ;;  %v545_v61 = vrot.slane %v242_v44, 2  ;;  %v645_v0 = vrot.slane %v1088_v10, 2  ;;  %v646_v1 = vrot.slane %v1091_v11, 2 }
  0x1d   : > { %v540_v57 = vor.u32 %v539_v55, %v538_v54  ;;  %v544_v60 = vrot.slane %v542_v56, 1  ;;  %v648_v5 = vrot.slane %v1095_v13, 2  ;;  %v650_v6 = vrot.slane %v1107_v25, 2 }
  0x1e   : > { %v647_v3 = vsel %vm644_vm6, %v645_v0, %v646_v1  ;;  %v426_v7 = vrot.slane %v1107_v25, 1  ;;  %v428_v12 = vrot.slane %v1115_v31, 1 }
  0x1f   : > { %v541_v62 = vsel %vm526_vm4, %v536_v50, %v540_v57  ;;  %v546_v63 = vor.u32 %v545_v61, %v544_v60  ;;  %v649_v8 = vsel %vm644_vm6, %v646_v1, %v648_v5  ;;  %v651_v9 = vsel %vm644_vm6, %v648_v5, %v650_v6 }
  0x21   : > { %v547_v2 = vsel %vm526_vm4, %v540_v57, %v546_v63 }
  0x22   : > { %924 = vmatmul.mubr.msk.bf16.gmra.mrb[4].mxu1 %vm251_vm2, %v245_v58  ;;  %950 = vmatmul.mubr.msk.bf16.vlgmr.msra.gmra.mrb[0].mxu0 %vm251_vm2, %v537_v59 }
  0x23   : > { %958 = vmatpush3.bf16.msra.mxu0 %v672_v51  ;;  %929 = vmatprep.mubr.msk.bf16.mxu1 %vm251_vm2, %v1088_v10  ;;  %v427_v10 = vsel %vm420_vm5, %v424_v18, %v426_v7 }
  0x24   : > { %953 = vmatprep.mubr.msk.bf16.mxu0 %vm251_vm2, %v541_v62 }
  0x2a   : > { %930 = vmatmul.mubr.msk.bf16.vlgmr.msra.gmra.mrb[0].mxu1 %vm251_vm2, %v1091_v11  ;;  %954 = vmatmul.mubr.msk.bf16.gmra.mrb[4].mxu0 %vm251_vm2, %v547_v2 }
  0x2b   : > { %968 = vmatpush3.bf16.msra.mxu1 %v1066_v4  ;;  %933 = vmatprep.mubr.msk.bf16.mxu1 %vm251_vm2, %v1095_v13  ;;  %v652_v4 = vrot.slane %v1115_v31, 2  ;;  %v429_v13 = vsel %vm420_vm5, %v426_v7, %v428_v12 }
  0x2c   : > { %959 = vmatprep.mubr.msk.bf16.mxu0 %vm251_vm2, %v647_v3 }
  0x2d   : > { %v653_v11 = vsel %vm644_vm6, %v650_v6, %v652_v4 }
  0x32   : > { %934 = vmatmul.mubr.msk.bf16.gmra.mrb[4].mxu1 %vm251_vm2, %v1107_v25  ;;  %960 = vmatmul.mubr.msk.bf16.vlgmr.msra.gmra.mrb[0].mxu0 %vm251_vm2, %v649_v8 }
  0x33   : > { %963 = vmatprep.mubr.msk.bf16.mxu0 %vm251_vm2, %v651_v9  ;;  %943 = vmatprep.mubr.msk.bf16.mxu1 %vm251_vm2, %v427_v10 }
  0x3a   : > { %964 = vmatmul.mubr.msk.bf16.gmra.mrb[4].mxu0 %vm251_vm2, %v653_v11 }
  0x3e   : > { %944 = vmatmul.mubr.msk.bf16.vlgmr.msra.gmra.mrb[4].mxu1 %vm251_vm2, %v429_v13 }
  0xfd   : > { %v931_v14 = vpop.f32.mrb[0].mxu1 }
  0xfe   : > { %v386_v15 = vpop.f32.mrb[1].mxu1 }
  0xff   : > { %v932_v16 = vpop.f32.mrb[2].mxu1 }
 0x100   : > { %v389_v17 = vpop.f32.mrb[3].mxu1 }
 0x105   : > { %v961_v18 = vpop.f32.mrb[0].mxu0 }
 0x106   : > { %v969_v20 = vadd.f32 %v961_v18, %v931_v14  ;;  %v708_v21 = vpop.f32.mrb[1].mxu0 }
 0x107   : > { %v970_v22 = vadd.f32 %v708_v21, %v386_v15  ;;  %v962_v23 = vpop.f32.mrb[2].mxu0 }
 0x108   : > { %v756_v24 = vadd.f32 %v969_v20, %v888_v19  ;;  %v971_v25 = vadd.f32 %v962_v23, %v932_v16  ;;  %v711_v26 = vpop.f32.mrb[3].mxu0 }
 0x109   : > { %v754_v27 = vadd.f32 %v970_v22, %v888_v19  ;;  %v972_v28 = vadd.f32 %v711_v26, %v389_v17 }
 0x10a   : > { %v764_v29 = vmul.f32 0.2, %v756_v24  ;;  %v757_v30 = vadd.f32 %v971_v25, %v888_v19 }
 0x10b   : > { %v762_v31 = vmul.f32 0.2, %v754_v27  ;;  %v755_v32 = vadd.f32 %v972_v28, %v888_v19 }
 0x10c   : > { %v772_v33 = vmax.f32 %v756_v24, %v764_v29  ;;  %v765_v34 = vmul.f32 0.2, %v757_v30 }
 0x10d   : > { %v770_v35 = vmax.f32 %v754_v27, %v762_v31  ;;  %v763_v36 = vmul.f32 0.2, %v755_v32  ;;  %v965_v37 = vpop.f32.mrb[4].mxu0 }
 0x10e   : > { %781 = vst.msk [vmem:[%s1180_s6 + $0x10] sm:$0xff] %vm778_vm7, %v772_v33  ;;  %v773_v38 = vmax.f32 %v757_v30, %v765_v34  ;;  %v724_v39 = vpop.f32.mrb[5].mxu0 }
 0x10f   : > { %779 = vst.msk [vmem:[%s1180_s6] sm:$0xff] %vm778_vm7, %v770_v35  ;;  %v771_v40 = vmax.f32 %v755_v32, %v763_v36  ;;  %v966_v41 = vpop.f32.mrb[6].mxu0 }
 0x110   : > { %782 = vst.msk [vmem:[%s1180_s6 + $0x18] sm:$0xff] %vm778_vm7, %v773_v38  ;;  %v727_v42 = vpop.f32.mrb[7].mxu0 }
 0x111   : > { %780 = vst.msk [vmem:[%s1180_s6 + $0x8] sm:$0xff] %vm778_vm7, %v771_v40  ;;  %v945_v43 = vpop.f32.mrb[4].mxu1 }
 0x112   : > { %v973_v44 = vadd.f32 %v965_v37, %v945_v43  ;;  %v500_v45 = vpop.f32.mrb[5].mxu1 }
 0x113   : > { %v974_v46 = vadd.f32 %v724_v39, %v500_v45  ;;  %v946_v47 = vpop.f32.mrb[6].mxu1 }
 0x114   : > { %v760_v48 = vadd.f32 %v973_v44, %v888_v19  ;;  %v975_v49 = vadd.f32 %v966_v41, %v946_v47  ;;  %v503_v50 = vpop.f32.mrb[7].mxu1 }
 0x115   : > { %v758_v51 = vadd.f32 %v974_v46, %v888_v19  ;;  %v976_v52 = vadd.f32 %v727_v42, %v503_v50 }
 0x116   : > { %v768_v53 = vmul.f32 0.2, %v760_v48  ;;  %v761_v54 = vadd.f32 %v975_v49, %v888_v19 }
 0x117   : > { %v766_v55 = vmul.f32 0.2, %v758_v51  ;;  %v759_v56 = vadd.f32 %v976_v52, %v888_v19 }
 0x118   : > { %v776_v57 = vmax.f32 %v760_v48, %v768_v53  ;;  %v769_v58 = vmul.f32 0.2, %v761_v54 }
 0x119   : > { %v774_v59 = vmax.f32 %v758_v51, %v766_v55  ;;  %v767_v60 = vmul.f32 0.2, %v759_v56 }
 0x11a   : > { %785 = vst.msk [vmem:[%s1180_s6 + $0x30] sm:$0xff] %vm778_vm7, %v776_v57  ;;  %v777_v61 = vmax.f32 %v761_v54, %v769_v58 }
 0x11b   : > { %783 = vst.msk [vmem:[%s1180_s6 + $0x20] sm:$0xff] %vm778_vm7, %v774_v59  ;;  %v775_v62 = vmax.f32 %v759_v56, %v767_v60 }
 0x11c   : > { %786 = vst.msk [vmem:[%s1180_s6 + $0x38] sm:$0xff] %vm778_vm7, %v777_v61 }
 0x11d   : > { %784 = vst.msk [vmem:[%s1180_s6 + $0x28] sm:$0xff] %vm778_vm7, %v775_v62 }
 0x11e PF: > { %s13_s12 = sadd.s32 1, %s1027_s12  }
 0x11f   : > { %p10_p4 = scmp.ge.s32.totalorder %s13_s12, 4  }
 0x121   :  { %12 = sbr.rel (!%p10_p4) target bundleno = 1 (0x1), region = 66 }

// kernel: dgcnn_semseg_forward.6
= control target key start
LH: loop header
LB: loop body
LE: loop exit
PB: predicated region body
PF: predicated region fallthrough
CT: control target
= control target key end

     0   :  { %s1258_s12 = smov 0   ;;  %s1427_s0 = inlined_call_operand.vmem [shape: bf16[2,68,64], index: 0, kind: input, shape index: {}]   ;;  %s1428_s1 = inlined_call_operand.vmem [shape: bf16[5,64,64], index: 1, kind: input, shape index: {}]   ;;  %s1429_s2 = inlined_call_operand.vmem [shape: f32[1,64], index: 2, kind: input, shape index: {}]   ;;  %s1430_s3 = inlined_call_operand.vmem [shape: f32[2,64,64], index: 3, kind: output, shape index: {}]  }
   0x1 LB: > { %s947_s13 = sadd.s32 4294967295, %s1236_s12   ;;  %p951_p0 = scmp.ge.s32.totalorder %s1236_s12, 1  ;;  %s1236_s12 = sphi %s1258_s12, %s13_s12  }
   0x2   : > { %p137_p1 = scmp.lt.s32.totalorder %s1236_s12, 3 }
   0x4   : > { %p138_p2 = pnand %p951_p0, %p137_p1 }
   0x5   : > { %v1205_v0 = vld [vmem:[%s1428_s1 + $0x20] sm:$0xff] (!%p138_p2)   ;;  %p161_p3 = scmp.lt.s32.totalorder (!%p138_p2), %s947_s13, 1  ;;  %v1207_v2 = vld [vmem:[%s1428_s1 + $0x28] sm:$0xff] (!%p138_p2)   ;;  %v1209_v4 = vld [vmem:[%s1428_s1 + $0x30] sm:$0xff] (!%p138_p2)   ;;  %vm282_vm0 = vcmask (!%p138_p2), 523264   ;;  %vm466_vm1 = vcmask (!%p138_p2), 1046528  }
   0x6   : > { %141 = sbr.rel (%p138_p2) target bundleno = 282 (0x11a), region = 32  ;;  %v1206_v1 = vld [vmem:[%s1428_s1 + $0x40] sm:$0xff] (!%p138_p2)   ;;  %1076 = vmatprep.subr.bf16.mxu1 (!%p138_p2), %v1205_v0  ;;  %v1208_v3 = vld [vmem:[%s1428_s1 + $0x48] sm:$0xff] (!%p138_p2)   ;;  %v1210_v5 = vld [vmem:[%s1428_s1 + $0x50] sm:$0xff] (!%p138_p2)   ;;  %vm221_vm2 = vsmask.f32 (!%p138_p2), 7424 }
   0x7   : > { %1108 = vmatprep.subr.bf16.mxu0 (!%p138_p2), %v1206_v1  ;;  %1077 = vmatpush3.bf16.msra.mxu1 (!%p138_p2), %v1205_v0  ;;  %v1211_v6 = vld [vmem:[%s1428_s1 + $0x38] sm:$0xff] (!%p138_p2)   ;;  %v1216_v18 = vld [vmem:[%s1428_s1] sm:$0xff] (!%p138_p2)   ;;  %v1218_v28 = vld [vmem:[%s1428_s1 + $0x8] sm:$0xff] (!%p138_p2)   ;;  %vm594_vm3 = vsmask.f32 (!%p138_p2), 6400  ;;  %vm734_vm4 = vcmask (!%p138_p2), 1045504  }
   0x8   : > { %1109 = vmatpush3.bf16.msra.mxu0 (!%p138_p2), %v1206_v1  ;;  %1078 = vmatprep.subr.bf16.mxu1 (!%p138_p2), %v1207_v2  ;;  %v1212_v7 = vld [vmem:[%s1428_s1 + $0x58] sm:$0xff] (!%p138_p2)   ;;  %v1217_v25 = vld [vmem:[%s1428_s1 + $0x60] sm:$0xff] (!%p138_p2)   ;;  %v1219_v32 = vld [vmem:[%s1428_s1 + $0x68] sm:$0xff] (!%p138_p2)  }
   0x9   : > { %1110 = vmatprep.subr.bf16.mxu0 (!%p138_p2), %v1208_v3  ;;  %v1222_v48 = vld [vmem:[%s1428_s1 + $0x10] sm:$0xff] (!%p138_p2)   ;;  %v1224_v57 = vld [vmem:[%s1428_s1 + $0x18] sm:$0xff] (!%p138_p2)   ;;  %v1226_v1 = vld [vmem:[%s1428_s1 + $0x80] sm:$0xff] (!%p138_p2)  }
   0xa   : > { %v1223_v50 = vld [vmem:[%s1428_s1 + $0x70] sm:$0xff] (!%p138_p2)   ;;  %v1225_v58 = vld [vmem:[%s1428_s1 + $0x78] sm:$0xff] (!%p138_p2)  }
   0xb   : > { %1079 = vmatpush3.bf16.msra.mxu1 (!%p138_p2), %v1207_v2 }
   0xc   : > { %1111 = vmatpush3.bf16.msra.mxu0 (!%p138_p2), %v1208_v3  ;;  %1080 = vmatprep.subr.bf16.mxu1 (!%p138_p2), %v1209_v4 }
   0xd   : > { %s1432_s13 = smov (!%p161_p3, %s947_s13), 1  ;;  %1112 = vmatprep.subr.bf16.mxu0 %v1210_v5 }
   0xe   : > { %s1196_s24 = smul.u32 36, %s1432_s13  ;;  %s1035_s8 = sshll.u32 %s1432_s13, 6 }
   0xf   : > { %1081 = vmatpush3.bf16.msra.mxu1 %v1209_v4  ;;  %s170_s11 = scalar_lea.vmem %s1430_s3, %s1035_s8 }
  0x10   : > { %s1293_s4 = scalar_lea.vmem %s1427_s0, %s1196_s24  ;;  %1113 = vmatpush3.bf16.msra.mxu0 %v1210_v5  ;;  %1082 = vmatprep.subr.bf16.mxu1 %v1211_v6 }
  0x11   : > { %v1299_v8 = vld [vmem:[%s1293_s4] sm:$0xff]   ;;  %v1302_v9 = vld [vmem:[%s1293_s4 + $0x8] sm:$0xff]   ;;  %v1305_v10 = vld [vmem:[%s1293_s4 + $0x10] sm:$0xff]   ;;  %1114 = vmatprep.subr.bf16.mxu0 %v1212_v7 }
  0x12   : > { %v223_v11 = vshrl.u32 %v1299_v8, 16  ;;  %v225_v12 = vshll.u32 %v1299_v8, 16  ;;  %v230_v13 = vshll.u32 %v1302_v9, 16  ;;  %v234_v14 = vshrl.u32 %v1302_v9, 16  ;;  %v1334_v36 = vld [vmem:[%s1293_s4 + $0x18] sm:$0xff]  }
  0x13   : > { %v467_v15 = vrot.slane %v1299_v8, 1  ;;  %v468_v16 = vrot.slane %v1302_v9, 1  ;;  %v238_v17 = vshll.u32 %v1305_v10, 16  ;;  %v470_v24 = vrot.slane %v1305_v10, 1  ;;  %1083 = vmatpush3.bf16.msra.mxu1 %v1211_v6  ;;  %v1227_v6 = vld [vmem:[%s1428_s1 + $0x88] sm:$0xff]  }
  0x14   : > { %v227_v19 = vrot.slane %v225_v12, 1  ;;  %v232_v20 = vrot.slane %v230_v13, 1  ;;  %v595_v21 = vrot.slane %v223_v11, 1  ;;  %v242_v29 = vshrl.u32 %v1305_v10, 16  ;;  %1115 = vmatpush3.bf16.msra.mxu0 %v1212_v7  ;;  %1092 = vmatprep.subr.bf16.mxu1 %v1216_v18 }
  0x15   : > { %v469_v22 = vsel %vm466_vm1, %v467_v15, %v468_v16  ;;  %v240_v23 = vrot.slane %v238_v17, 1  ;;  %v599_v30 = vrot.slane %v230_v13, 2  ;;  %v471_v31 = vsel %vm466_vm1, %v468_v16, %v470_v24  ;;  %1124 = vmatprep.subr.bf16.mxu0 %v1217_v25  ;;  %v1338_v38 = vld [vmem:[%s1293_s4 + $0x20] ss:$0 sps:$4 sm:$0x33]  }
  0x16   : > { %v228_v26 = vor.u32 %v227_v19, %v223_v11  ;;  %v236_v27 = vor.u32 %v234_v14, %v232_v20  ;;  %1116 = vmatprep.mubr.msk.bf16.mxu0 %vm282_vm0, %v469_v22  ;;  %v603_v35 = vrot.slane %v238_v17, 2  ;;  %v596_v39 = vrot.slane %v225_v12, 2  ;;  %v1228_v12 = vld [vmem:[%s1428_s1 + $0x90] sm:$0xff]  }
  0x17   : > { %v244_v37 = vor.u32 %v242_v29, %v240_v23  ;;  %1117 = vmatmul.mubr.msk.bf16.vlgmr.msra.gmra.mrb[0].mxu0 %vm282_vm0, %v471_v31  ;;  %v246_v40 = vshll.u32 %v1334_v36, 16  ;;  %v602_v41 = vrot.slane %v242_v29, 1  ;;  %v472_v42 = vrot.slane %v1334_v36, 1 }
  0x18   : > { %v233_v33 = vsel %vm221_vm2, %v228_v26, %v232_v20  ;;  %v241_v34 = vsel %vm221_vm2, %v236_v27, %v240_v23  ;;  %v250_v43 = vshrl.u32 %v1334_v36, 16  ;;  %1125 = vmatpush3.bf16.msra.mxu0 %v1217_v25  ;;  %v254_v44 = vshll.u32 %v1338_v38, 16 }
  0x19   : > { %1084 = vmatprep.mubr.msk.bf16.mxu1 %vm282_vm0, %v233_v33  ;;  %v474_v45 = vrot.slane %v1338_v38, 1  ;;  %1126 = vmatprep.subr.bf16.mxu0 %v1219_v32  ;;  %v248_v46 = vrot.slane %v246_v40, 1  ;;  %v473_v47 = vsel %vm466_vm1, %v470_v24, %v472_v42  ;;  %v597_v51 = vor.u32 %v596_v39, %v595_v21 }
  0x1a   : > { %1085 = vmatmul.mubr.msk.bf16.vlgmr.msra.gmra.mrb[0].mxu1 %vm282_vm0, %v241_v34  ;;  %1120 = vmatprep.mubr.msk.bf16.mxu0 %vm282_vm0, %v473_v47  ;;  %v256_v49 = vrot.slane %v254_v44, 1  ;;  %v598_v54 = vrot.slane %v234_v14, 1  ;;  %v606_v61 = vrot.slane %v250_v43, 1  ;;  %v607_v62 = vrot.slane %v246_v40, 2 }
  0x1b   : > { %1093 = vmatpush3.bf16.msra.mxu1 %v1216_v18  ;;  %v249_v52 = vsel %vm221_vm2, %v244_v37, %v248_v46  ;;  %v252_v53 = vor.u32 %v250_v43, %v248_v46  ;;  %v475_v55 = vsel %vm466_vm1, %v472_v42, %v474_v45  ;;  %v604_v63 = vor.u32 %v603_v35, %v602_v41  ;;  %v1229_v18 = vld [vmem:[%s1428_s1 + $0x98] sm:$0xff]  }
  0x1c   : > { %1094 = vmatprep.subr.bf16.mxu1 %v1218_v28  ;;  %1127 = vmatpush3.bf16.msra.mxu0 %v1219_v32  ;;  %v600_v59 = vor.u32 %v599_v30, %v598_v54  ;;  %v610_v0 = vshrl.u32 %v1338_v38, 16  ;;  %v608_v2 = vor.u32 %v607_v62, %v606_v61  ;;  %v613_v5 = vrot.slane %v254_v44, 2 }
  0x1d   : > { %1088 = vmatprep.mubr.msk.bf16.mxu1 %vm282_vm0, %v249_v52  ;;  %v257_v56 = vsel %vm221_vm2, %v252_v53, %v256_v49  ;;  %1128 = vmatprep.subr.bf16.mxu0 %v1223_v50  ;;  %v735_v13 = vrot.slane %v1299_v8, 2  ;;  %v736_v14 = vrot.slane %v1302_v9, 2  ;;  %v738_v15 = vrot.slane %v1305_v10, 2 }
  0x1e   : > { %v601_v60 = vsel %vm594_vm3, %v597_v51, %v600_v59  ;;  %v605_v3 = vsel %vm594_vm3, %v600_v59, %v604_v63  ;;  %v612_v4 = vrot.slane %v610_v0, 1  ;;  %v609_v7 = vsel %vm594_vm3, %v604_v63, %v608_v2 }
  0x1f   : > { %1095 = vmatpush3.bf16.msra.mxu1 %v1218_v28  ;;  %1121 = vmatmul.mubr.msk.bf16.gmra.mrb[4].mxu0 %vm282_vm0, %v475_v55  ;;  %v740_v16 = vrot.slane %v1334_v36, 2  ;;  %v739_v19 = vsel %vm734_vm4, %v736_v14, %v738_v15 }
  0x20   : > { %1096 = vmatprep.subr.bf16.mxu1 %v1222_v48  ;;  %1129 = vmatpush3.bf16.msra.mxu0 %v1223_v50  ;;  %v614_v11 = vor.u32 %v613_v5, %v612_v4 }
  0x21   : > { %1130 = vmatprep.subr.bf16.mxu0 %v1225_v58  ;;  %1132 = vmatprep.mubr.msk.bf16.mxu0 %vm282_vm0, %v601_v60 }
  0x22   : > { %1089 = vmatmul.mubr.msk.bf16.gmra.mrb[4].mxu1 %vm282_vm0, %v257_v56  ;;  %v615_v17 = vsel %vm594_vm3, %v608_v2, %v614_v11 }
  0x23   : > { %1097 = vmatpush3.bf16.msra.mxu1 %v1222_v48  ;;  %1100 = vmatprep.mubr.msk.bf16.mxu1 %vm282_vm0, %v1299_v8  ;;  %v737_v8 = vsel %vm734_vm4, %v735_v13, %v736_v14 }
  0x24   : > { %1098 = vmatprep.subr.bf16.mxu1 %v1224_v57  ;;  %1131 = vmatpush3.bf16.msra.mxu0 %v1225_v58 }
  0x25   : > { %1140 = vmatprep.subr.bf16.mxu0 %v1226_v1 }
  0x27   : > { %1099 = vmatpush3.bf16.msra.mxu1 %v1224_v57  ;;  %1133 = vmatmul.mubr.msk.bf16.vlgmr.msra.gmra.mrb[0].mxu0 %vm282_vm0, %v605_v3 }
  0x28   : > { %1156 = vmatprep.subr.bf16.mxu1 %v1226_v1  ;;  %1141 = vmatpush3.bf16.msra.mxu0 %v1226_v1 }
  0x29   : > { %1142 = vmatprep.subr.bf16.mxu0 %v1227_v6  ;;  %1136 = vmatprep.mubr.msk.bf16.mxu0 %vm282_vm0, %v609_v7 }
  0x2a   : > { %1101 = vmatmul.mubr.msk.bf16.vlgmr.msra.gmra.mrb[0].mxu1 %vm282_vm0, %v1302_v9  ;;  %v741_v9 = vsel %vm734_vm4, %v738_v15, %v740_v16 }
  0x2b   : > { %1160 = vmatpush3.bf16.msra.mxu1 %v1226_v1  ;;  %1104 = vmatprep.mubr.msk.bf16.mxu1 %vm282_vm0, %v1305_v10  ;;  %v742_v10 = vrot.slane %v1338_v38, 2  ;;  %v1032_v38 = vld [vmem:[%s1429_s2] ss:$0 sm:$0xff] }
  0x2c   : > { %1157 = vmatprep.subr.bf16.mxu1 %v1227_v6  ;;  %1143 = vmatpush3.bf16.msra.mxu0 %v1227_v6 }
  0x2d   : > { %1144 = vmatprep.subr.bf16.mxu0 %v1228_v12  ;;  %v743_v20 = vsel %vm734_vm4, %v740_v16, %v742_v10 }
  0x2f   : > { %1161 = vmatpush3.bf16.msra.mxu1 %v1227_v6  ;;  %1137 = vmatmul.mubr.msk.bf16.gmra.mrb[4].mxu0 %vm282_vm0, %v615_v17 }
  0x30   : > { %1158 = vmatprep.subr.bf16.mxu1 %v1228_v12  ;;  %1145 = vmatpush3.bf16.msra.mxu0 %v1228_v12 }
  0x31   : > { %1146 = vmatprep.subr.bf16.mxu0 %v1229_v18  ;;  %1148 = vmatprep.mubr.msk.bf16.mxu0 %vm282_vm0, %v737_v8 }
  0x32   : > { %1105 = vmatmul.mubr.msk.bf16.gmra.mrb[4].mxu1 %vm282_vm0, %v1334_v36 }
  0x33   : > { %1162 = vmatpush3.bf16.msra.mxu1 %v1228_v12  ;;  %1152 = vmatprep.mubr.msk.bf16.mxu1 %vm282_vm0, %v741_v9 }
  0x34   : > { %1159 = vmatprep.subr.bf16.mxu1 %v1229_v18  ;;  %1147 = vmatpush3.bf16.msra.mxu0 %v1229_v18 }
  0x37   : > { %1163 = vmatpush3.bf16.msra.mxu1 %v1229_v18  ;;  %1149 = vmatmul.mubr.msk.bf16.vlgmr.msra.gmra.mrb[0].mxu0 %vm282_vm0, %v739_v19 }
  0x3a   : > { %1153 = vmatmul.mubr.msk.bf16.vlgmr.msra.gmra.mrb[8].mxu1 %vm282_vm0, %v743_v20 }
  0xfd   : > { %v1102_v21 = vpop.f32.mrb[0].mxu1 }
  0xfe   : > { %v426_v22 = vpop.f32.mrb[1].mxu1 }
  0xff   : > { %v1103_v23 = vpop.f32.mrb[2].mxu1 }
 0x100   : > { %v429_v24 = vpop.f32.mrb[3].mxu1 }
 0x102   : > { %v1138_v26 = vpop.f32.mrb[4].mxu0 }
 0x103   : > { %v702_v29 = vpop.f32.mrb[5].mxu0 }
 0x104   : > { %v1139_v32 = vpop.f32.mrb[6].mxu0 }
 0x105   : > { %v1106_v25 = vpop.f32.mrb[4].mxu1  ;;  %v705_v35 = vpop.f32.mrb[7].mxu0 }
 0x106   : > { %v1168_v27 = vadd.f32 %v1138_v26, %v1106_v25  ;;  %v442_v28 = vpop.f32.mrb[5].mxu1 }
 0x107   : > { %v1170_v30 = vadd.f32 %v702_v29, %v442_v28  ;;  %v1107_v31 = vpop.f32.mrb[6].mxu1 }
 0x108   : > { %v1172_v33 = vadd.f32 %v1139_v32, %v1107_v31  ;;  %v445_v34 = vpop.f32.mrb[7].mxu1 }
 0x109   : > { %v1174_v36 = vadd.f32 %v705_v35, %v445_v34 }
 0x10a   : > { %v1150_v37 = vpop.f32.mrb[0].mxu0 }
 0x10b   : > { %v1164_v40 = vadd.f32 %v1150_v37, %v1102_v21  ;;  %v814_v42 = vpop.f32.mrb[1].mxu0 }
 0x10c   : > { %v1165_v44 = vadd.f32 %v814_v42, %v426_v22  ;;  %v1151_v46 = vpop.f32.mrb[2].mxu0 }
 0x10d   : > { %v1154_v39 = vpop.f32.mrb[8].mxu1  ;;  %v862_v48 = vadd.f32 %v1164_v40, %v1032_v38  ;;  %v1166_v50 = vadd.f32 %v1151_v46, %v1103_v23  ;;  %v817_v52 = vpop.f32.mrb[3].mxu0 }
 0x10e   : > { %v1169_v41 = vadd.f32 %v1168_v27, %v1154_v39  ;;  %v830_v43 = vpop.f32.mrb[9].mxu1  ;;  %v860_v54 = vadd.f32 %v1165_v44, %v1032_v38  ;;  %v1167_v56 = vadd.f32 %v817_v52, %v429_v24 }
 0x10f   : > { %v1171_v45 = vadd.f32 %v1170_v30, %v830_v43  ;;  %v1155_v47 = vpop.f32.mrb[10].mxu1  ;;  %v870_v58 = vmul.f32 0.2, %v862_v48  ;;  %v863_v60 = vadd.f32 %v1166_v50, %v1032_v38 }
 0x110   : > { %v866_v49 = vadd.f32 %v1169_v41, %v1032_v38  ;;  %v1173_v51 = vadd.f32 %v1172_v33, %v1155_v47  ;;  %v833_v53 = vpop.f32.mrb[11].mxu1  ;;  %v868_v62 = vmul.f32 0.2, %v860_v54  ;;  %v861_v0 = vadd.f32 %v1167_v56, %v1032_v38 }
 0x111   : > { %v864_v55 = vadd.f32 %v1171_v45, %v1032_v38  ;;  %v1175_v57 = vadd.f32 %v1174_v36, %v833_v53  ;;  %v878_v2 = vmax.f32 %v862_v48, %v870_v58  ;;  %v871_v4 = vmul.f32 0.2, %v863_v60 }
 0x112   : > { %v874_v59 = vmul.f32 0.2, %v866_v49  ;;  %v867_v61 = vadd.f32 %v1173_v51, %v1032_v38  ;;  %v876_v6 = vmax.f32 %v860_v54, %v868_v62  ;;  %v869_v11 = vmul.f32 0.2, %v861_v0 }
 0x113   : > { %v872_v63 = vmul.f32 0.2, %v864_v55  ;;  %v865_v1 = vadd.f32 %v1175_v57, %v1032_v38  ;;  %886 = vst.msk [vmem:[%s170_s11 + $0x10] sm:$0xff] %vm282_vm0, %v878_v2  ;;  %v879_v13 = vmax.f32 %v863_v60, %v871_v4 }
 0x114   : > { %v882_v3 = vmax.f32 %v866_v49, %v874_v59  ;;  %v875_v5 = vmul.f32 0.2, %v867_v61  ;;  %884 = vst.msk [vmem:[%s170_s11] sm:$0xff] %vm282_vm0, %v876_v6  ;;  %v877_v15 = vmax.f32 %v861_v0, %v869_v11 }
 0x115   : > { %v880_v7 = vmax.f32 %v864_v55, %v872_v63  ;;  %v873_v12 = vmul.f32 0.2, %v865_v1  ;;  %887 = vst.msk [vmem:[%s170_s11 + $0x18] sm:$0xff] %vm282_vm0, %v879_v13 }
 0x116   : > { %890 = vst.msk [vmem:[%s170_s11 + $0x30] sm:$0xff] %vm282_vm0, %v882_v3  ;;  %v883_v14 = vmax.f32 %v867_v61, %v875_v5  ;;  %885 = vst.msk [vmem:[%s170_s11 + $0x8] sm:$0xff] %vm282_vm0, %v877_v15 }
 0x117   : > { %888 = vst.msk [vmem:[%s170_s11 + $0x20] sm:$0xff] %vm282_vm0, %v880_v7  ;;  %v881_v16 = vmax.f32 %v865_v1, %v873_v12 }
 0x118   : > { %891 = vst.msk [vmem:[%s170_s11 + $0x38] sm:$0xff] %vm282_vm0, %v883_v14 }
 0x119   : > { %889 = vst.msk [vmem:[%s170_s11 + $0x28] sm:$0xff] %vm282_vm0, %v881_v16 }
 0x11a PF: > { %s13_s12 = sadd.s32 1, %s1236_s12  }
 0x11b   : > { %p10_p4 = scmp.ge.s32.totalorder %s13_s12, 4  }
 0x11d   :  { %12 = sbr.rel (!%p10_p4) target bundleno = 1 (0x1), region = 66 }

// kernel: dgcnn_semseg_forward.8
= control target key start
LH: loop header
LB: loop body
LE: loop exit
PB: predicated region body
PF: predicated region fallthrough
CT: control target
= control target key end

     0   :  { %s2404_s18 = smov 0   ;;  %s2406_s19 = smov 0   ;;  %s2919_s0 = inlined_call_operand.vmem [shape: bf16[2,64,64], index: 0, kind: input, shape index: {}]   ;;  %s2920_s1 = inlined_call_operand.vmem [shape: bf16[2,64,64], index: 1, kind: input, shape index: {}]   ;;  %s2921_s2 = inlined_call_operand.vmem [shape: bf16[2,64,64], index: 2, kind: input, shape index: {}]   ;;  %s2922_s3 = inlined_call_operand.vmem [shape: bf16[192,1024], index: 3, kind: input, shape index: {}]   ;;  %s2923_s4 = inlined_call_operand.vmem [shape: f32[1,1024], index: 4, kind: input, shape index: {}]   ;;  %s2924_s5 = inlined_call_operand.vmem [shape: f32[2,1,1024], index: 5, kind: output, shape index: {}]  }
   0x1   :  { %s2408_s20 = smov 0   ;;  %s2410_s21 = smov 0  }
   0x2   :  { %s2412_s22 = smov 0  }
   0x3 LB: > { %s24_s23 = sadd.s32 1, %s2361_s20  ;;  %s27_s24 = sadd.s32 1, %s2365_s21  ;;  %s2369_s22 = sphi %s2412_s22, %s15_s22   ;;  %s2365_s21 = sphi %s2410_s21, %s2928_s21   ;;  %s2361_s20 = sphi %s2408_s20, %s2927_s20   ;;  %s2357_s19 = sphi %s2406_s19, %s2926_s19   ;;  %s2353_s18 = sphi %s2404_s18, %s2925_s18  }
   0x4   : > { %p25_p0 = scmp.ge.s32.totalorder %s24_s23, 2  ;;  %p2077_p1 = scmp.ge.s32.totalorder %s2369_s22, 1 }
   0x5   : > { %p240_p2 = scmp.lt.s32.totalorder %s2369_s22, 5 }
   0x6   : > { %s2930_s23 = smov (%p25_p0, %s24_s23), 0  ;;  %s2932_s24 = smov (!%p25_p0, %s27_s24), %s2365_s21 }
   0x7   : > { %p241_p3 = pnand %p2077_p1, %p240_p2  ;;  %p29_p4 = scmp.ge.s32.totalorder %s2932_s24, 2 }
   0x8   : > { %v364_v0 = vld [vmem:[%s2922_s3 + $0x100] sm:$0xff] (!%p241_p3)  ;;  %v365_v2 = vld [vmem:[%s2922_s3 + $0x108] sm:$0xff] (!%p241_p3)  ;;  %s2078_s6 = sshll.u32 (!%p241_p3), %s2353_s18, 2  ;;  %p290_p5 = scmp.lt.s32.totalorder (!%p241_p3), %s2357_s19, 1  ;;  %v2371_v8 = vmov (!%p241_p3), 0   ;;  %v366_v31 = vld [vmem:[%s2922_s3 + $0x110] sm:$0xff] (!%p241_p3) }
   0x9   : > { %s2934_s24 = smov (%p29_p4, %s2932_s24), 0  ;;  %244 = sbr.rel (%p241_p3) target bundleno = 387 (0x183), region = 40 }
   0xa   : > { %v368_v1 = vld [vmem:[%s2922_s3 + $0x120] sm:$0xff] (!%p241_p3)  ;;  %v369_v4 = vld [vmem:[%s2922_s3 + $0x128] sm:$0xff] (!%p241_p3)  ;;  %605 = vmatprep.mubr.bf16.mxu0 (!%p241_p3), %v2371_v8  ;;  %658 = vmatprep.mubr.bf16.mxu1 (!%p241_p3), %v2371_v8  ;;  %p292_p6 = scmp.lt.s32.totalorder (!%p241_p3), %s2078_s6, 7  ;;  %v370_v32 = vld [vmem:[%s2922_s3 + $0x130] sm:$0xff] (!%p241_p3)  ;;  %vm566_vm0 = vcmask (!%p241_p3), 523264   ;;  %p2214_p7 = scmp.ne.s32.totalorder (!%p241_p3), %s2353_s18, 0 }
   0xb   : > { %v2091_v3 = vcombine.high (!%p241_p3), %v364_v0, %v368_v1  ;;  %v2090_v5 = vcombine.low (!%p241_p3), %v364_v0, %v368_v1  ;;  %v372_v6 = vld [vmem:[%s2922_s3 + $0x140] sm:$0xff] (!%p241_p3)  ;;  %v2093_v9 = vcombine.high (!%p241_p3), %v365_v2, %v369_v4  ;;  %v2092_v10 = vcombine.low (!%p241_p3), %v365_v2, %v369_v4  ;;  %v373_v12 = vld [vmem:[%s2922_s3 + $0x148] sm:$0xff] (!%p241_p3)  ;;  %v367_v33 = vld [vmem:[%s2922_s3 + $0x118] sm:$0xff] (!%p241_p3) }
   0xc   : > { %v376_v7 = vld [vmem:[%s2922_s3 + $0x160] sm:$0xff] (!%p241_p3)  ;;  %v377_v13 = vld [vmem:[%s2922_s3 + $0x168] sm:$0xff] (!%p241_p3)  ;;  %v371_v34 = vld [vmem:[%s2922_s3 + $0x138] sm:$0xff] (!%p241_p3)  ;;  %v2095_v37 = vcombine.high (!%p241_p3), %v366_v31, %v370_v32  ;;  %v2094_v44 = vcombine.low (!%p241_p3), %v366_v31, %v370_v32 }
   0xd   : > { %v2099_v11 = vcombine.high (!%p241_p3), %v372_v6, %v376_v7  ;;  %v380_v14 = vld [vmem:[%s2922_s3 + $0x180] sm:$0xff] (!%p241_p3)  ;;  %573 = vmatprep.subr.bf16.mxu0 (!%p241_p3), %v2091_v3  ;;  %v2101_v15 = vcombine.high (!%p241_p3), %v373_v12, %v377_v13  ;;  %v381_v17 = vld [vmem:[%s2922_s3 + $0x188] sm:$0xff] (!%p241_p3)  ;;  %626 = vmatprep.subr.bf16.mxu1 (!%p241_p3), %v2093_v9  ;;  %v2098_v19 = vcombine.low (!%p241_p3), %v372_v6, %v376_v7  ;;  %v374_v39 = vld [vmem:[%s2922_s3 + $0x150] sm:$0xff] (!%p241_p3) }
   0xe   : > { %v384_v16 = vld [vmem:[%s2922_s3 + $0x1a0] sm:$0xff] (!%p241_p3)  ;;  %v385_v18 = vld [vmem:[%s2922_s3 + $0x1a8] sm:$0xff] (!%p241_p3)  ;;  %574 = vmatpush1.bf16.msra.mxu0 (!%p241_p3), %v2090_v5  ;;  %627 = vmatpush1.bf16.msra.mxu1 (!%p241_p3), %v2092_v10  ;;  %v2100_v20 = vcombine.low (!%p241_p3), %v373_v12, %v377_v13  ;;  %v2097_v38 = vcombine.high (!%p241_p3), %v367_v33, %v371_v34  ;;  %v378_v40 = vld [vmem:[%s2922_s3 + $0x170] sm:$0xff] (!%p241_p3)  ;;  %v2096_v45 = vcombine.low (!%p241_p3), %v367_v33, %v371_v34 }
   0xf   : > { %575 = vmatprep.subr.bf16.mxu0 (!%p241_p3), %v2099_v11  ;;  %v2107_v21 = vcombine.high (!%p241_p3), %v380_v14, %v384_v16  ;;  %628 = vmatprep.subr.bf16.mxu1 (!%p241_p3), %v2101_v15  ;;  %v2109_v22 = vcombine.high (!%p241_p3), %v381_v17, %v385_v18  ;;  %v388_v23 = vld [vmem:[%s2922_s3 + $0x1c0] sm:$0xff] (!%p241_p3)  ;;  %v389_v25 = vld [vmem:[%s2922_s3 + $0x1c8] sm:$0xff] (!%p241_p3)  ;;  %v2106_v27 = vcombine.low (!%p241_p3), %v380_v14, %v384_v16  ;;  %v375_v42 = vld [vmem:[%s2922_s3 + $0x158] sm:$0xff] (!%p241_p3) }
  0x10   : > { %s2936_s19 = smov (!%p290_p5, %s2357_s19), 1  ;;  %s2938_s6 = smov (!%p292_p6, %s2078_s6), 7  ;;  %v392_v24 = vld [vmem:[%s2922_s3 + $0x1e0] sm:$0xff]  ;;  %v393_v26 = vld [vmem:[%s2922_s3 + $0x1e8] sm:$0xff]  ;;  %v2108_v28 = vcombine.low %v381_v17, %v385_v18  ;;  %v379_v43 = vld [vmem:[%s2922_s3 + $0x178] sm:$0xff]  ;;  %v2103_v46 = vcombine.high %v374_v39, %v378_v40  ;;  %v2102_v52 = vcombine.low %v374_v39, %v378_v40 }
  0x11   : > { %s2079_s8 = sshll.u32 %s2936_s19, 3  ;;  %v2115_v29 = vcombine.high %v388_v23, %v392_v24  ;;  %v2117_v30 = vcombine.high %v389_v25, %v393_v26  ;;  %v2114_v35 = vcombine.low %v388_v23, %v392_v24  ;;  %v2116_v36 = vcombine.low %v389_v25, %v393_v26  ;;  %v382_v47 = vld [vmem:[%s2922_s3 + $0x190] sm:$0xff]  ;;  %v383_v50 = vld [vmem:[%s2922_s3 + $0x198] sm:$0xff]  ;;  %v328_v1 = vld [vmem:[%s2922_s3] sm:$0xff] }
  0x12   : > { %s295_s9 = sadd.s32 %s2079_s8, %s2938_s6  ;;  %s2484_s12 = scalar_lea.vmem %s2924_s5, %s2079_s8  ;;  %576 = vmatpush1.bf16.msra.mxu0 %v2098_v19  ;;  %629 = vmatpush1.bf16.msra.mxu1 %v2100_v20  ;;  %v2105_v48 = vcombine.high %v375_v42, %v379_v43  ;;  %v386_v49 = vld [vmem:[%s2922_s3 + $0x1b0] sm:$0xff]  ;;  %v387_v51 = vld [vmem:[%s2922_s3 + $0x1b8] sm:$0xff]  ;;  %v2104_v53 = vcombine.low %v375_v42, %v379_v43  ;;  %v332_v2 = vld [vmem:[%s2922_s3 + $0x20] sm:$0xff] }
  0x13   : > { %s2492_s19 = sshll.u32 %s295_s9, 2  ;;  %577 = vmatprep.subr.bf16.mxu0 %v2107_v21  ;;  %630 = vmatprep.subr.bf16.mxu1 %v2109_v22  ;;  %v2111_v54 = vcombine.high %v382_v47, %v386_v49  ;;  %v2113_v55 = vcombine.high %v383_v50, %v387_v51  ;;  %v390_v56 = vld [vmem:[%s2922_s3 + $0x1d0] sm:$0xff]  ;;  %v391_v59 = vld [vmem:[%s2922_s3 + $0x1d8] sm:$0xff]  ;;  %v2110_v61 = vcombine.low %v382_v47, %v386_v49  ;;  %v329_v3 = vld [vmem:[%s2922_s3 + $0x8] sm:$0xff] }
  0x14   : > { %s2504_s29 = scalar_lea.vmem %s2920_s1, %s2492_s19  ;;  %s2537_s8 = scalar_lea.vmem %s2919_s0, %s2492_s19  ;;  %v394_v57 = vld [vmem:[%s2922_s3 + $0x1f0] sm:$0xff]  ;;  %v395_v60 = vld [vmem:[%s2922_s3 + $0x1f8] sm:$0xff]  ;;  %v2112_v62 = vcombine.low %v383_v50, %v387_v51  ;;  %v333_v4 = vld [vmem:[%s2922_s3 + $0x28] sm:$0xff]  ;;  %v2133_v7 = vcombine.high %v328_v1, %v332_v2  ;;  %v2132_v14 = vcombine.low %v328_v1, %v332_v2 }
  0x15   : > { %v2525_v41 = vld [vmem:[%s2504_s29] sm:$0xff]   ;;  %v2564_v58 = vld [vmem:[%s2504_s29 + $0x8] sm:$0xff]   ;;  %v2119_v63 = vcombine.high %v390_v56, %v394_v57  ;;  %v2121_v0 = vcombine.high %v391_v59, %v395_v60  ;;  %v2118_v5 = vcombine.low %v390_v56, %v394_v57  ;;  %s2592_s26 = scalar_lea.vmem %s2921_s2, %s2492_s19  ;;  %v2120_v6 = vcombine.low %v391_v59, %v395_v60  ;;  %v330_v34 = vld [vmem:[%s2922_s3 + $0x10] sm:$0xff] }
  0x16   : > { %578 = vmatpush1.bf16.msra.mxu0 %v2106_v27  ;;  %631 = vmatpush1.bf16.msra.mxu1 %v2108_v28  ;;  %v2135_v9 = vcombine.high %v329_v3, %v333_v4  ;;  %v336_v10 = vld [vmem:[%s2922_s3 + $0x40] sm:$0xff]  ;;  %v337_v12 = vld [vmem:[%s2922_s3 + $0x48] sm:$0xff]  ;;  %v2134_v15 = vcombine.low %v329_v3, %v333_v4  ;;  %v338_v42 = vld [vmem:[%s2922_s3 + $0x50] sm:$0xff] }
  0x17   : > { %579 = vmatprep.subr.bf16.mxu0 %v2115_v29  ;;  %632 = vmatprep.subr.bf16.mxu1 %v2117_v30  ;;  %v340_v11 = vld [vmem:[%s2922_s3 + $0x60] sm:$0xff]  ;;  %v341_v13 = vld [vmem:[%s2922_s3 + $0x68] sm:$0xff]  ;;  %v342_v43 = vld [vmem:[%s2922_s3 + $0x70] sm:$0xff] }
  0x18   : > { %v2141_v16 = vcombine.high %v336_v10, %v340_v11  ;;  %v344_v17 = vld [vmem:[%s2922_s3 + $0x80] sm:$0xff]  ;;  %v2143_v18 = vcombine.high %v337_v12, %v341_v13  ;;  %v345_v20 = vld [vmem:[%s2922_s3 + $0x88] sm:$0xff]  ;;  %v2140_v22 = vcombine.low %v336_v10, %v340_v11  ;;  %v2142_v23 = vcombine.low %v337_v12, %v341_v13  ;;  %v346_v51 = vld [vmem:[%s2922_s3 + $0x90] sm:$0xff] }
  0x19   : > { %v348_v19 = vld [vmem:[%s2922_s3 + $0xa0] sm:$0xff]  ;;  %v349_v21 = vld [vmem:[%s2922_s3 + $0xa8] sm:$0xff]  ;;  %v2145_v49 = vcombine.high %v338_v42, %v342_v43  ;;  %v354_v59 = vld [vmem:[%s2922_s3 + $0xd0] sm:$0xff] }
  0x1a   : > { %580 = vmatpush1.bf16.msra.mxu0 %v2114_v35  ;;  %633 = vmatpush1.bf16.msra.mxu1 %v2116_v36  ;;  %v2149_v24 = vcombine.high %v344_v17, %v348_v19  ;;  %v2151_v25 = vcombine.high %v345_v20, %v349_v21  ;;  %v352_v26 = vld [vmem:[%s2922_s3 + $0xc0] sm:$0xff]  ;;  %v353_v28 = vld [vmem:[%s2922_s3 + $0xc8] sm:$0xff]  ;;  %v2148_v30 = vcombine.low %v344_v17, %v348_v19  ;;  %v334_v35 = vld [vmem:[%s2922_s3 + $0x30] sm:$0xff] }
  0x1b   : > { %679 = vmatprep.subr.bf16.mxu0 %v2095_v37  ;;  %732 = vmatprep.subr.bf16.mxu1 %v2097_v38  ;;  %v356_v27 = vld [vmem:[%s2922_s3 + $0xe0] sm:$0xff]  ;;  %v357_v29 = vld [vmem:[%s2922_s3 + $0xe8] sm:$0xff]  ;;  %v2150_v31 = vcombine.low %v345_v20, %v349_v21  ;;  %v331_v36 = vld [vmem:[%s2922_s3 + $0x18] sm:$0xff]  ;;  %v2137_v40 = vcombine.high %v330_v34, %v334_v35  ;;  %v2136_v47 = vcombine.low %v330_v34, %v334_v35 }
  0x1c   : > { %v2157_v32 = vcombine.high %v352_v26, %v356_v27  ;;  %v2159_v33 = vcombine.high %v353_v28, %v357_v29  ;;  %v335_v37 = vld [vmem:[%s2922_s3 + $0x38] sm:$0xff]  ;;  %v2156_v38 = vcombine.low %v352_v26, %v356_v27  ;;  %v2158_v39 = vcombine.low %v353_v28, %v357_v29  ;;  %v358_v60 = vld [vmem:[%s2922_s3 + $0xf0] sm:$0xff]  ;;  %v1177_v4 = vld [vmem:[%s2922_s3 + $0x200] sm:$0xff] }
  0x1d   : > { %2122 = vmatmul.mubr.msk.bf16.vlgmr.msra.gmra.mrb[0].mxu0 %vm566_vm0, %v2525_v41  ;;  %2124 = vmatmul.mubr.msk.bf16.vlgmr.msra.gmra.mrb[0].mxu1 %vm566_vm0, %v2525_v41  ;;  %v2161_v2 = vcombine.high %v354_v59, %v358_v60  ;;  %v1185_v13 = vld [vmem:[%s2922_s3 + $0x240] sm:$0xff] }
  0x1e   : > { %680 = vmatpush1.bf16.msra.mxu0 %v2094_v44  ;;  %733 = vmatpush1.bf16.msra.mxu1 %v2096_v45  ;;  %v2663_v44 = vld [vmem:[%s2537_s8] sm:$0xff]   ;;  %v339_v45 = vld [vmem:[%s2922_s3 + $0x58] sm:$0xff] }
  0x1f   : > { %681 = vmatprep.subr.bf16.mxu0 %v2103_v46  ;;  %734 = vmatprep.subr.bf16.mxu1 %v2105_v48  ;;  %v343_v46 = vld [vmem:[%s2922_s3 + $0x78] sm:$0xff]  ;;  %v2138_v48 = vcombine.low %v331_v36, %v335_v37  ;;  %v1193_v21 = vld [vmem:[%s2922_s3 + $0x280] sm:$0xff] }
  0x20   : > { %615 = vmatprep.mubr.bf16.mxu0 %v2371_v8  ;;  %668 = vmatprep.mubr.bf16.mxu1 %v2371_v8  ;;  %v2147_v50 = vcombine.high %v339_v45, %v343_v46  ;;  %v2146_v56 = vcombine.low %v339_v45, %v343_v46  ;;  %v1201_v29 = vld [vmem:[%s2922_s3 + $0x2c0] sm:$0xff]  ;;  %v1187_v45 = vld [vmem:[%s2922_s3 + $0x250] sm:$0xff] }
  0x21   : > { %v1191_v46 = vld [vmem:[%s2922_s3 + $0x270] sm:$0xff] }
  0x22   : > { %682 = vmatpush1.bf16.msra.mxu0 %v2102_v52  ;;  %735 = vmatpush1.bf16.msra.mxu1 %v2104_v53  ;;  %v350_v52 = vld [vmem:[%s2922_s3 + $0xb0] sm:$0xff]  ;;  %v347_v53 = vld [vmem:[%s2922_s3 + $0x98] sm:$0xff] }
  0x23   : > { %683 = vmatprep.subr.bf16.mxu0 %v2111_v54  ;;  %736 = vmatprep.subr.bf16.mxu1 %v2113_v55  ;;  %v351_v54 = vld [vmem:[%s2922_s3 + $0xb8] sm:$0xff]  ;;  %v2144_v55 = vcombine.low %v338_v42, %v342_v43  ;;  %v2153_v57 = vcombine.high %v346_v51, %v350_v52 }
  0x24   : > { %v2154_v1 = vcombine.low %v347_v53, %v351_v54 }
  0x25   : > { %2123 = vmatmul.mubr.msk.bf16.gmra.mrb[4].mxu0 %vm566_vm0, %v2564_v58  ;;  %2125 = vmatmul.mubr.msk.bf16.gmra.mrb[4].mxu1 %vm566_vm0, %v2564_v58 }
  0x26   : > { %684 = vmatpush1.bf16.msra.mxu0 %v2110_v61  ;;  %737 = vmatpush1.bf16.msra.mxu1 %v2112_v62  ;;  %v2696_v61 = vld [vmem:[%s2537_s8 + $0x8] sm:$0xff]   ;;  %v355_v62 = vld [vmem:[%s2922_s3 + $0xd8] sm:$0xff] }
  0x27   : > { %685 = vmatprep.subr.bf16.mxu0 %v2119_v63  ;;  %738 = vmatprep.subr.bf16.mxu1 %v2121_v0  ;;  %v359_v63 = vld [vmem:[%s2922_s3 + $0xf8] sm:$0xff]  ;;  %v2152_v0 = vcombine.low %v346_v51, %v350_v52  ;;  %v2187_v52 = vcombine.high %v1187_v45, %v1191_v46 }
  0x28   : > { %711 = vmatprep.mubr.bf16.mxu0 %v2371_v8  ;;  %764 = vmatprep.mubr.bf16.mxu1 %v2371_v8  ;;  %v2163_v3 = vcombine.high %v355_v62, %v359_v63  ;;  %v2162_v10 = vcombine.low %v355_v62, %v359_v63  ;;  %v1203_v62 = vld [vmem:[%s2922_s3 + $0x2d0] sm:$0xff] }
  0x29   : > { %v1207_v63 = vld [vmem:[%s2922_s3 + $0x2f0] sm:$0xff] }
  0x2a   : > { %686 = vmatpush1.bf16.msra.mxu0 %v2118_v5  ;;  %739 = vmatpush1.bf16.msra.mxu1 %v2120_v6  ;;  %v1181_v5 = vld [vmem:[%s2922_s3 + $0x220] sm:$0xff]  ;;  %v1178_v6 = vld [vmem:[%s2922_s3 + $0x208] sm:$0xff] }
  0x2b   : > { %961 = vmatprep.subr.bf16.mxu0 %v2133_v7  ;;  %1014 = vmatprep.subr.bf16.mxu1 %v2135_v9  ;;  %v1182_v7 = vld [vmem:[%s2922_s3 + $0x228] sm:$0xff]  ;;  %v2160_v9 = vcombine.low %v354_v59, %v358_v60  ;;  %v2175_v11 = vcombine.high %v1177_v4, %v1181_v5  ;;  %v2174_v17 = vcombine.low %v1177_v4, %v1181_v5 }
  0x2c   : > { %v2177_v12 = vcombine.high %v1178_v6, %v1182_v7  ;;  %v2203_v5 = vcombine.high %v1203_v62, %v1207_v63 }
  0x2d   : > { %2126 = vmatmul.mubr.msk.bf16.vlgmr.msra.gmra.mrb[8].mxu0 %vm566_vm0, %v2525_v41  ;;  %2128 = vmatmul.mubr.msk.bf16.vlgmr.msra.gmra.mrb[8].mxu1 %vm566_vm0, %v2525_v41  ;;  %v2139_v41 = vcombine.high %v331_v36, %v335_v37  ;;  %v1179_v37 = vld [vmem:[%s2922_s3 + $0x210] sm:$0xff] }
  0x2e   : > { %962 = vmatpush1.bf16.msra.mxu0 %v2132_v14  ;;  %1015 = vmatpush1.bf16.msra.mxu1 %v2134_v15  ;;  %v1189_v14 = vld [vmem:[%s2922_s3 + $0x260] sm:$0xff]  ;;  %v1186_v15 = vld [vmem:[%s2922_s3 + $0x248] sm:$0xff] }
  0x2f   : > { %963 = vmatprep.subr.bf16.mxu0 %v2141_v16  ;;  %1016 = vmatprep.subr.bf16.mxu1 %v2143_v18  ;;  %v1190_v16 = vld [vmem:[%s2922_s3 + $0x268] sm:$0xff]  ;;  %v2176_v18 = vcombine.low %v1178_v6, %v1182_v7  ;;  %v2183_v19 = vcombine.high %v1185_v13, %v1189_v14  ;;  %v2202_v7 = vcombine.low %v1203_v62, %v1207_v63 }
  0x30   : > { %721 = vmatprep.mubr.bf16.mxu0 %v2371_v8  ;;  %774 = vmatprep.mubr.bf16.mxu1 %v2371_v8  ;;  %v2185_v20 = vcombine.high %v1186_v15, %v1190_v16  ;;  %v2184_v26 = vcombine.low %v1186_v15, %v1190_v16 }
  0x32   : > { %964 = vmatpush1.bf16.msra.mxu0 %v2140_v22  ;;  %1017 = vmatpush1.bf16.msra.mxu1 %v2142_v23  ;;  %v1197_v22 = vld [vmem:[%s2922_s3 + $0x2a0] sm:$0xff]  ;;  %v1194_v23 = vld [vmem:[%s2922_s3 + $0x288] sm:$0xff] }
  0x33   : > { %965 = vmatprep.subr.bf16.mxu0 %v2149_v24  ;;  %1018 = vmatprep.subr.bf16.mxu1 %v2151_v25  ;;  %v1198_v24 = vld [vmem:[%s2922_s3 + $0x2a8] sm:$0xff]  ;;  %v2182_v25 = vcombine.low %v1185_v13, %v1189_v14  ;;  %v2191_v27 = vcombine.high %v1193_v21, %v1197_v22  ;;  %v1629_v13 = vld [vmem:[%s2923_s4] sm:$0xff] }
  0x34   : > { %v2193_v28 = vcombine.high %v1194_v23, %v1198_v24  ;;  %v2192_v34 = vcombine.low %v1194_v23, %v1198_v24 }
  0x35   : > { %2127 = vmatmul.mubr.msk.bf16.gmra.mrb[12].mxu0 %vm566_vm0, %v2564_v58  ;;  %2129 = vmatmul.mubr.msk.bf16.gmra.mrb[12].mxu1 %vm566_vm0, %v2564_v58  ;;  %v2155_v58 = vcombine.high %v347_v53, %v351_v54  ;;  %v1195_v54 = vld [vmem:[%s2922_s3 + $0x290] sm:$0xff] }
  0x36   : > { %966 = vmatpush1.bf16.msra.mxu0 %v2148_v30  ;;  %1019 = vmatpush1.bf16.msra.mxu1 %v2150_v31  ;;  %v1205_v30 = vld [vmem:[%s2922_s3 + $0x2e0] sm:$0xff]  ;;  %v1202_v31 = vld [vmem:[%s2922_s3 + $0x2c8] sm:$0xff] }
  0x37   : > { %967 = vmatprep.subr.bf16.mxu0 %v2157_v32  ;;  %1020 = vmatprep.subr.bf16.mxu1 %v2159_v33  ;;  %v1206_v32 = vld [vmem:[%s2922_s3 + $0x2e8] sm:$0xff]  ;;  %v2190_v33 = vcombine.low %v1193_v21, %v1197_v22  ;;  %v2199_v35 = vcombine.high %v1201_v29, %v1205_v30 }
  0x38   : > { %993 = vmatprep.mubr.bf16.mxu0 %v2371_v8  ;;  %1046 = vmatprep.mubr.bf16.mxu1 %v2371_v8  ;;  %v2201_v36 = vcombine.high %v1202_v31, %v1206_v32  ;;  %v2200_v42 = vcombine.low %v1202_v31, %v1206_v32 }
  0x3a   : > { %968 = vmatpush1.bf16.msra.mxu0 %v2156_v38  ;;  %1021 = vmatpush1.bf16.msra.mxu1 %v2158_v39  ;;  %v1183_v38 = vld [vmem:[%s2922_s3 + $0x230] sm:$0xff]  ;;  %v1180_v39 = vld [vmem:[%s2922_s3 + $0x218] sm:$0xff] }
  0x3b   : > { %1067 = vmatprep.subr.bf16.mxu0 %v2137_v40  ;;  %1120 = vmatprep.subr.bf16.mxu1 %v2139_v41  ;;  %v1184_v40 = vld [vmem:[%s2922_s3 + $0x238] sm:$0xff]  ;;  %v2198_v41 = vcombine.low %v1201_v29, %v1205_v30  ;;  %v2179_v43 = vcombine.high %v1179_v37, %v1183_v38 }
  0x3c   : > { %v2180_v51 = vcombine.low %v1180_v39, %v1184_v40 }
  0x3d   : > { %2164 = vmatmul.mubr.msk.bf16.vlgmr.msra.gmra.mrb[0].mxu0 %vm566_vm0, %v2663_v44  ;;  %2166 = vmatmul.mubr.msk.bf16.vlgmr.msra.gmra.mrb[0].mxu1 %vm566_vm0, %v2663_v44 }
  0x3e   : > { %1068 = vmatpush1.bf16.msra.mxu0 %v2136_v47  ;;  %1121 = vmatpush1.bf16.msra.mxu1 %v2138_v48  ;;  %v2329_v47 = vld [vmem:[%s2592_s26] sm:$0xff]   ;;  %v1188_v48 = vld [vmem:[%s2922_s3 + $0x258] sm:$0xff] }
  0x3f   : > { %1069 = vmatprep.subr.bf16.mxu0 %v2145_v49  ;;  %1122 = vmatprep.subr.bf16.mxu1 %v2147_v50  ;;  %v1192_v49 = vld [vmem:[%s2922_s3 + $0x278] sm:$0xff]  ;;  %v2178_v50 = vcombine.low %v1179_v37, %v1183_v38 }
  0x40   : > { %1003 = vmatprep.mubr.bf16.mxu0 %v2371_v8  ;;  %1056 = vmatprep.mubr.bf16.mxu1 %v2371_v8  ;;  %v2189_v53 = vcombine.high %v1188_v48, %v1192_v49  ;;  %v2188_v59 = vcombine.low %v1188_v48, %v1192_v49 }
  0x42   : > { %1070 = vmatpush1.bf16.msra.mxu0 %v2144_v55  ;;  %1123 = vmatpush1.bf16.msra.mxu1 %v2146_v56  ;;  %v1199_v55 = vld [vmem:[%s2922_s3 + $0x2b0] sm:$0xff]  ;;  %v1196_v56 = vld [vmem:[%s2922_s3 + $0x298] sm:$0xff] }
  0x43   : > { %1071 = vmatprep.subr.bf16.mxu0 %v2153_v57  ;;  %1124 = vmatprep.subr.bf16.mxu1 %v2155_v58  ;;  %v1200_v57 = vld [vmem:[%s2922_s3 + $0x2b8] sm:$0xff]  ;;  %v2186_v58 = vcombine.low %v1187_v45, %v1191_v46  ;;  %v2195_v60 = vcombine.high %v1195_v54, %v1199_v55 }
  0x44   : > { %v2196_v4 = vcombine.low %v1196_v56, %v1200_v57 }
  0x45   : > { %2165 = vmatmul.mubr.msk.bf16.gmra.mrb[4].mxu0 %vm566_vm0, %v2696_v61  ;;  %2167 = vmatmul.mubr.msk.bf16.gmra.mrb[4].mxu1 %vm566_vm0, %v2696_v61 }
  0x46   : > { %1072 = vmatpush1.bf16.msra.mxu0 %v2152_v0  ;;  %1125 = vmatpush1.bf16.msra.mxu1 %v2154_v1  ;;  %v2330_v0 = vld [vmem:[%s2592_s26 + $0x8] sm:$0xff]   ;;  %v1204_v1 = vld [vmem:[%s2922_s3 + $0x2d8] sm:$0xff] }
  0x47   : > { %1073 = vmatprep.subr.bf16.mxu0 %v2161_v2  ;;  %1126 = vmatprep.subr.bf16.mxu1 %v2163_v3  ;;  %v1208_v2 = vld [vmem:[%s2922_s3 + $0x2f8] sm:$0xff]  ;;  %v2194_v3 = vcombine.low %v1195_v54, %v1199_v55 }
  0x48   : > { %1099 = vmatprep.mubr.bf16.mxu0 %v2371_v8  ;;  %1152 = vmatprep.mubr.bf16.mxu1 %v2371_v8  ;;  %v2205_v6 = vcombine.high %v1204_v1, %v1208_v2 }
  0x4a   : > { %1074 = vmatpush1.bf16.msra.mxu0 %v2160_v9  ;;  %1127 = vmatpush1.bf16.msra.mxu1 %v2162_v10  ;;  %v2204_v9 = vcombine.low %v1204_v1, %v1208_v2  ;;  %v1631_v10 = vlaneseq }
  0x4b   : > { %1385 = vmatprep.subr.bf16.mxu0 %v2175_v11  ;;  %1438 = vmatprep.subr.bf16.mxu1 %v2177_v12 }
  0x4c   : > { %v2834_v11 = vshrl.u32 %v1631_v10, 7 }
  0x4d   : > { %2168 = vmatmul.mubr.msk.bf16.vlgmr.msra.gmra.mrb[8].mxu0 %vm566_vm0, %v2663_v44  ;;  %2170 = vmatmul.mubr.msk.bf16.vlgmr.msra.gmra.mrb[8].mxu1 %vm566_vm0, %v2663_v44  ;;  %v2181_v44 = vcombine.high %v1180_v39, %v1184_v40 }
  0x4e   : > { %1386 = vmatpush1.bf16.msra.mxu0 %v2174_v17  ;;  %1439 = vmatpush1.bf16.msra.mxu1 %v2176_v18  ;;  %v1633_v12 = vsub.s32 0, %v2834_v11  ;;  %v1641_v14 = vsub.s32 2, %v2834_v11  ;;  %v1637_v15 = vsub.s32 1, %v2834_v11  ;;  %v1645_v16 = vsub.s32 3, %v2834_v11 }
  0x4f   : > { %1387 = vmatprep.subr.bf16.mxu0 %v2183_v19  ;;  %1440 = vmatprep.subr.bf16.mxu1 %v2185_v20  ;;  %v1649_v24 = vsub.s32 4, %v2834_v11  ;;  %v1657_v29 = vsub.s32 6, %v2834_v11  ;;  %v1653_v30 = vsub.s32 5, %v2834_v11 }
  0x50   : > { %1109 = vmatprep.mubr.bf16.mxu0 %v2371_v8  ;;  %1162 = vmatprep.mubr.bf16.mxu1 %v2371_v8  ;;  %v1642_v17 = vrot.slane %v1629_v13, %v1641_v14  ;;  %v1638_v18 = vrot.slane %v1629_v13, %v1637_v15  ;;  %v2843_v19 = vrot.slane %v1629_v13, %v1645_v16 }
  0x51   : > { %v2851_v45 = vrot.slane %v1629_v13, %v1649_v24  ;;  %v2853_v48 = vrot.slane %v1629_v13, %v1657_v29  ;;  %v2855_v49 = vrot.slane %v1629_v13, %v1653_v30 }
  0x52   : > { %1388 = vmatpush1.bf16.msra.mxu0 %v2182_v25  ;;  %1441 = vmatpush1.bf16.msra.mxu1 %v2184_v26 }
  0x53   : > { %1389 = vmatprep.subr.bf16.mxu0 %v2191_v27  ;;  %1442 = vmatprep.subr.bf16.mxu1 %v2193_v28 }
  0x55   : > { %2169 = vmatmul.mubr.msk.bf16.gmra.mrb[12].mxu0 %vm566_vm0, %v2696_v61  ;;  %2171 = vmatmul.mubr.msk.bf16.gmra.mrb[12].mxu1 %vm566_vm0, %v2696_v61  ;;  %v2197_v61 = vcombine.high %v1196_v56, %v1200_v57 }
  0x56   : > { %1390 = vmatpush1.bf16.msra.mxu0 %v2190_v33  ;;  %1443 = vmatpush1.bf16.msra.mxu1 %v2192_v34 }
  0x57   : > { %1391 = vmatprep.subr.bf16.mxu0 %v2199_v35  ;;  %1444 = vmatprep.subr.bf16.mxu1 %v2201_v36  ;;  %v1661_v36 = vsub.s32 7, %v2834_v11 }
  0x58   : > { %1417 = vmatprep.mubr.bf16.mxu0 %v2371_v8  ;;  %1470 = vmatprep.mubr.bf16.mxu1 %v2371_v8 }
  0x5a   : > { %1392 = vmatpush1.bf16.msra.mxu0 %v2198_v41  ;;  %1445 = vmatpush1.bf16.msra.mxu1 %v2200_v42 }
  0x5b   : > { %1491 = vmatprep.subr.bf16.mxu0 %v2179_v43  ;;  %1544 = vmatprep.subr.bf16.mxu1 %v2181_v44 }
  0x5d   : > { %2206 = vmatmul.mubr.msk.bf16.vlgmr.msra.gmra.mrb[0].mxu0 %vm566_vm0, %v2329_v47  ;;  %2208 = vmatmul.mubr.msk.bf16.vlgmr.msra.gmra.mrb[0].mxu1 %vm566_vm0, %v2329_v47 }
  0x5e   : > { %1492 = vmatpush1.bf16.msra.mxu0 %v2178_v50  ;;  %1545 = vmatpush1.bf16.msra.mxu1 %v2180_v51 }
  0x5f   : > { %1493 = vmatprep.subr.bf16.mxu0 %v2187_v52  ;;  %1546 = vmatprep.subr.bf16.mxu1 %v2189_v53  ;;  %v2857_v53 = vrot.slane %v1629_v13, %v1661_v36 }
  0x60   : > { %1427 = vmatprep.mubr.bf16.mxu0 %v2371_v8  ;;  %1480 = vmatprep.mubr.bf16.mxu1 %v2371_v8 }
  0x62   : > { %1494 = vmatpush1.bf16.msra.mxu0 %v2186_v58  ;;  %1547 = vmatpush1.bf16.msra.mxu1 %v2188_v59 }
  0x63   : > { %1495 = vmatprep.subr.bf16.mxu0 %v2195_v60  ;;  %1548 = vmatprep.subr.bf16.mxu1 %v2197_v61 }
  0x65   : > { %2207 = vmatmul.mubr.msk.bf16.gmra.mrb[4].mxu0 %vm566_vm0, %v2330_v0  ;;  %2209 = vmatmul.mubr.msk.bf16.gmra.mrb[4].mxu1 %vm566_vm0, %v2330_v0 }
  0x66   : > { %1496 = vmatpush1.bf16.msra.mxu0 %v2194_v3  ;;  %1549 = vmatpush1.bf16.msra.mxu1 %v2196_v4 }
  0x67   : > { %1497 = vmatprep.subr.bf16.mxu0 %v2203_v5  ;;  %1550 = vmatprep.subr.bf16.mxu1 %v2205_v6 }
  0x68   : > { %1523 = vmatprep.mubr.bf16.mxu0 %v2371_v8  ;;  %1576 = vmatprep.mubr.bf16.mxu1 %v2371_v8 }
  0x6a   : > { %1498 = vmatpush1.bf16.msra.mxu0 %v2202_v7  ;;  %1551 = vmatpush1.bf16.msra.mxu1 %v2204_v9 }
  0x6d   : > { %2210 = vmatmul.mubr.msk.bf16.vlgmr.msra.gmra.mrb[8].mxu0 %vm566_vm0, %v2329_v47  ;;  %2212 = vmatmul.mubr.msk.bf16.vlgmr.msra.gmra.mrb[8].mxu1 %vm566_vm0, %v2329_v47 }
  0x6e   : > { %1533 = vmatprep.mubr.bf16.mxu0 %v2371_v8  ;;  %1586 = vmatprep.mubr.bf16.mxu1 %v2371_v8  ;;  %v1634_v8 = vrot.slane %v1629_v13, %v1633_v12 }
  0x75   : > { %2211 = vmatmul.mubr.msk.bf16.gmra.mrb[12].mxu0 %vm566_vm0, %v2330_v0  ;;  %2213 = vmatmul.mubr.msk.bf16.gmra.mrb[12].mxu1 %vm566_vm0, %v2330_v0 }
 0x130   : > { %v1419_v20 = vpop.f32.mrb[0].mxu0  ;;  %v1472_v22 = vpop.f32.mrb[0].mxu1 }
 0x131   : > { %v1671_v21 = vadd.f32 %v1634_v8, %v1419_v20  ;;  %v1421_v23 = vpop.f32.mrb[1].mxu0  ;;  %v1673_v25 = vadd.f32 %v1642_v17, %v1472_v22  ;;  %v1474_v27 = vpop.f32.mrb[1].mxu1 }
 0x132   : > { %v1672_v26 = vadd.f32 %v1638_v18, %v1421_v23  ;;  %v1423_v28 = vpop.f32.mrb[2].mxu0  ;;  %v1674_v32 = vadd.f32 %v2843_v19, %v1474_v27  ;;  %v1476_v34 = vpop.f32.mrb[2].mxu1 }
 0x133   : > { %v1703_v31 = vmul.f32 0.2, %v1671_v21  ;;  %v1679_v33 = vadd.f32 %v1634_v8, %v1423_v28  ;;  %v1425_v35 = vpop.f32.mrb[3].mxu0  ;;  %v1705_v37 = vmul.f32 0.2, %v1673_v25  ;;  %v1681_v39 = vadd.f32 %v1642_v17, %v1476_v34  ;;  %v1478_v41 = vpop.f32.mrb[3].mxu1 }
 0x134   : > { %v1704_v38 = vmul.f32 0.2, %v1672_v26  ;;  %v1680_v40 = vadd.f32 %v1638_v18, %v1425_v35  ;;  %v1706_v42 = vmul.f32 0.2, %v1674_v32  ;;  %v1682_v44 = vadd.f32 %v2843_v19, %v1478_v41 }
 0x135   : > { %v1711_v43 = vmul.f32 0.2, %v1679_v33  ;;  %v1713_v46 = vmul.f32 0.2, %v1681_v39  ;;  %v1735_v50 = vmax.f32 %v1671_v21, %v1703_v31  ;;  %v1737_v54 = vmax.f32 %v1673_v25, %v1705_v37 }
 0x136   : > { %v1712_v47 = vmul.f32 0.2, %v1680_v40  ;;  %v1714_v52 = vmul.f32 0.2, %v1682_v44  ;;  %v1736_v55 = vmax.f32 %v1672_v26, %v1704_v38  ;;  %v1738_v59 = vmax.f32 %v1674_v32, %v1706_v42 }
 0x137   : > { %v1743_v51 = vmax.f32 %v1679_v33, %v1711_v43  ;;  %v1745_v56 = vmax.f32 %v1681_v39, %v1713_v46 }
 0x138   : > { %v1744_v57 = vmax.f32 %v1680_v40, %v1712_v47  ;;  %v1429_v58 = vpop.f32.mrb[4].mxu0  ;;  %v1746_v61 = vmax.f32 %v1682_v44, %v1714_v52  ;;  %v1482_v63 = vpop.f32.mrb[4].mxu1 }
 0x139   : > { %v1767_v60 = vmax.f32 %v1735_v50, %v1743_v51  ;;  %v1687_v62 = vadd.f32 %v1634_v8, %v1429_v58  ;;  %v1431_v0 = vpop.f32.mrb[5].mxu0  ;;  %v1785_v1 = vmax.f32 %v1737_v54, %v1745_v56  ;;  %v1689_v3 = vadd.f32 %v1642_v17, %v1482_v63  ;;  %v1484_v5 = vpop.f32.mrb[5].mxu1 }
 0x13a   : > { %v1776_v2 = vmax.f32 %v1736_v55, %v1744_v57  ;;  %v1688_v4 = vadd.f32 %v1638_v18, %v1431_v0  ;;  %v1433_v6 = vpop.f32.mrb[6].mxu0  ;;  %v1794_v7 = vmax.f32 %v1738_v59, %v1746_v61  ;;  %v1690_v10 = vadd.f32 %v2843_v19, %v1484_v5  ;;  %v1486_v13 = vpop.f32.mrb[6].mxu1 }
 0x13b   : > { %v1719_v9 = vmul.f32 0.2, %v1687_v62  ;;  %v1695_v12 = vadd.f32 %v1634_v8, %v1433_v6  ;;  %v1435_v14 = vpop.f32.mrb[7].mxu0  ;;  %v1721_v15 = vmul.f32 0.2, %v1689_v3  ;;  %v1697_v20 = vadd.f32 %v1642_v17, %v1486_v13  ;;  %v1488_v22 = vpop.f32.mrb[7].mxu1 }
 0x13c   : > { %v1720_v16 = vmul.f32 0.2, %v1688_v4  ;;  %v1696_v21 = vadd.f32 %v1638_v18, %v1435_v14  ;;  %v1722_v24 = vmul.f32 0.2, %v1690_v10  ;;  %v1698_v26 = vadd.f32 %v2843_v19, %v1488_v22 }
 0x13d   : > { %v1751_v23 = vmax.f32 %v1687_v62, %v1719_v9  ;;  %v1727_v25 = vmul.f32 0.2, %v1695_v12  ;;  %v1753_v27 = vmax.f32 %v1689_v3, %v1721_v15  ;;  %v1729_v29 = vmul.f32 0.2, %v1697_v20 }
 0x13e   : > { %v1752_v28 = vmax.f32 %v1688_v4, %v1720_v16  ;;  %v1728_v30 = vmul.f32 0.2, %v1696_v21  ;;  %v1754_v32 = vmax.f32 %v1690_v10, %v1722_v24  ;;  %v1730_v8 = vmul.f32 0.2, %v1698_v26 }
 0x13f   : > { %v1768_v31 = vmax.f32 %v1767_v60, %v1751_v23  ;;  %v1759_v33 = vmax.f32 %v1695_v12, %v1727_v25  ;;  %v1786_v34 = vmax.f32 %v1785_v1, %v1753_v27  ;;  %v1761_v36 = vmax.f32 %v1697_v20, %v1729_v29 }
 0x140   : > { %v1777_v35 = vmax.f32 %v1776_v2, %v1752_v28  ;;  %v1760_v37 = vmax.f32 %v1696_v21, %v1728_v30  ;;  %v1525_v17 = vpop.f32.mrb[8].mxu0  ;;  %v1795_v18 = vmax.f32 %v1794_v7, %v1754_v32  ;;  %v1762_v39 = vmax.f32 %v1698_v26, %v1730_v8  ;;  %v1578_v19 = vpop.f32.mrb[8].mxu1 }
 0x141   : > { %v1769_v38 = vmax.f32 %v1768_v31, %v1759_v33  ;;  %v2862_v40 = vadd.f32 %v2851_v45, %v1525_v17  ;;  %v1527_v41 = vpop.f32.mrb[9].mxu0  ;;  %v1787_v42 = vmax.f32 %v1786_v34, %v1761_v36  ;;  %v1677_v44 = vadd.f32 %v2853_v48, %v1578_v19  ;;  %v1580_v47 = vpop.f32.mrb[9].mxu1 }
 0x142   : > { %v1778_v43 = vmax.f32 %v1777_v35, %v1760_v37  ;;  %v1676_v46 = vadd.f32 %v2855_v49, %v1527_v41  ;;  %v1529_v50 = vpop.f32.mrb[10].mxu0  ;;  %v1796_v52 = vmax.f32 %v1795_v18, %v1762_v39  ;;  %v1678_v55 = vadd.f32 %v2857_v53, %v1580_v47  ;;  %v1582_v56 = vpop.f32.mrb[10].mxu1 }
 0x143   : > { %v1770_v51 = vrot.slane %v1769_v38, 4  ;;  %v1707_v54 = vmul.f32 0.2, %v2862_v40  ;;  %v1531_v57 = vpop.f32.mrb[11].mxu0  ;;  %v1788_v58 = vrot.slane %v1787_v42, 4  ;;  %v1584_v2 = vpop.f32.mrb[11].mxu1  ;;  %v1683_v12 = vadd.f32 %v2851_v45, %v1529_v50 }
 0x144   : > { %v1779_v59 = vrot.slane %v1778_v43, 4  ;;  %v1709_v60 = vmul.f32 0.2, %v1677_v44  ;;  %v1708_v61 = vmul.f32 0.2, %v1676_v46  ;;  %v1797_v63 = vrot.slane %v1796_v52, 4 }
 0x145   : > { %v1771_v62 = vmax.f32 %v1769_v38, %v1770_v51  ;;  %v1739_v0 = vmax.f32 %v2862_v40, %v1707_v54  ;;  %v1710_v1 = vmul.f32 0.2, %v1678_v55  ;;  %v1789_v3 = vmax.f32 %v1787_v42, %v1788_v58 }
 0x146   : > { %v1780_v4 = vmax.f32 %v1778_v43, %v1779_v59  ;;  %v1741_v5 = vmax.f32 %v1677_v44, %v1709_v60  ;;  %v1740_v6 = vmax.f32 %v1676_v46, %v1708_v61  ;;  %v1798_v9 = vmax.f32 %v1796_v52, %v1797_v63 }
 0x147   : > { %v1772_v7 = vrot.slane %v1771_v62, 2  ;;  %v1742_v10 = vmax.f32 %v1678_v55, %v1710_v1  ;;  %v1790_v13 = vrot.slane %v1789_v3, 2  ;;  %v1685_v15 = vadd.f32 %v2853_v48, %v1582_v56 }
 0x148   : > { %v1781_v14 = vrot.slane %v1780_v4, 2  ;;  %v1684_v16 = vadd.f32 %v2855_v49, %v1531_v57  ;;  %v1535_v20 = vpop.f32.mrb[12].mxu0  ;;  %v1799_v22 = vrot.slane %v1798_v9, 2  ;;  %v1715_v23 = vmul.f32 0.2, %v1683_v12  ;;  %v1588_v25 = vpop.f32.mrb[12].mxu1 }
 0x149   : > { %v1773_v21 = vmax.f32 %v1771_v62, %v1772_v7  ;;  %v1686_v24 = vadd.f32 %v2857_v53, %v1584_v2  ;;  %v1537_v26 = vpop.f32.mrb[13].mxu0  ;;  %v1791_v27 = vmax.f32 %v1789_v3, %v1790_v13  ;;  %v1717_v29 = vmul.f32 0.2, %v1685_v15  ;;  %v1590_v31 = vpop.f32.mrb[13].mxu1 }
 0x14a   : > { %v1782_v28 = vmax.f32 %v1780_v4, %v1781_v14  ;;  %v1716_v30 = vmul.f32 0.2, %v1684_v16  ;;  %v1539_v32 = vpop.f32.mrb[14].mxu0  ;;  %v1800_v8 = vmax.f32 %v1798_v9, %v1799_v22  ;;  %v1747_v34 = vmax.f32 %v1683_v12, %v1715_v23  ;;  %v1592_v36 = vpop.f32.mrb[14].mxu1 }
 0x14b   : > { %v1774_v33 = vrot.slane %v1773_v21, 1  ;;  %v1718_v35 = vmul.f32 0.2, %v1686_v24  ;;  %v1541_v37 = vpop.f32.mrb[15].mxu0  ;;  %v1792_v17 = vrot.slane %v1791_v27, 1  ;;  %v1749_v38 = vmax.f32 %v1685_v15, %v1717_v29  ;;  %v1594_v40 = vpop.f32.mrb[15].mxu1 }
 0x14c   : > { %v1783_v18 = vrot.slane %v1782_v28, 1  ;;  %v1748_v39 = vmax.f32 %v1684_v16, %v1716_v30  ;;  %v1801_v41 = vrot.slane %v1800_v8, 1  ;;  %v1803_v42 = vmax.f32 %v1739_v0, %v1747_v34 }
 0x14d   : > { %v2873_v19 = vmax.f32 %v1773_v21, %v1774_v33  ;;  %v1750_v43 = vmax.f32 %v1686_v24, %v1718_v35  ;;  %v2875_v44 = vmax.f32 %v1791_v27, %v1792_v17  ;;  %v1821_v47 = vmax.f32 %v1741_v5, %v1749_v38 }
 0x14e   : > { %v2877_v46 = vmax.f32 %v1782_v28, %v1783_v18  ;;  %v1812_v50 = vmax.f32 %v1740_v6, %v1748_v39  ;;  %v2879_v51 = vmax.f32 %v1800_v8, %v1801_v41  ;;  %v1691_v54 = vadd.f32 %v2851_v45, %v1535_v20 }
 0x14f   : > { %v1830_v52 = vmax.f32 %v1742_v10, %v1750_v43  ;;  %v1693_v55 = vadd.f32 %v2853_v48, %v1588_v25  ;;  %v1692_v56 = vadd.f32 %v2855_v49, %v1537_v26  ;;  %v1694_v57 = vadd.f32 %v2857_v53, %v1590_v31 }
 0x150   : > { %v1699_v58 = vadd.f32 %v2851_v45, %v1539_v32  ;;  %v1701_v59 = vadd.f32 %v2853_v48, %v1592_v36  ;;  %v1723_v60 = vmul.f32 0.2, %v1691_v54  ;;  %v1700_v62 = vadd.f32 %v2855_v49, %v1541_v37 }
 0x151   : > { %v1725_v61 = vmul.f32 0.2, %v1693_v55  ;;  %v1702_v63 = vadd.f32 %v2857_v53, %v1594_v40  ;;  %v1724_v0 = vmul.f32 0.2, %v1692_v56  ;;  %v1726_v1 = vmul.f32 0.2, %v1694_v57 }
 0x152   : > { %v1731_v2 = vmul.f32 0.2, %v1699_v58  ;;  %v1755_v3 = vmax.f32 %v1691_v54, %v1723_v60  ;;  %v1733_v5 = vmul.f32 0.2, %v1701_v59  ;;  %v1732_v6 = vmul.f32 0.2, %v1700_v62 }
 0x153   : > { %v1757_v4 = vmax.f32 %v1693_v55, %v1725_v61  ;;  %v1756_v7 = vmax.f32 %v1692_v56, %v1724_v0  ;;  %v1758_v9 = vmax.f32 %v1694_v57, %v1726_v1  ;;  %v1734_v12 = vmul.f32 0.2, %v1702_v63 }
 0x154   : > { %v1763_v10 = vmax.f32 %v1699_v58, %v1731_v2  ;;  %v1804_v45 = vmax.f32 %v1803_v42, %v1755_v3  ;;  %v1765_v48 = vmax.f32 %v1701_v59, %v1733_v5  ;;  %v1764_v14 = vmax.f32 %v1700_v62, %v1732_v6 }
 0x155   : > { %v1822_v13 = vmax.f32 %v1821_v47, %v1757_v4  ;;  %v1813_v15 = vmax.f32 %v1812_v50, %v1756_v7  ;;  %v1831_v16 = vmax.f32 %v1830_v52, %v1758_v9  ;;  %v1766_v49 = vmax.f32 %v1702_v63, %v1734_v12 }
 0x156   : > { %v1805_v20 = vmax.f32 %v1804_v45, %v1763_v10  ;;  %v2372_v47 = vmov (!%p2214_p7), 1966171168   ;;  %v1851_v52 = vcombine.low (!%p2214_p7), %v2873_v19, %v2877_v46  ;;  %v1852_v54 = vcombine.low (!%p2214_p7), %v2875_v44, %v2879_v51 }
 0x157   : > { %v1823_v53 = vmax.f32 %v1822_v13, %v1765_v48  ;;  %v1814_v21 = vmax.f32 %v1813_v15, %v1764_v14  ;;  %v1832_v22 = vmax.f32 %v1831_v16, %v1766_v49  ;;  %v1856_v50 = vunpack.c.l.s4 (!%p2214_p7), %v2372_v47 }
 0x158   : > { %v1806_v23 = vrot.slane %v1805_v20, 4 }
 0x159   : > { %v1824_v24 = vrot.slane %v1823_v53, 4  ;;  %v1815_v25 = vrot.slane %v1814_v21, 4  ;;  %v1833_v26 = vrot.slane %v1832_v22, 4  ;;  %v1857_v57 = vunpack.c.0.s8 (!%p2214_p7), %v1856_v50 }
 0x15a   : > { %v1807_v27 = vmax.f32 %v1805_v20, %v1806_v23 }
 0x15b   : > { %v1825_v28 = vmax.f32 %v1823_v53, %v1824_v24  ;;  %v1816_v29 = vmax.f32 %v1814_v21, %v1815_v25  ;;  %v1834_v30 = vmax.f32 %v1832_v22, %v1833_v26  ;;  %v1860_v58 = vsub.s32 (!%p2214_p7), %v1857_v57, %v2834_v11 }
 0x15c   : > { %v1808_v31 = vrot.slane %v1807_v27, 2 }
 0x15d   : > { %v1826_v32 = vrot.slane %v1825_v28, 2  ;;  %v1817_v33 = vrot.slane %v1816_v29, 2  ;;  %v1835_v8 = vrot.slane %v1834_v30, 2  ;;  %1842 = sbr.rel (%p2214_p7) target bundleno = 368 (0x170), region = 44  ;;  %v1861_v59 = vrot.slane (!%p2214_p7), %v1851_v52, %v1860_v58 }
 0x15e   : > { %v1809_v34 = vmax.f32 %v1807_v27, %v1808_v31  ;;  %v1868_v60 = vrot.slane (!%p2214_p7), %v1852_v54, %v1860_v58 }
 0x15f   : > { %v1827_v35 = vmax.f32 %v1825_v28, %v1826_v32  ;;  %v1818_v36 = vmax.f32 %v1816_v29, %v1817_v33  ;;  %v1836_v37 = vmax.f32 %v1834_v30, %v1835_v8 }
 0x160   : > { %v1810_v17 = vrot.slane %v1809_v34, 1  ;;  %v1883_v63 = vcombine.low (!%p2214_p7), %v1861_v59, %v1868_v60 }
 0x161   : > { %v1828_v18 = vrot.slane %v1827_v35, 1  ;;  %v1819_v38 = vrot.slane %v1818_v36, 1  ;;  %v1837_v39 = vrot.slane %v1836_v37, 1 }
 0x162   : > { %v1811_v40 = vmax.f32 %v1809_v34, %v1810_v17  ;;  %v1891_v1 = vrot.slane (!%p2214_p7), %v1883_v63, %v1860_v58 }
 0x163   : > { %v1829_v41 = vmax.f32 %v1827_v35, %v1828_v18  ;;  %v1820_v42 = vmax.f32 %v1818_v36, %v1819_v38  ;;  %v1838_v43 = vmax.f32 %v1836_v37, %v1837_v39 }
 0x165   : > { %v1853_v55 = vcombine.low %v1811_v40, %v1820_v42  ;;  %v1854_v56 = vcombine.low %v1829_v41, %v1838_v43 }
 0x167   : > { %v1875_v61 = vrot.slane %v1853_v55, %v1860_v58  ;;  %v1882_v62 = vrot.slane %v1854_v56, %v1860_v58 }
 0x169   : > { %v1884_v0 = vcombine.low %v1875_v61, %v1882_v62 }
 0x16b   : > { %v1898_v2 = vrot.slane %v1884_v0, %v1860_v58 }
 0x16d   : > { %v1899_v3 = vcombine.low %v1891_v1, %v1898_v2 }
 0x16f   : > { %1901 = vst [vmem:[%s2484_s12] sm:$0xff] %v1899_v3 }
 0x170 PF: > { %p2215_p8 = scmp.le.s32.totalorder %s2353_s18, 0 }
 0x171   : > { %v2373_v4 = vmov (!%p2215_p8), 1966171168   ;;  %v1915_v6 = vcombine.low (!%p2215_p8), %v2873_v19, %v2877_v46  ;;  %v1916_v7 = vcombine.low (!%p2215_p8), %v2875_v44, %v2879_v51  ;;  %v1917_v9 = vcombine.low (!%p2215_p8), %v1811_v40, %v1820_v42 }
 0x172   : > { %1905 = sbr.rel (%p2215_p8) target bundleno = 387 (0x183), region = 48  ;;  %v1920_v5 = vunpack.c.l.s4 (!%p2215_p8), %v2373_v4  ;;  %v1918_v10 = vcombine.low (!%p2215_p8), %v1829_v41, %v1838_v43 }
 0x174   : > { %v1921_v12 = vunpack.c.0.s8 (!%p2215_p8), %v1920_v5 }
 0x176   : > { %v1924_v45 = vsub.s32 (!%p2215_p8), %v1921_v12, %v2834_v11  ;;  %v1906_v21 = vld [vmem:[%s2484_s12] sm:$0xff] (!%p2215_p8) }
 0x178   : > { %v1925_v13 = vrot.slane (!%p2215_p8), %v1915_v6, %v1924_v45  ;;  %v1932_v48 = vrot.slane (!%p2215_p8), %v1916_v7, %v1924_v45  ;;  %v1939_v14 = vrot.slane (!%p2215_p8), %v1917_v9, %v1924_v45  ;;  %v1946_v15 = vrot.slane (!%p2215_p8), %v1918_v10, %v1924_v45 }
 0x17a   : > { %v1947_v16 = vcombine.low %v1925_v13, %v1932_v48  ;;  %v1948_v49 = vcombine.low %v1939_v14, %v1946_v15 }
 0x17c   : > { %v1955_v20 = vrot.slane %v1947_v16, %v1924_v45  ;;  %v1962_v53 = vrot.slane %v1948_v49, %v1924_v45 }
 0x17e   : > { %v1963_v22 = vcombine.low %v1955_v20, %v1962_v53 }
 0x180   : > { %v1965_v19 = vmax.f32 %v1906_v21, %v1963_v22 }
 0x182   : > { %1966 = vst [vmem:[%s2484_s12] sm:$0xff] %v1965_v19 }
 0x183 PF: > { %s15_s22 = sadd.s32 1, %s2369_s22   ;;  %s2925_s18 = smov %s2361_s20 }
 0x184   : > { %p12_p9 = scmp.ge.s32.totalorder %s15_s22, 6   ;;  %s2926_s19 = smov %s2365_s21 }
 0x185   : > { %s2927_s20 = smov %s2930_s23  ;;  %s2928_s21 = smov %s2934_s24 }
 0x186   :  { %14 = sbr.rel (!%p12_p9) target bundleno = 3 (0x3), region = 84 }

// kernel: dgcnn_semseg_forward.9
= control target key start
LH: loop header
LB: loop body
LE: loop exit
PB: predicated region body
PF: predicated region fallthrough
CT: control target
= control target key end

     0   :  { %s5269_s13 = smov 0   ;;  %s5271_s14 = smov 0   ;;  %s6674_s0 = inlined_call_operand.vmem [shape: f32[2,1,1024], index: 0, kind: input, shape index: {}]   ;;  %s6675_s1 = inlined_call_operand.vmem [shape: bf16[2,64,64], index: 1, kind: input, shape index: {}]   ;;  %s6676_s2 = inlined_call_operand.vmem [shape: bf16[2,64,64], index: 2, kind: input, shape index: {}]   ;;  %s6677_s3 = inlined_call_operand.vmem [shape: bf16[2,64,64], index: 3, kind: input, shape index: {}]   ;;  %s6678_s4 = inlined_call_operand.vmem [shape: bf16[1024,512], index: 4, kind: input, shape index: {}]   ;;  %s6679_s5 = inlined_call_operand.vmem [shape: bf16[192,512], index: 5, kind: input, shape index: {}]   ;;  %s6680_s6 = inlined_call_operand.vmem [shape: f32[1,512], index: 6, kind: input, shape index: {}]   ;;  %s6681_s7 = inlined_call_operand.vmem [shape: bf16[512,256], index: 7, kind: input, shape index: {}]   ;;  %s6682_s8 = inlined_call_operand.vmem [shape: f32[1,256], index: 8, kind: input, shape index: {}]   ;;  %s6683_s9 = inlined_call_operand.vmem [shape: bf16[256,13], index: 9, kind: input, shape index: {}]   ;;  %s6684_s10 = inlined_call_operand.vmem [shape: f32[2,64,13], index: 10, kind: output, shape index: {}]  }
   0x1   :  { %s5273_s15 = smov 0   ;;  %s5275_s16 = smov 0  }
   0x2   :  { %s5277_s17 = smov 0  }
   0x3 LB: > { %s29_s18 = sadd.s32 1, %s5203_s15  ;;  %s32_s19 = sadd.s32 1, %s5207_s16  ;;  %s5211_s17 = sphi %s5277_s17, %s20_s17   ;;  %s5207_s16 = sphi %s5275_s16, %s6688_s16   ;;  %s5203_s15 = sphi %s5273_s15, %s6687_s15   ;;  %s5199_s14 = sphi %s5271_s14, %s6686_s14   ;;  %s5195_s13 = sphi %s5269_s13, %s6685_s13  }
   0x4   : > { %p30_p0 = scmp.ge.s32.totalorder %s29_s18, 2  ;;  %p4042_p1 = scmp.ge.s32.totalorder %s5211_s17, 1 }
   0x5   : > { %p376_p2 = scmp.lt.s32.totalorder %s5211_s17, 5 }
   0x6   : > { %s6690_s18 = smov (%p30_p0, %s29_s18), 0  ;;  %s6692_s19 = smov (!%p30_p0, %s32_s19), %s5207_s16 }
   0x7   : > { %p377_p3 = pnand %p4042_p1, %p376_p2  ;;  %p34_p4 = scmp.ge.s32.totalorder %s6692_s19, 2 }
   0x8   : > { %v4599_v0 = vld [vmem:[%s6678_s4 + $0x4] ss:$16 sps:$4 sm:$0xff] (!%p377_p3)   ;;  %v4603_v2 = vld [vmem:[%s6678_s4] ss:$16 sps:$4 sm:$0xff] (!%p377_p3)   ;;  %p444_p5 = scmp.lt.s32.totalorder (!%p377_p3), %s5199_s14, 1  ;;  %v747_v36 = vlaneseq (!%p377_p3)  ;;  %s4044_s30 = sshll.u32 (!%p377_p3), %s5195_s13, 2 }
   0x9   : > { %s6694_s19 = smov (%p34_p4, %s6692_s19), 0  ;;  %380 = sbr.rel (%p377_p3) target bundleno = 1040 (0x410), region = 60 }
   0xa   : > { %v4601_v1 = vld [vmem:[%s6678_s4 + $0x204] ss:$16 sps:$4 sm:$0xff] (!%p377_p3)   ;;  %2075 = vmatprep.subr.bf16.mxu1 (!%p377_p3), %v4599_v0  ;;  %v4604_v3 = vld [vmem:[%s6678_s4 + $0x200] ss:$16 sps:$4 sm:$0xff] (!%p377_p3)   ;;  %v5424_v40 = vshrl.u32 (!%p377_p3), %v747_v36, 7  ;;  %p451_p6 = scmp.lt.s32.totalorder (!%p377_p3), %s4044_s30, 7 }
   0xb   : > { %2116 = vmatprep.subr.bf16.mxu0 (!%p377_p3), %v4601_v1  ;;  %v4605_v4 = vld [vmem:[%s6678_s4 + $0x24] ss:$16 sps:$4 sm:$0xff] (!%p377_p3)   ;;  %2076 = vmatpush1.bf16.msra.mxu1 (!%p377_p3), %v4603_v2  ;;  %v4609_v6 = vld [vmem:[%s6678_s4 + $0x20] ss:$16 sps:$4 sm:$0xff] (!%p377_p3)   ;;  %vm2533_vm0 = vcmask (!%p377_p3), 523264   ;;  %vm3895_vm1 = vcmask (!%p377_p3), 105472  }
   0xc   : > { %2117 = vmatpush1.bf16.msra.mxu0 (!%p377_p3), %v4604_v3  ;;  %v4607_v5 = vld [vmem:[%s6678_s4 + $0x224] ss:$16 sps:$4 sm:$0xff] (!%p377_p3)   ;;  %2077 = vmatprep.subr.bf16.mxu1 (!%p377_p3), %v4605_v4  ;;  %v4610_v7 = vld [vmem:[%s6678_s4 + $0x220] ss:$16 sps:$4 sm:$0xff] (!%p377_p3)   ;;  %v5448_v46 = vsub.s32 (!%p377_p3), 1, %v5424_v40  ;;  %v761_v47 = vsub.s32 (!%p377_p3), 3, %v5424_v40 }
   0xd   : > { %2118 = vmatprep.subr.bf16.mxu0 (!%p377_p3), %v4607_v5  ;;  %v4611_v8 = vld [vmem:[%s6678_s4 + $0x44] ss:$16 sps:$4 sm:$0xff] (!%p377_p3)   ;;  %v4615_v10 = vld [vmem:[%s6678_s4 + $0x40] ss:$16 sps:$4 sm:$0xff] (!%p377_p3)   ;;  %v765_v51 = vsub.s32 (!%p377_p3), 4, %v5424_v40  ;;  %v5506_v5 = vsub.s32 (!%p377_p3), 0, %v5424_v40 }
   0xe   : > { %v4613_v9 = vld [vmem:[%s6678_s4 + $0x244] ss:$16 sps:$4 sm:$0xff] (!%p377_p3)   ;;  %v4616_v11 = vld [vmem:[%s6678_s4 + $0x240] ss:$16 sps:$4 sm:$0xff] (!%p377_p3)  }
   0xf   : > { %2078 = vmatpush1.bf16.msra.mxu1 (!%p377_p3), %v4609_v6  ;;  %v4617_v12 = vld [vmem:[%s6678_s4 + $0x64] ss:$16 sps:$4 sm:$0xff] (!%p377_p3)   ;;  %v4621_v14 = vld [vmem:[%s6678_s4 + $0x60] ss:$16 sps:$4 sm:$0xff] (!%p377_p3)   ;;  %v757_v6 = vsub.s32 (!%p377_p3), 2, %v5424_v40 }
  0x10   : > { %2119 = vmatpush1.bf16.msra.mxu0 %v4610_v7  ;;  %2079 = vmatprep.subr.bf16.mxu1 %v4611_v8  ;;  %v4619_v13 = vld [vmem:[%s6678_s4 + $0x264] ss:$16 sps:$4 sm:$0xff]   ;;  %v4622_v15 = vld [vmem:[%s6678_s4 + $0x260] ss:$16 sps:$4 sm:$0xff]   ;;  %s6696_s14 = smov (!%p444_p5, %s5199_s14), 1  ;;  %s6698_s30 = smov (!%p451_p6, %s4044_s30), 7 }
  0x11   : > { %2120 = vmatprep.subr.bf16.mxu0 %v4613_v9  ;;  %v4623_v16 = vld [vmem:[%s6678_s4 + $0x84] ss:$16 sps:$4 sm:$0xff]   ;;  %v4627_v18 = vld [vmem:[%s6678_s4 + $0x80] ss:$16 sps:$4 sm:$0xff]   ;;  %s4043_s24 = sshll.u32 %s6696_s14, 3 }
  0x12   : > { %v4625_v17 = vld [vmem:[%s6678_s4 + $0x284] ss:$16 sps:$4 sm:$0xff]   ;;  %v4628_v19 = vld [vmem:[%s6678_s4 + $0x280] ss:$16 sps:$4 sm:$0xff]   ;;  %s447_s20 = scalar_lea.vmem %s6674_s0, %s4043_s24  ;;  %s5782_s11 = sadd.s32 %s4043_s24, %s6698_s30 }
  0x13   : > { %2080 = vmatpush1.bf16.msra.mxu1 %v4615_v10  ;;  %v4629_v20 = vld [vmem:[%s6678_s4 + $0xa4] ss:$16 sps:$4 sm:$0xff]   ;;  %v4633_v22 = vld [vmem:[%s6678_s4 + $0xa0] ss:$16 sps:$4 sm:$0xff]   ;;  %s5793_s23 = sshll.u32 %s5782_s11, 2 }
  0x14   : > { %2121 = vmatpush1.bf16.msra.mxu0 %v4616_v11  ;;  %2081 = vmatprep.subr.bf16.mxu1 %v4617_v12  ;;  %v4631_v21 = vld [vmem:[%s6678_s4 + $0x2a4] ss:$16 sps:$4 sm:$0xff]   ;;  %v4634_v23 = vld [vmem:[%s6678_s4 + $0x2a0] ss:$16 sps:$4 sm:$0xff]   ;;  %v769_v11 = vsub.s32 5, %v5424_v40  ;;  %s5808_s29 = scalar_lea.vmem %s6676_s2, %s5793_s23  ;;  %s5889_s14 = scalar_lea.vmem %s6675_s1, %s5793_s23 }
  0x15   : > { %2122 = vmatprep.subr.bf16.mxu0 %v4619_v13  ;;  %v4635_v24 = vld [vmem:[%s6678_s4 + $0xc4] ss:$16 sps:$4 sm:$0xff]   ;;  %v4639_v26 = vld [vmem:[%s6678_s4 + $0xc0] ss:$16 sps:$4 sm:$0xff]   ;;  %s5928_s25 = scalar_lea.vmem %s6677_s3, %s5793_s23 }
  0x16   : > { %v4637_v25 = vld [vmem:[%s6678_s4 + $0x2c4] ss:$16 sps:$4 sm:$0xff]   ;;  %v4640_v27 = vld [vmem:[%s6678_s4 + $0x2c0] ss:$16 sps:$4 sm:$0xff]  }
  0x17   : > { %2082 = vmatpush1.bf16.msra.mxu1 %v4621_v14  ;;  %v4641_v28 = vld [vmem:[%s6678_s4 + $0xe4] ss:$16 sps:$4 sm:$0xff]   ;;  %v4645_v30 = vld [vmem:[%s6678_s4 + $0xe0] ss:$16 sps:$4 sm:$0xff]  }
  0x18   : > { %2123 = vmatpush1.bf16.msra.mxu0 %v4622_v15  ;;  %2083 = vmatprep.subr.bf16.mxu1 %v4623_v16  ;;  %v4643_v29 = vld [vmem:[%s6678_s4 + $0x2e4] ss:$16 sps:$4 sm:$0xff]   ;;  %v4646_v31 = vld [vmem:[%s6678_s4 + $0x2e0] ss:$16 sps:$4 sm:$0xff]   ;;  %v777_v16 = vsub.s32 7, %v5424_v40 }
  0x19   : > { %2124 = vmatprep.subr.bf16.mxu0 %v4625_v17  ;;  %v4647_v32 = vld [vmem:[%s6678_s4 + $0x104] ss:$16 sps:$4 sm:$0xff]   ;;  %v4651_v34 = vld [vmem:[%s6678_s4 + $0x100] ss:$16 sps:$4 sm:$0xff]  }
  0x1a   : > { %v4649_v33 = vld [vmem:[%s6678_s4 + $0x304] ss:$16 sps:$4 sm:$0xff]   ;;  %v4652_v35 = vld [vmem:[%s6678_s4 + $0x300] ss:$16 sps:$4 sm:$0xff]  }
  0x1b   : > { %2084 = vmatpush1.bf16.msra.mxu1 %v4627_v18  ;;  %v4653_v37 = vld [vmem:[%s6678_s4 + $0x124] ss:$16 sps:$4 sm:$0xff]   ;;  %v4657_v39 = vld [vmem:[%s6678_s4 + $0x120] ss:$16 sps:$4 sm:$0xff]   ;;  %v4700_v18 = vld [vmem:[%s6678_s4 + $0xc] ss:$16 sps:$4 sm:$0xff]  }
  0x1c   : > { %2125 = vmatpush1.bf16.msra.mxu0 %v4628_v19  ;;  %2085 = vmatprep.subr.bf16.mxu1 %v4629_v20  ;;  %v4655_v38 = vld [vmem:[%s6678_s4 + $0x324] ss:$16 sps:$4 sm:$0xff]   ;;  %v4658_v41 = vld [vmem:[%s6678_s4 + $0x320] ss:$16 sps:$4 sm:$0xff]   ;;  %v773_v19 = vsub.s32 6, %v5424_v40 }
  0x1d   : > { %2126 = vmatprep.subr.bf16.mxu0 %v4631_v21  ;;  %v4659_v42 = vld [vmem:[%s6678_s4 + $0x144] ss:$16 sps:$4 sm:$0xff]   ;;  %v4663_v44 = vld [vmem:[%s6678_s4 + $0x140] ss:$16 sps:$4 sm:$0xff]  }
  0x1e   : > { %v4661_v43 = vld [vmem:[%s6678_s4 + $0x344] ss:$16 sps:$4 sm:$0xff]   ;;  %v4664_v45 = vld [vmem:[%s6678_s4 + $0x340] ss:$16 sps:$4 sm:$0xff]  }
  0x1f   : > { %2086 = vmatpush1.bf16.msra.mxu1 %v4633_v22  ;;  %v4665_v48 = vld [vmem:[%s6678_s4 + $0x164] ss:$16 sps:$4 sm:$0xff]   ;;  %v4669_v54 = vld [vmem:[%s6678_s4 + $0x160] ss:$16 sps:$4 sm:$0xff]  }
  0x20   : > { %2127 = vmatpush1.bf16.msra.mxu0 %v4634_v23  ;;  %2087 = vmatprep.subr.bf16.mxu1 %v4635_v24  ;;  %v4667_v49 = vld [vmem:[%s6678_s4 + $0x364] ss:$16 sps:$4 sm:$0xff]   ;;  %v4670_v55 = vld [vmem:[%s6678_s4 + $0x360] ss:$16 sps:$4 sm:$0xff]  }
  0x21   : > { %2128 = vmatprep.subr.bf16.mxu0 %v4637_v25  ;;  %v489_v50 = vld [vmem:[%s447_s20] sm:$0xff] }
  0x22   : > { %v754_v52 = vrot.slane %v489_v50, %v5448_v46  ;;  %v762_v53 = vrot.slane %v489_v50, %v761_v47  ;;  %v4671_v56 = vld [vmem:[%s6678_s4 + $0x184] ss:$16 sps:$4 sm:$0xff]   ;;  %v5477_v60 = vrot.slane %v489_v50, %v765_v51  ;;  %v4675_v61 = vld [vmem:[%s6678_s4 + $0x180] ss:$16 sps:$4 sm:$0xff]   ;;  %v750_v12 = vrot.slane %v489_v50, %v5506_v5 }
  0x23   : > { %2088 = vmatpush1.bf16.msra.mxu1 %v4639_v26  ;;  %v4673_v57 = vld [vmem:[%s6678_s4 + $0x384] ss:$16 sps:$4 sm:$0xff]   ;;  %v4676_v62 = vld [vmem:[%s6678_s4 + $0x380] ss:$16 sps:$4 sm:$0xff]   ;;  %v758_v13 = vrot.slane %v489_v50, %v757_v6  ;;  %v770_v20 = vrot.slane %v489_v50, %v769_v11  ;;  %v5539_v21 = vrot.slane %v489_v50, %v777_v16  ;;  %v5545_v24 = vrot.slane %v489_v50, %v773_v19  ;;  %v4698_v26 = vld [vmem:[%s6678_s4 + $0x8] ss:$16 sps:$4 sm:$0xff]  }
  0x24   : > { %2129 = vmatpush1.bf16.msra.mxu0 %v4640_v27  ;;  %2089 = vmatprep.subr.bf16.mxu1 %v4641_v28  ;;  %v5473_v58 = vpack.c.bf16 %v754_v52, %v754_v52  ;;  %v5475_v59 = vpack.c.bf16 %v762_v53, %v762_v53  ;;  %v4677_v63 = vld [vmem:[%s6678_s4 + $0x1a4] ss:$16 sps:$4 sm:$0xff]   ;;  %v4681_v1 = vld [vmem:[%s6678_s4 + $0x1a0] ss:$16 sps:$4 sm:$0xff]   ;;  %v5541_v22 = vpack.c.bf16 %v750_v12, %v750_v12  ;;  %v4706_v28 = vld [vmem:[%s6678_s4 + $0x2c] ss:$16 sps:$4 sm:$0xff]  }
  0x25   : > { %2130 = vmatprep.subr.bf16.mxu0 %v4643_v29  ;;  %v4679_v0 = vld [vmem:[%s6678_s4 + $0x3a4] ss:$16 sps:$4 sm:$0xff]   ;;  %v4682_v2 = vld [vmem:[%s6678_s4 + $0x3a0] ss:$16 sps:$4 sm:$0xff]   ;;  %v5543_v23 = vpack.c.bf16 %v758_v13, %v758_v13  ;;  %v5559_v29 = vpack.c.bf16 %v770_v20, %v770_v20  ;;  %v4728_v50 = vld [vmem:[%s6678_s4 + $0xa8] ss:$16 sps:$4 sm:$0xff]  }
  0x26   : > { %2107 = vmatprep.mubr.bf16.mxu1 %v5473_v58  ;;  %2148 = vmatprep.mubr.bf16.mxu0 %v5475_v59  ;;  %v4683_v3 = vld [vmem:[%s6678_s4 + $0x1c4] ss:$16 sps:$4 sm:$0xff]   ;;  %v4687_v7 = vld [vmem:[%s6678_s4 + $0x1c0] ss:$16 sps:$4 sm:$0xff]   ;;  %v4736_v52 = vld [vmem:[%s6678_s4 + $0xcc] ss:$16 sps:$4 sm:$0xff]  }
  0x27   : > { %2090 = vmatpush1.bf16.msra.mxu1 %v4645_v30  ;;  %v4685_v4 = vld [vmem:[%s6678_s4 + $0x3c4] ss:$16 sps:$4 sm:$0xff]   ;;  %v4688_v8 = vld [vmem:[%s6678_s4 + $0x3c0] ss:$16 sps:$4 sm:$0xff]   ;;  %v4766_v12 = vld [vmem:[%s6678_s4 + $0x16c] ss:$16 sps:$4 sm:$0xff]  }
  0x28   : > { %2131 = vmatpush1.bf16.msra.mxu0 %v4646_v31  ;;  %2091 = vmatprep.subr.bf16.mxu1 %v4647_v32  ;;  %v4689_v9 = vld [vmem:[%s6678_s4 + $0x1e4] ss:$16 sps:$4 sm:$0xff]   ;;  %v4693_v14 = vld [vmem:[%s6678_s4 + $0x1e0] ss:$16 sps:$4 sm:$0xff]   ;;  %v4704_v31 = vld [vmem:[%s6678_s4 + $0x28] ss:$16 sps:$4 sm:$0xff]  }
  0x29   : > { %2132 = vmatprep.subr.bf16.mxu0 %v4649_v33  ;;  %v4691_v10 = vld [vmem:[%s6678_s4 + $0x3e4] ss:$16 sps:$4 sm:$0xff]   ;;  %v4694_v15 = vld [vmem:[%s6678_s4 + $0x3e0] ss:$16 sps:$4 sm:$0xff]   ;;  %v4712_v33 = vld [vmem:[%s6678_s4 + $0x4c] ss:$16 sps:$4 sm:$0xff]  }
  0x2a   : > { %v4697_v17 = vld [vmem:[%s6678_s4 + $0x404] ss:$16 sps:$4 sm:$0xff]   ;;  %v4695_v25 = vld [vmem:[%s6678_s4 + $0x400] ss:$16 sps:$4 sm:$0xff]   ;;  %v4772_v16 = vld [vmem:[%s6678_s4 + $0x18c] ss:$16 sps:$4 sm:$0xff]  }
  0x2b   : > { %2092 = vmatpush1.bf16.msra.mxu1 %v4651_v34  ;;  %v4703_v27 = vld [vmem:[%s6678_s4 + $0x424] ss:$16 sps:$4 sm:$0xff]   ;;  %v4701_v30 = vld [vmem:[%s6678_s4 + $0x420] ss:$16 sps:$4 sm:$0xff]   ;;  %v4778_v20 = vld [vmem:[%s6678_s4 + $0x1ac] ss:$16 sps:$4 sm:$0xff]  }
  0x2c   : > { %2133 = vmatpush1.bf16.msra.mxu0 %v4652_v35  ;;  %2093 = vmatprep.subr.bf16.mxu1 %v4653_v37  ;;  %v4709_v32 = vld [vmem:[%s6678_s4 + $0x444] ss:$16 sps:$4 sm:$0xff]   ;;  %v4707_v34 = vld [vmem:[%s6678_s4 + $0x440] ss:$16 sps:$4 sm:$0xff]   ;;  %v4710_v35 = vld [vmem:[%s6678_s4 + $0x48] ss:$16 sps:$4 sm:$0xff]  }
  0x2d   : > { %2134 = vmatprep.subr.bf16.mxu0 %v4655_v38  ;;  %v4715_v36 = vld [vmem:[%s6678_s4 + $0x464] ss:$16 sps:$4 sm:$0xff]   ;;  %v4718_v37 = vld [vmem:[%s6678_s4 + $0x6c] ss:$16 sps:$4 sm:$0xff]   ;;  %v4713_v38 = vld [vmem:[%s6678_s4 + $0x460] ss:$16 sps:$4 sm:$0xff]  }
  0x2e   : > { %v4733_v51 = vld [vmem:[%s6678_s4 + $0x4c4] ss:$16 sps:$4 sm:$0xff]   ;;  %v4731_v53 = vld [vmem:[%s6678_s4 + $0x4c0] ss:$16 sps:$4 sm:$0xff]  }
  0x2f   : > { %2094 = vmatpush1.bf16.msra.mxu1 %v4657_v39  ;;  %v4716_v39 = vld [vmem:[%s6678_s4 + $0x68] ss:$16 sps:$4 sm:$0xff]   ;;  %v4763_v11 = vld [vmem:[%s6678_s4 + $0x564] ss:$16 sps:$4 sm:$0xff]   ;;  %v4761_v13 = vld [vmem:[%s6678_s4 + $0x560] ss:$16 sps:$4 sm:$0xff]  }
  0x30   : > { %2135 = vmatpush1.bf16.msra.mxu0 %v4658_v41  ;;  %2095 = vmatprep.subr.bf16.mxu1 %v4659_v42  ;;  %v4721_v41 = vld [vmem:[%s6678_s4 + $0x484] ss:$16 sps:$4 sm:$0xff]   ;;  %v4724_v42 = vld [vmem:[%s6678_s4 + $0x8c] ss:$16 sps:$4 sm:$0xff]  }
  0x31   : > { %2136 = vmatprep.subr.bf16.mxu0 %v4661_v43  ;;  %v4719_v43 = vld [vmem:[%s6678_s4 + $0x480] ss:$16 sps:$4 sm:$0xff]   ;;  %v4775_v19 = vld [vmem:[%s6678_s4 + $0x5a4] ss:$16 sps:$4 sm:$0xff]  }
  0x33   : > { %2096 = vmatpush1.bf16.msra.mxu1 %v4663_v44  ;;  %v4722_v44 = vld [vmem:[%s6678_s4 + $0x88] ss:$16 sps:$4 sm:$0xff]  }
  0x34   : > { %2137 = vmatpush1.bf16.msra.mxu0 %v4664_v45  ;;  %2097 = vmatprep.subr.bf16.mxu1 %v4665_v48  ;;  %v4727_v45 = vld [vmem:[%s6678_s4 + $0x4a4] ss:$16 sps:$4 sm:$0xff]   ;;  %v4730_v48 = vld [vmem:[%s6678_s4 + $0xac] ss:$16 sps:$4 sm:$0xff]  }
  0x35   : > { %2138 = vmatprep.subr.bf16.mxu0 %v4667_v49  ;;  %v4725_v49 = vld [vmem:[%s6678_s4 + $0x4a0] ss:$16 sps:$4 sm:$0xff]  }
  0x37   : > { %2098 = vmatpush1.bf16.msra.mxu1 %v4669_v54  ;;  %v4734_v54 = vld [vmem:[%s6678_s4 + $0xc8] ss:$16 sps:$4 sm:$0xff]  }
  0x38   : > { %2139 = vmatpush1.bf16.msra.mxu0 %v4670_v55  ;;  %2099 = vmatprep.subr.bf16.mxu1 %v4671_v56  ;;  %v4739_v55 = vld [vmem:[%s6678_s4 + $0x4e4] ss:$16 sps:$4 sm:$0xff]   ;;  %v4742_v56 = vld [vmem:[%s6678_s4 + $0xec] ss:$16 sps:$4 sm:$0xff]  }
  0x39   : > { %2140 = vmatprep.subr.bf16.mxu0 %v4673_v57  ;;  %v4737_v57 = vld [vmem:[%s6678_s4 + $0x4e0] ss:$16 sps:$4 sm:$0xff]  }
  0x3b   : > { %2100 = vmatpush1.bf16.msra.mxu1 %v4675_v61  ;;  %v4745_v61 = vld [vmem:[%s6678_s4 + $0x504] ss:$16 sps:$4 sm:$0xff]  }
  0x3c   : > { %2141 = vmatpush1.bf16.msra.mxu0 %v4676_v62  ;;  %2101 = vmatprep.subr.bf16.mxu1 %v4677_v63  ;;  %v4748_v62 = vld [vmem:[%s6678_s4 + $0x10c] ss:$16 sps:$4 sm:$0xff]   ;;  %v4743_v63 = vld [vmem:[%s6678_s4 + $0x500] ss:$16 sps:$4 sm:$0xff]  }
  0x3d   : > { %2142 = vmatprep.subr.bf16.mxu0 %v4679_v0  ;;  %v4746_v0 = vld [vmem:[%s6678_s4 + $0x108] ss:$16 sps:$4 sm:$0xff]  }
  0x3f   : > { %2102 = vmatpush1.bf16.msra.mxu1 %v4681_v1  ;;  %v4751_v1 = vld [vmem:[%s6678_s4 + $0x524] ss:$16 sps:$4 sm:$0xff]  }
  0x40   : > { %2143 = vmatpush1.bf16.msra.mxu0 %v4682_v2  ;;  %2103 = vmatprep.subr.bf16.mxu1 %v4683_v3  ;;  %v4754_v2 = vld [vmem:[%s6678_s4 + $0x12c] ss:$16 sps:$4 sm:$0xff]   ;;  %v4749_v3 = vld [vmem:[%s6678_s4 + $0x520] ss:$16 sps:$4 sm:$0xff]  }
  0x41   : > { %2144 = vmatprep.subr.bf16.mxu0 %v4685_v4  ;;  %v4752_v4 = vld [vmem:[%s6678_s4 + $0x128] ss:$16 sps:$4 sm:$0xff]  }
  0x43   : > { %2104 = vmatpush1.bf16.msra.mxu1 %v4687_v7  ;;  %v4757_v7 = vld [vmem:[%s6678_s4 + $0x544] ss:$16 sps:$4 sm:$0xff]  }
  0x44   : > { %2145 = vmatpush1.bf16.msra.mxu0 %v4688_v8  ;;  %2105 = vmatprep.subr.bf16.mxu1 %v4689_v9  ;;  %v4760_v8 = vld [vmem:[%s6678_s4 + $0x14c] ss:$16 sps:$4 sm:$0xff]   ;;  %v4755_v9 = vld [vmem:[%s6678_s4 + $0x540] ss:$16 sps:$4 sm:$0xff]  }
  0x45   : > { %2146 = vmatprep.subr.bf16.mxu0 %v4691_v10  ;;  %v4758_v10 = vld [vmem:[%s6678_s4 + $0x148] ss:$16 sps:$4 sm:$0xff]  }
  0x47   : > { %2106 = vmatpush1.bf16.msra.mxu1 %v4693_v14  ;;  %v4764_v14 = vld [vmem:[%s6678_s4 + $0x168] ss:$16 sps:$4 sm:$0xff]  }
  0x48   : > { %2147 = vmatpush1.bf16.msra.mxu0 %v4694_v15  ;;  %2239 = vmatprep.subr.bf16.mxu1 %v4700_v18  ;;  %v4769_v15 = vld [vmem:[%s6678_s4 + $0x584] ss:$16 sps:$4 sm:$0xff]   ;;  %v4770_v18 = vld [vmem:[%s6678_s4 + $0x188] ss:$16 sps:$4 sm:$0xff]  }
  0x49   : > { %2157 = vmatprep.subr.bf16.mxu0 %v4697_v17  ;;  %v4767_v17 = vld [vmem:[%s6678_s4 + $0x580] ss:$16 sps:$4 sm:$0xff]  }
  0x4a   : > { %2108 = vmatmul.mubr.bf16.vlgmr.msra.gmra.mrb[0].mxu1 %v5541_v22 }
  0x4b   : > { %2149 = vmatmul.mubr.bf16.vlgmr.msra.gmra.mrb[0].mxu0 %v5543_v23  ;;  %2240 = vmatpush1.bf16.msra.mxu1 %v4698_v26  ;;  %v4776_v26 = vld [vmem:[%s6678_s4 + $0x1a8] ss:$16 sps:$4 sm:$0xff]  }
  0x4c   : > { %2158 = vmatpush1.bf16.msra.mxu0 %v4695_v25  ;;  %2241 = vmatprep.subr.bf16.mxu1 %v4706_v28  ;;  %v4773_v25 = vld [vmem:[%s6678_s4 + $0x5a0] ss:$16 sps:$4 sm:$0xff]   ;;  %v4784_v28 = vld [vmem:[%s6678_s4 + $0x1cc] ss:$16 sps:$4 sm:$0xff]  }
  0x4d   : > { %2159 = vmatprep.subr.bf16.mxu0 %v4703_v27  ;;  %2189 = vmatprep.mubr.bf16.mxu0 %v5559_v29  ;;  %v4781_v27 = vld [vmem:[%s6678_s4 + $0x5c4] ss:$16 sps:$4 sm:$0xff]  }
  0x4e   : > { %2271 = vmatprep.mubr.bf16.mxu1 %v5473_v58  ;;  %v4740_v58 = vld [vmem:[%s6678_s4 + $0xe8] ss:$16 sps:$4 sm:$0xff]  }
  0x4f   : > { %2242 = vmatpush1.bf16.msra.mxu1 %v4704_v31  ;;  %v4782_v31 = vld [vmem:[%s6678_s4 + $0x1c8] ss:$16 sps:$4 sm:$0xff]  }
  0x50   : > { %2160 = vmatpush1.bf16.msra.mxu0 %v4701_v30  ;;  %2243 = vmatprep.subr.bf16.mxu1 %v4712_v33  ;;  %v4779_v30 = vld [vmem:[%s6678_s4 + $0x5c0] ss:$16 sps:$4 sm:$0xff]   ;;  %v4790_v33 = vld [vmem:[%s6678_s4 + $0x1ec] ss:$16 sps:$4 sm:$0xff]  }
  0x51   : > { %2161 = vmatprep.subr.bf16.mxu0 %v4709_v32  ;;  %v4787_v32 = vld [vmem:[%s6678_s4 + $0x5e4] ss:$16 sps:$4 sm:$0xff]  }
  0x53   : > { %2244 = vmatpush1.bf16.msra.mxu1 %v4710_v35  ;;  %v4788_v35 = vld [vmem:[%s6678_s4 + $0x1e8] ss:$16 sps:$4 sm:$0xff]  }
  0x54   : > { %2162 = vmatpush1.bf16.msra.mxu0 %v4707_v34  ;;  %2245 = vmatprep.subr.bf16.mxu1 %v4718_v37  ;;  %v4785_v34 = vld [vmem:[%s6678_s4 + $0x5e0] ss:$16 sps:$4 sm:$0xff]   ;;  %v4796_v37 = vld [vmem:[%s6678_s4 + $0x20c] ss:$16 sps:$4 sm:$0xff]  }
  0x55   : > { %2163 = vmatprep.subr.bf16.mxu0 %v4715_v36  ;;  %v4793_v36 = vld [vmem:[%s6678_s4 + $0x604] ss:$16 sps:$4 sm:$0xff]  }
  0x57   : > { %2246 = vmatpush1.bf16.msra.mxu1 %v4716_v39  ;;  %v4791_v39 = vld [vmem:[%s6678_s4 + $0x600] ss:$16 sps:$4 sm:$0xff]  }
  0x58   : > { %2164 = vmatpush1.bf16.msra.mxu0 %v4713_v38  ;;  %2247 = vmatprep.subr.bf16.mxu1 %v4724_v42  ;;  %v5748_v38 = vpack.c.bf16 %v5477_v60, %v5477_v60  ;;  %v4799_v42 = vld [vmem:[%s6678_s4 + $0x624] ss:$16 sps:$4 sm:$0xff]   ;;  %v4802_v60 = vld [vmem:[%s6678_s4 + $0x22c] ss:$16 sps:$4 sm:$0xff]  }
  0x59   : > { %2165 = vmatprep.subr.bf16.mxu0 %v4721_v41  ;;  %v4794_v41 = vld [vmem:[%s6678_s4 + $0x208] ss:$16 sps:$4 sm:$0xff]  }
  0x5b   : > { %2248 = vmatpush1.bf16.msra.mxu1 %v4722_v44  ;;  %v4797_v44 = vld [vmem:[%s6678_s4 + $0x620] ss:$16 sps:$4 sm:$0xff]  }
  0x5c   : > { %2166 = vmatpush1.bf16.msra.mxu0 %v4719_v43  ;;  %2249 = vmatprep.subr.bf16.mxu1 %v4730_v48  ;;  %v5764_v43 = vpack.c.bf16 %v5539_v21, %v5539_v21  ;;  %v4805_v21 = vld [vmem:[%s6678_s4 + $0x644] ss:$16 sps:$4 sm:$0xff]   ;;  %v4803_v48 = vld [vmem:[%s6678_s4 + $0x640] ss:$16 sps:$4 sm:$0xff]  }
  0x5d   : > { %2167 = vmatprep.subr.bf16.mxu0 %v4727_v45  ;;  %v4800_v45 = vld [vmem:[%s6678_s4 + $0x228] ss:$16 sps:$4 sm:$0xff]  }
  0x5f   : > { %2250 = vmatpush1.bf16.msra.mxu1 %v4728_v50  ;;  %v4811_v50 = vld [vmem:[%s6678_s4 + $0x664] ss:$16 sps:$4 sm:$0xff]  }
  0x60   : > { %2168 = vmatpush1.bf16.msra.mxu0 %v4725_v49  ;;  %2251 = vmatprep.subr.bf16.mxu1 %v4736_v52  ;;  %v4806_v49 = vld [vmem:[%s6678_s4 + $0x248] ss:$16 sps:$4 sm:$0xff]  }
  0x61   : > { %2169 = vmatprep.subr.bf16.mxu0 %v4733_v51  ;;  %v4809_v51 = vld [vmem:[%s6678_s4 + $0x660] ss:$16 sps:$4 sm:$0xff]   ;;  %v4812_v52 = vld [vmem:[%s6678_s4 + $0x268] ss:$16 sps:$4 sm:$0xff]  }
  0x63   : > { %2252 = vmatpush1.bf16.msra.mxu1 %v4734_v54  ;;  %v4820_v54 = vld [vmem:[%s6678_s4 + $0x28c] ss:$16 sps:$4 sm:$0xff]  }
  0x64   : > { %2170 = vmatpush1.bf16.msra.mxu0 %v4731_v53  ;;  %2253 = vmatprep.subr.bf16.mxu1 %v4742_v56  ;;  %v4817_v53 = vld [vmem:[%s6678_s4 + $0x684] ss:$16 sps:$4 sm:$0xff]   ;;  %v4818_v56 = vld [vmem:[%s6678_s4 + $0x288] ss:$16 sps:$4 sm:$0xff]  }
  0x65   : > { %2171 = vmatprep.subr.bf16.mxu0 %v4739_v55  ;;  %v4815_v55 = vld [vmem:[%s6678_s4 + $0x680] ss:$16 sps:$4 sm:$0xff]  }
  0x67   : > { %2254 = vmatpush1.bf16.msra.mxu1 %v4740_v58  ;;  %v4826_v58 = vld [vmem:[%s6678_s4 + $0x2ac] ss:$16 sps:$4 sm:$0xff]  }
  0x68   : > { %2172 = vmatpush1.bf16.msra.mxu0 %v4737_v57  ;;  %2255 = vmatprep.subr.bf16.mxu1 %v4748_v62  ;;  %v4823_v57 = vld [vmem:[%s6678_s4 + $0x6a4] ss:$16 sps:$4 sm:$0xff]   ;;  %v4824_v62 = vld [vmem:[%s6678_s4 + $0x2a8] ss:$16 sps:$4 sm:$0xff]  }
  0x69   : > { %2173 = vmatprep.subr.bf16.mxu0 %v4745_v61  ;;  %v4821_v61 = vld [vmem:[%s6678_s4 + $0x6a0] ss:$16 sps:$4 sm:$0xff]  }
  0x6b   : > { %2256 = vmatpush1.bf16.msra.mxu1 %v4746_v0  ;;  %v4832_v0 = vld [vmem:[%s6678_s4 + $0x2cc] ss:$16 sps:$4 sm:$0xff]  }
  0x6c   : > { %2174 = vmatpush1.bf16.msra.mxu0 %v4743_v63  ;;  %2257 = vmatprep.subr.bf16.mxu1 %v4754_v2  ;;  %v4829_v63 = vld [vmem:[%s6678_s4 + $0x6c4] ss:$16 sps:$4 sm:$0xff]   ;;  %v4830_v2 = vld [vmem:[%s6678_s4 + $0x2c8] ss:$16 sps:$4 sm:$0xff]  }
  0x6d   : > { %2175 = vmatprep.subr.bf16.mxu0 %v4751_v1  ;;  %v4827_v1 = vld [vmem:[%s6678_s4 + $0x6c0] ss:$16 sps:$4 sm:$0xff]  }
  0x6f   : > { %2258 = vmatpush1.bf16.msra.mxu1 %v4752_v4  ;;  %v4838_v4 = vld [vmem:[%s6678_s4 + $0x2ec] ss:$16 sps:$4 sm:$0xff]  }
  0x70   : > { %2176 = vmatpush1.bf16.msra.mxu0 %v4749_v3  ;;  %2259 = vmatprep.subr.bf16.mxu1 %v4760_v8  ;;  %v4835_v3 = vld [vmem:[%s6678_s4 + $0x6e4] ss:$16 sps:$4 sm:$0xff]   ;;  %v4836_v8 = vld [vmem:[%s6678_s4 + $0x2e8] ss:$16 sps:$4 sm:$0xff]  }
  0x71   : > { %2177 = vmatprep.subr.bf16.mxu0 %v4757_v7  ;;  %v4833_v7 = vld [vmem:[%s6678_s4 + $0x6e0] ss:$16 sps:$4 sm:$0xff]  }
  0x73   : > { %2260 = vmatpush1.bf16.msra.mxu1 %v4758_v10  ;;  %v4844_v10 = vld [vmem:[%s6678_s4 + $0x30c] ss:$16 sps:$4 sm:$0xff]  }
  0x74   : > { %2178 = vmatpush1.bf16.msra.mxu0 %v4755_v9  ;;  %2261 = vmatprep.subr.bf16.mxu1 %v4766_v12  ;;  %v4841_v9 = vld [vmem:[%s6678_s4 + $0x704] ss:$16 sps:$4 sm:$0xff]   ;;  %v4842_v12 = vld [vmem:[%s6678_s4 + $0x308] ss:$16 sps:$4 sm:$0xff]  }
  0x75   : > { %2179 = vmatprep.subr.bf16.mxu0 %v4763_v11  ;;  %v4839_v11 = vld [vmem:[%s6678_s4 + $0x700] ss:$16 sps:$4 sm:$0xff]  }
  0x77   : > { %2262 = vmatpush1.bf16.msra.mxu1 %v4764_v14  ;;  %v4850_v14 = vld [vmem:[%s6678_s4 + $0x32c] ss:$16 sps:$4 sm:$0xff]  }
  0x78   : > { %2180 = vmatpush1.bf16.msra.mxu0 %v4761_v13  ;;  %2263 = vmatprep.subr.bf16.mxu1 %v4772_v16  ;;  %v4847_v13 = vld [vmem:[%s6678_s4 + $0x724] ss:$16 sps:$4 sm:$0xff]   ;;  %v4848_v16 = vld [vmem:[%s6678_s4 + $0x328] ss:$16 sps:$4 sm:$0xff]  }
  0x79   : > { %2181 = vmatprep.subr.bf16.mxu0 %v4769_v15  ;;  %v4845_v15 = vld [vmem:[%s6678_s4 + $0x720] ss:$16 sps:$4 sm:$0xff]  }
  0x7b   : > { %2264 = vmatpush1.bf16.msra.mxu1 %v4770_v18  ;;  %v4856_v18 = vld [vmem:[%s6678_s4 + $0x34c] ss:$16 sps:$4 sm:$0xff]  }
  0x7c   : > { %2182 = vmatpush1.bf16.msra.mxu0 %v4767_v17  ;;  %2265 = vmatprep.subr.bf16.mxu1 %v4778_v20  ;;  %v4853_v17 = vld [vmem:[%s6678_s4 + $0x744] ss:$16 sps:$4 sm:$0xff]   ;;  %v4854_v20 = vld [vmem:[%s6678_s4 + $0x348] ss:$16 sps:$4 sm:$0xff]  }
  0x7d   : > { %2183 = vmatprep.subr.bf16.mxu0 %v4775_v19  ;;  %v4851_v19 = vld [vmem:[%s6678_s4 + $0x740] ss:$16 sps:$4 sm:$0xff]  }
  0x7f   : > { %2266 = vmatpush1.bf16.msra.mxu1 %v4776_v26  ;;  %v4862_v26 = vld [vmem:[%s6678_s4 + $0x36c] ss:$16 sps:$4 sm:$0xff]  }
  0x80   : > { %2184 = vmatpush1.bf16.msra.mxu0 %v4773_v25  ;;  %2267 = vmatprep.subr.bf16.mxu1 %v4784_v28  ;;  %v4859_v25 = vld [vmem:[%s6678_s4 + $0x764] ss:$16 sps:$4 sm:$0xff]   ;;  %v4860_v28 = vld [vmem:[%s6678_s4 + $0x368] ss:$16 sps:$4 sm:$0xff]  }
  0x81   : > { %2185 = vmatprep.subr.bf16.mxu0 %v4781_v27  ;;  %v4857_v27 = vld [vmem:[%s6678_s4 + $0x760] ss:$16 sps:$4 sm:$0xff]  }
  0x83   : > { %2268 = vmatpush1.bf16.msra.mxu1 %v4782_v31  ;;  %v4868_v31 = vld [vmem:[%s6678_s4 + $0x38c] ss:$16 sps:$4 sm:$0xff]  }
  0x84   : > { %2186 = vmatpush1.bf16.msra.mxu0 %v4779_v30  ;;  %2269 = vmatprep.subr.bf16.mxu1 %v4790_v33  ;;  %v4865_v30 = vld [vmem:[%s6678_s4 + $0x784] ss:$16 sps:$4 sm:$0xff]   ;;  %v4866_v33 = vld [vmem:[%s6678_s4 + $0x388] ss:$16 sps:$4 sm:$0xff]  }
  0x85   : > { %2187 = vmatprep.subr.bf16.mxu0 %v4787_v32  ;;  %v4863_v32 = vld [vmem:[%s6678_s4 + $0x780] ss:$16 sps:$4 sm:$0xff]  }
  0x87   : > { %2270 = vmatpush1.bf16.msra.mxu1 %v4788_v35  ;;  %v4874_v35 = vld [vmem:[%s6678_s4 + $0x3ac] ss:$16 sps:$4 sm:$0xff]  }
  0x88   : > { %2188 = vmatpush1.bf16.msra.mxu0 %v4785_v34  ;;  %2280 = vmatprep.subr.bf16.mxu1 %v4796_v37  ;;  %v4871_v34 = vld [vmem:[%s6678_s4 + $0x7a4] ss:$16 sps:$4 sm:$0xff]   ;;  %v4872_v37 = vld [vmem:[%s6678_s4 + $0x3a8] ss:$16 sps:$4 sm:$0xff]  }
  0x89   : > { %2198 = vmatprep.subr.bf16.mxu0 %v4793_v36  ;;  %v4869_v36 = vld [vmem:[%s6678_s4 + $0x7a0] ss:$16 sps:$4 sm:$0xff]  }
  0x8a   : > { %2272 = vmatmul.mubr.bf16.vlgmr.msra.gmra.mrb[4].mxu1 %v5541_v22  ;;  %v4808_v22 = vld [vmem:[%s6678_s4 + $0x24c] ss:$16 sps:$4 sm:$0xff]  }
  0x8b   : > { %2190 = vmatmul.mubr.bf16.vlgmr.msra.gmra.mrb[0].mxu0 %v5748_v38  ;;  %2281 = vmatpush1.bf16.msra.mxu1 %v4794_v41  ;;  %v4880_v41 = vld [vmem:[%s6678_s4 + $0x3cc] ss:$16 sps:$4 sm:$0xff]  }
  0x8c   : > { %2199 = vmatpush1.bf16.msra.mxu0 %v4791_v39  ;;  %2282 = vmatprep.subr.bf16.mxu1 %v4802_v60  ;;  %v4877_v39 = vld [vmem:[%s6678_s4 + $0x7c4] ss:$16 sps:$4 sm:$0xff]   ;;  %v4878_v60 = vld [vmem:[%s6678_s4 + $0x3c8] ss:$16 sps:$4 sm:$0xff]  }
  0x8d   : > { %2200 = vmatprep.subr.bf16.mxu0 %v4799_v42  ;;  %2230 = vmatprep.mubr.bf16.mxu0 %v5764_v43  ;;  %v4875_v42 = vld [vmem:[%s6678_s4 + $0x7c0] ss:$16 sps:$4 sm:$0xff]  }
  0x8e   : > { %2312 = vmatprep.mubr.bf16.mxu1 %v5475_v59  ;;  %v4814_v59 = vld [vmem:[%s6678_s4 + $0x26c] ss:$16 sps:$4 sm:$0xff]  }
  0x8f   : > { %2283 = vmatpush1.bf16.msra.mxu1 %v4800_v45  ;;  %v4886_v45 = vld [vmem:[%s6678_s4 + $0x3ec] ss:$16 sps:$4 sm:$0xff]  }
  0x90   : > { %2201 = vmatpush1.bf16.msra.mxu0 %v4797_v44  ;;  %2284 = vmatprep.subr.bf16.mxu1 %v4808_v22  ;;  %v4883_v44 = vld [vmem:[%s6678_s4 + $0x7e4] ss:$16 sps:$4 sm:$0xff]   ;;  %v4884_v22 = vld [vmem:[%s6678_s4 + $0x3e8] ss:$16 sps:$4 sm:$0xff]  }
  0x91   : > { %2202 = vmatprep.subr.bf16.mxu0 %v4805_v21  ;;  %v4881_v21 = vld [vmem:[%s6678_s4 + $0x7e0] ss:$16 sps:$4 sm:$0xff]  }
  0x93   : > { %2285 = vmatpush1.bf16.msra.mxu1 %v4806_v49  ;;  %v4892_v49 = vld [vmem:[%s6679_s5 + $0x84] ss:$16 sps:$4 sm:$0xff]  }
  0x94   : > { %2203 = vmatpush1.bf16.msra.mxu0 %v4803_v48  ;;  %2286 = vmatprep.subr.bf16.mxu1 %v4814_v59  ;;  %v4889_v48 = vld [vmem:[%s6678_s4 + $0x40c] ss:$16 sps:$4 sm:$0xff]   ;;  %v4887_v59 = vld [vmem:[%s6678_s4 + $0x408] ss:$16 sps:$4 sm:$0xff]  }
  0x95   : > { %2204 = vmatprep.subr.bf16.mxu0 %v4811_v50  ;;  %v5977_v50 = vpack.c.bf16 %v5545_v24, %v5545_v24  ;;  %v4898_v24 = vld [vmem:[%s6679_s5 + $0xa4] ss:$16 sps:$4 sm:$0xff]  }
  0x97   : > { %2287 = vmatpush1.bf16.msra.mxu1 %v4812_v52  ;;  %v4895_v52 = vld [vmem:[%s6678_s4 + $0x42c] ss:$16 sps:$4 sm:$0xff]  }
  0x98   : > { %2205 = vmatpush1.bf16.msra.mxu0 %v4809_v51  ;;  %2288 = vmatprep.subr.bf16.mxu1 %v4820_v54  ;;  %v4890_v51 = vld [vmem:[%s6679_s5 + $0x80] ss:$16 sps:$4 sm:$0xff]  }
  0x99   : > { %2206 = vmatprep.subr.bf16.mxu0 %v4817_v53  ;;  %v4893_v53 = vld [vmem:[%s6678_s4 + $0x428] ss:$16 sps:$4 sm:$0xff]   ;;  %v4896_v54 = vld [vmem:[%s6679_s5 + $0xa0] ss:$16 sps:$4 sm:$0xff]  }
  0x9b   : > { %2289 = vmatpush1.bf16.msra.mxu1 %v4818_v56  ;;  %v5213_v56 = vmov 0  }
  0x9c   : > { %2207 = vmatpush1.bf16.msra.mxu0 %v4815_v55  ;;  %2290 = vmatprep.subr.bf16.mxu1 %v4826_v58  ;;  %v4901_v55 = vld [vmem:[%s6678_s4 + $0x44c] ss:$16 sps:$4 sm:$0xff]   ;;  %v4902_v58 = vld [vmem:[%s6679_s5 + $0xc0] ss:$16 sps:$4 sm:$0xff]  }
  0x9d   : > { %2208 = vmatprep.subr.bf16.mxu0 %v4823_v57  ;;  %v4899_v57 = vld [vmem:[%s6678_s4 + $0x448] ss:$16 sps:$4 sm:$0xff]  }
  0x9f   : > { %2291 = vmatpush1.bf16.msra.mxu1 %v4824_v62  ;;  %v4905_v62 = vld [vmem:[%s6678_s4 + $0x468] ss:$16 sps:$4 sm:$0xff]  }
  0xa0   : > { %2209 = vmatpush1.bf16.msra.mxu0 %v4821_v61  ;;  %2292 = vmatprep.subr.bf16.mxu1 %v4832_v0  ;;  %v4907_v61 = vld [vmem:[%s6678_s4 + $0x46c] ss:$16 sps:$4 sm:$0xff]  }
  0xa1   : > { %2210 = vmatprep.subr.bf16.mxu0 %v4829_v63  ;;  %v4908_v63 = vld [vmem:[%s6679_s5 + $0xe0] ss:$16 sps:$4 sm:$0xff]   ;;  %v4913_v0 = vld [vmem:[%s6678_s4 + $0x48c] ss:$16 sps:$4 sm:$0xff]  }
  0xa3   : > { %2293 = vmatpush1.bf16.msra.mxu1 %v4830_v2  ;;  %v4914_v2 = vld [vmem:[%s5808_s29] sm:$0xff]  }
  0xa4   : > { %2211 = vmatpush1.bf16.msra.mxu0 %v4827_v1  ;;  %2294 = vmatprep.subr.bf16.mxu1 %v4838_v4  ;;  %v4917_v1 = vld [vmem:[%s6679_s5 + $0x8c] ss:$16 sps:$4 sm:$0xff]   ;;  %v4915_v4 = vld [vmem:[%s6679_s5 + $0x88] ss:$16 sps:$4 sm:$0xff]  }
  0xa5   : > { %2212 = vmatprep.subr.bf16.mxu0 %v4835_v3  ;;  %v4911_v3 = vld [vmem:[%s6678_s4 + $0x488] ss:$16 sps:$4 sm:$0xff]  }
  0xa7   : > { %2295 = vmatpush1.bf16.msra.mxu1 %v4836_v8  ;;  %v4923_v8 = vld [vmem:[%s6679_s5 + $0xac] ss:$16 sps:$4 sm:$0xff]  }
  0xa8   : > { %2213 = vmatpush1.bf16.msra.mxu0 %v4833_v7  ;;  %2296 = vmatprep.subr.bf16.mxu1 %v4844_v10  ;;  %v4920_v7 = vld [vmem:[%s6678_s4 + $0x4ac] ss:$16 sps:$4 sm:$0xff]   ;;  %v4921_v10 = vld [vmem:[%s6679_s5 + $0xa8] ss:$16 sps:$4 sm:$0xff]  }
  0xa9   : > { %2214 = vmatprep.subr.bf16.mxu0 %v4841_v9  ;;  %v4918_v9 = vld [vmem:[%s6678_s4 + $0x4a8] ss:$16 sps:$4 sm:$0xff]  }
  0xab   : > { %2297 = vmatpush1.bf16.msra.mxu1 %v4842_v12  ;;  %v4930_v12 = vld [vmem:[%s6679_s5 + $0xcc] ss:$16 sps:$4 sm:$0xff]  }
  0xac   : > { %2215 = vmatpush1.bf16.msra.mxu0 %v4839_v11  ;;  %2298 = vmatprep.subr.bf16.mxu1 %v4850_v14  ;;  %v4926_v11 = vld [vmem:[%s6678_s4 + $0x4cc] ss:$16 sps:$4 sm:$0xff]   ;;  %v4924_v14 = vld [vmem:[%s6678_s4 + $0x4c8] ss:$16 sps:$4 sm:$0xff]  }
  0xad   : > { %2216 = vmatprep.subr.bf16.mxu0 %v4847_v13  ;;  %v4927_v13 = vld [vmem:[%s5808_s29 + $0x8] sm:$0xff]  }
  0xaf   : > { %2299 = vmatpush1.bf16.msra.mxu1 %v4848_v16  ;;  %v4933_v16 = vld [vmem:[%s6678_s4 + $0x4ec] ss:$16 sps:$4 sm:$0xff]  }
  0xb0   : > { %2217 = vmatpush1.bf16.msra.mxu0 %v4845_v15  ;;  %2300 = vmatprep.subr.bf16.mxu1 %v4856_v18  ;;  %v4928_v15 = vld [vmem:[%s6679_s5 + $0xc8] ss:$16 sps:$4 sm:$0xff]  }
  0xb1   : > { %2218 = vmatprep.subr.bf16.mxu0 %v4853_v17  ;;  %v4936_v17 = vld [vmem:[%s6679_s5 + $0xec] ss:$16 sps:$4 sm:$0xff]   ;;  %v4931_v18 = vld [vmem:[%s6678_s4 + $0x4e8] ss:$16 sps:$4 sm:$0xff]  }
  0xb3   : > { %2301 = vmatpush1.bf16.msra.mxu1 %v4854_v20  ;;  %v4939_v20 = vld [vmem:[%s6678_s4 + $0x50c] ss:$16 sps:$4 sm:$0xff]  }
  0xb4   : > { %2219 = vmatpush1.bf16.msra.mxu0 %v4851_v19  ;;  %2302 = vmatprep.subr.bf16.mxu1 %v4862_v26  ;;  %v4934_v19 = vld [vmem:[%s6679_s5 + $0xe8] ss:$16 sps:$4 sm:$0xff]  }
  0xb5   : > { %2220 = vmatprep.subr.bf16.mxu0 %v4859_v25  ;;  %v4942_v25 = vld [vmem:[%s6679_s5 + $0x4] ss:$16 sps:$4 sm:$0xff]   ;;  %v4937_v26 = vld [vmem:[%s6678_s4 + $0x508] ss:$16 sps:$4 sm:$0xff]  }
  0xb7   : > { %2303 = vmatpush1.bf16.msra.mxu1 %v4860_v28  ;;  %v4945_v28 = vld [vmem:[%s6678_s4 + $0x52c] ss:$16 sps:$4 sm:$0xff]  }
  0xb8   : > { %2221 = vmatpush1.bf16.msra.mxu0 %v4857_v27  ;;  %2304 = vmatprep.subr.bf16.mxu1 %v4868_v31  ;;  %v4940_v27 = vld [vmem:[%s6679_s5] ss:$16 sps:$4 sm:$0xff]   ;;  %v4943_v31 = vld [vmem:[%s6678_s4 + $0x528] ss:$16 sps:$4 sm:$0xff]  }
  0xb9   : > { %2222 = vmatprep.subr.bf16.mxu0 %v4865_v30  ;;  %v4948_v30 = vld [vmem:[%s6679_s5 + $0x24] ss:$16 sps:$4 sm:$0xff]  }
  0xbb   : > { %2305 = vmatpush1.bf16.msra.mxu1 %v4866_v33  ;;  %v4951_v33 = vld [vmem:[%s6678_s4 + $0x54c] ss:$16 sps:$4 sm:$0xff]  }
  0xbc   : > { %2223 = vmatpush1.bf16.msra.mxu0 %v4863_v32  ;;  %2306 = vmatprep.subr.bf16.mxu1 %v4874_v35  ;;  %v4946_v32 = vld [vmem:[%s6679_s5 + $0x20] ss:$16 sps:$4 sm:$0xff]   ;;  %v4949_v35 = vld [vmem:[%s6678_s4 + $0x548] ss:$16 sps:$4 sm:$0xff]  }
  0xbd   : > { %2224 = vmatprep.subr.bf16.mxu0 %v4871_v34  ;;  %v4954_v34 = vld [vmem:[%s6679_s5 + $0x44] ss:$16 sps:$4 sm:$0xff]  }
  0xbf   : > { %2307 = vmatpush1.bf16.msra.mxu1 %v4872_v37  ;;  %v4957_v37 = vld [vmem:[%s6678_s4 + $0x56c] ss:$16 sps:$4 sm:$0xff]  }
  0xc0   : > { %2225 = vmatpush1.bf16.msra.mxu0 %v4869_v36  ;;  %2308 = vmatprep.subr.bf16.mxu1 %v4880_v41  ;;  %v4952_v36 = vld [vmem:[%s6679_s5 + $0x40] ss:$16 sps:$4 sm:$0xff]   ;;  %v4955_v41 = vld [vmem:[%s6678_s4 + $0x568] ss:$16 sps:$4 sm:$0xff]  }
  0xc1   : > { %2226 = vmatprep.subr.bf16.mxu0 %v4877_v39  ;;  %v4960_v39 = vld [vmem:[%s6679_s5 + $0x64] ss:$16 sps:$4 sm:$0xff]  }
  0xc3   : > { %2309 = vmatpush1.bf16.msra.mxu1 %v4878_v60  ;;  %v4963_v60 = vld [vmem:[%s6678_s4 + $0x58c] ss:$16 sps:$4 sm:$0xff]  }
  0xc4   : > { %2227 = vmatpush1.bf16.msra.mxu0 %v4875_v42  ;;  %2310 = vmatprep.subr.bf16.mxu1 %v4886_v45  ;;  %v4958_v42 = vld [vmem:[%s6679_s5 + $0x60] ss:$16 sps:$4 sm:$0xff]  }
  0xc5   : > { %2228 = vmatprep.subr.bf16.mxu0 %v4883_v44  ;;  %v4967_v44 = vld [vmem:[%s6679_s5 + $0x104] ss:$16 sps:$4 sm:$0xff]  }
  0xc6   : > { %v6137_v45 = vld [vmem:[%s5889_s14] sm:$0xff]  }
  0xc7   : > { %2311 = vmatpush1.bf16.msra.mxu1 %v4884_v22  ;;  %v4965_v22 = vld [vmem:[%s6679_s5 + $0x100] ss:$16 sps:$4 sm:$0xff]  }
  0xc8   : > { %2229 = vmatpush1.bf16.msra.mxu0 %v4881_v21  ;;  %2321 = vmatprep.subr.bf16.mxu1 %v4889_v48  ;;  %v4961_v21 = vld [vmem:[%s6678_s4 + $0x588] ss:$16 sps:$4 sm:$0xff]   ;;  %v4970_v48 = vld [vmem:[%s6678_s4 + $0x5ac] ss:$16 sps:$4 sm:$0xff]  }
  0xc9   : > { %2540 = vmatprep.subr.bf16.mxu0 %v4892_v49  ;;  %v4973_v49 = vld [vmem:[%s6679_s5 + $0x124] ss:$16 sps:$4 sm:$0xff]  }
  0xca   : > { %2313 = vmatmul.mubr.bf16.vlgmr.msra.gmra.mrb[4].mxu1 %v5543_v23  ;;  %v4904_v23 = vld [vmem:[%s6679_s5 + $0xc4] ss:$16 sps:$4 sm:$0xff]  }
  0xcb   : > { %2231 = vmatmul.mubr.bf16.vlgmr.msra.gmra.mrb[0].mxu0 %v5977_v50  ;;  %2322 = vmatpush1.bf16.msra.mxu1 %v4887_v59  ;;  %v4968_v59 = vld [vmem:[%s6678_s4 + $0x5a8] ss:$16 sps:$4 sm:$0xff]  }
  0xcc   : > { %2541 = vmatpush1.bf16.msra.mxu0 %v4890_v51  ;;  %2323 = vmatprep.subr.bf16.mxu1 %v4895_v52  ;;  %v4971_v51 = vld [vmem:[%s6679_s5 + $0x120] ss:$16 sps:$4 sm:$0xff]   ;;  %v4976_v52 = vld [vmem:[%s6678_s4 + $0x5cc] ss:$16 sps:$4 sm:$0xff]  }
  0xcd   : > { %2542 = vmatprep.subr.bf16.mxu0 %v4898_v24  ;;  %2572 = vmatprep.mubr.bf16.mxu0 %v5213_v56  ;;  %v4980_v24 = vld [vmem:[%s6679_s5 + $0x144] ss:$16 sps:$4 sm:$0xff]  }
  0xce   : > { %2353 = vmatprep.mubr.bf16.mxu1 %v5559_v29  ;;  %v4910_v29 = vld [vmem:[%s6679_s5 + $0xe4] ss:$16 sps:$4 sm:$0xff]  }
  0xcf   : > { %2324 = vmatpush1.bf16.msra.mxu1 %v4893_v53  ;;  %v6168_v53 = vld [vmem:[%s5889_s14 + $0x8] sm:$0xff]   ;;  %s4055_s14 = sshll.u32 %s5782_s11, 3 }
  0xd0   : > { %2543 = vmatpush1.bf16.msra.mxu0 %v4896_v54  ;;  %2325 = vmatprep.subr.bf16.mxu1 %v4901_v55  ;;  %v4974_v54 = vld [vmem:[%s6678_s4 + $0x5c8] ss:$16 sps:$4 sm:$0xff]   ;;  %v4978_v55 = vld [vmem:[%s6679_s5 + $0x140] ss:$16 sps:$4 sm:$0xff]   ;;  %s486_s27 = scalar_lea.vmem %s6684_s10, %s4055_s14 }
  0xd1   : > { %2544 = vmatprep.subr.bf16.mxu0 %v4904_v23  ;;  %v4983_v23 = vld [vmem:[%s6678_s4 + $0x5ec] ss:$16 sps:$4 sm:$0xff]  }
  0xd3   : > { %2326 = vmatpush1.bf16.msra.mxu1 %v4899_v57  ;;  %v4986_v57 = vld [vmem:[%s6679_s5 + $0x164] ss:$16 sps:$4 sm:$0xff]  }
  0xd4   : > { %2545 = vmatpush1.bf16.msra.mxu0 %v4902_v58  ;;  %2327 = vmatprep.subr.bf16.mxu1 %v4907_v61  ;;  %v4981_v58 = vld [vmem:[%s6678_s4 + $0x5e8] ss:$16 sps:$4 sm:$0xff]   ;;  %v4984_v61 = vld [vmem:[%s6679_s5 + $0x160] ss:$16 sps:$4 sm:$0xff]  }
  0xd5   : > { %2546 = vmatprep.subr.bf16.mxu0 %v4910_v29  ;;  %v4989_v29 = vld [vmem:[%s6678_s4 + $0x60c] ss:$16 sps:$4 sm:$0xff]  }
  0xd7   : > { %2328 = vmatpush1.bf16.msra.mxu1 %v4905_v62  ;;  %v6195_v62 = vld [vmem:[%s5928_s25] sm:$0xff]  }
  0xd8   : > { %2547 = vmatpush1.bf16.msra.mxu0 %v4908_v63  ;;  %2329 = vmatprep.subr.bf16.mxu1 %v4913_v0  ;;  %v4987_v63 = vld [vmem:[%s6678_s4 + $0x608] ss:$16 sps:$4 sm:$0xff]   ;;  %v4993_v0 = vld [vmem:[%s6678_s4 + $0x62c] ss:$16 sps:$4 sm:$0xff]  }
  0xd9   : > { %2593 = vmatprep.subr.bf16.mxu0 %v4917_v1  ;;  %v4991_v1 = vld [vmem:[%s6678_s4 + $0x628] ss:$16 sps:$4 sm:$0xff]  }
  0xdb   : > { %4330 = vmatmul.mubr.msk.bf16.vlgmr.msra.gmra.mrb[4].mxu0 %vm2533_vm0, %v4914_v2  ;;  %2330 = vmatpush1.bf16.msra.mxu1 %v4911_v3  ;;  %v6215_v3 = vld [vmem:[%s5928_s25 + $0x8] sm:$0xff]  }
  0xdc   : > { %2594 = vmatpush1.bf16.msra.mxu0 %v4915_v4  ;;  %2331 = vmatprep.subr.bf16.mxu1 %v4920_v7  ;;  %v5000_v4 = vld [vmem:[%s6678_s4 + $0x66c] ss:$16 sps:$4 sm:$0xff]  }
  0xdd   : > { %2595 = vmatprep.subr.bf16.mxu0 %v4923_v8  ;;  %2582 = vmatprep.mubr.bf16.mxu0 %v5213_v56  ;;  %v5003_v7 = vld [vmem:[%s6678_s4 + $0x68c] ss:$16 sps:$4 sm:$0xff]   ;;  %v5001_v8 = vld [vmem:[%s6678_s4 + $0x688] ss:$16 sps:$4 sm:$0xff]  }
  0xdf   : > { %2332 = vmatpush1.bf16.msra.mxu1 %v4918_v9  ;;  %v5006_v9 = vld [vmem:[%s6678_s4 + $0x6ac] ss:$16 sps:$4 sm:$0xff]  }
  0xe0   : > { %2596 = vmatpush1.bf16.msra.mxu0 %v4921_v10  ;;  %2333 = vmatprep.subr.bf16.mxu1 %v4926_v11  ;;  %v5004_v10 = vld [vmem:[%s6678_s4 + $0x6a8] ss:$16 sps:$4 sm:$0xff]   ;;  %v5009_v11 = vld [vmem:[%s6678_s4 + $0x6cc] ss:$16 sps:$4 sm:$0xff]  }
  0xe1   : > { %2597 = vmatprep.subr.bf16.mxu0 %v4930_v12 }
  0xe3   : > { %4331 = vmatmul.mubr.msk.bf16.gmra.mrb[8].mxu0 %vm2533_vm0, %v4927_v13  ;;  %2334 = vmatpush1.bf16.msra.mxu1 %v4924_v14 }
  0xe4   : > { %2598 = vmatpush1.bf16.msra.mxu0 %v4928_v15  ;;  %2335 = vmatprep.subr.bf16.mxu1 %v4933_v16  ;;  %v5007_v15 = vld [vmem:[%s6678_s4 + $0x6c8] ss:$16 sps:$4 sm:$0xff]  }
  0xe5   : > { %2599 = vmatprep.subr.bf16.mxu0 %v4936_v17  ;;  %2625 = vmatprep.mubr.bf16.mxu0 %v5213_v56  ;;  %v5012_v17 = vld [vmem:[%s6678_s4 + $0x6ec] ss:$16 sps:$4 sm:$0xff]  }
  0xe7   : > { %2336 = vmatpush1.bf16.msra.mxu1 %v4931_v18  ;;  %v5061_v18 = vld [vmem:[%s6681_s7] ss:$8 sps:$4 sm:$0xff]  }
  0xe8   : > { %2600 = vmatpush1.bf16.msra.mxu0 %v4934_v19  ;;  %2337 = vmatprep.subr.bf16.mxu1 %v4939_v20  ;;  %v5063_v19 = vld [vmem:[%s6681_s7 + $0x4] ss:$8 sps:$4 sm:$0xff]   ;;  %v5066_v20 = vld [vmem:[%s6681_s7 + $0x14] ss:$8 sps:$4 sm:$0xff]  }
  0xe9   : > { %2742 = vmatprep.subr.bf16.mxu0 %v4942_v25  ;;  %v5010_v25 = vld [vmem:[%s6678_s4 + $0x6e8] ss:$16 sps:$4 sm:$0xff]  }
  0xeb   : > { %4332 = vmatmul.mubr.msk.bf16.vlgmr.msra.gmra.mrb[12].mxu0 %vm2533_vm0, %v4914_v2  ;;  %2338 = vmatpush1.bf16.msra.mxu1 %v4937_v26  ;;  %v4996_v2 = vld [vmem:[%s6678_s4 + $0x64c] ss:$16 sps:$4 sm:$0xff]  }
  0xec   : > { %2743 = vmatpush1.bf16.msra.mxu0 %v4940_v27  ;;  %2339 = vmatprep.subr.bf16.mxu1 %v4945_v28  ;;  %v5015_v26 = vld [vmem:[%s6678_s4 + $0x70c] ss:$16 sps:$4 sm:$0xff]   ;;  %v5064_v27 = vld [vmem:[%s6681_s7 + $0x10] ss:$8 sps:$4 sm:$0xff]  }
  0xed   : > { %2744 = vmatprep.subr.bf16.mxu0 %v4948_v30  ;;  %2635 = vmatprep.mubr.bf16.mxu0 %v5213_v56  ;;  %v5069_v28 = vld [vmem:[%s6681_s7 + $0x24] ss:$8 sps:$4 sm:$0xff]   ;;  %v5013_v30 = vld [vmem:[%s6678_s4 + $0x708] ss:$16 sps:$4 sm:$0xff]  }
  0xef   : > { %2340 = vmatpush1.bf16.msra.mxu1 %v4943_v31  ;;  %v5018_v31 = vld [vmem:[%s6678_s4 + $0x72c] ss:$16 sps:$4 sm:$0xff]  }
  0xf0   : > { %2745 = vmatpush1.bf16.msra.mxu0 %v4946_v32  ;;  %2341 = vmatprep.subr.bf16.mxu1 %v4951_v33  ;;  %v5067_v32 = vld [vmem:[%s6681_s7 + $0x20] ss:$8 sps:$4 sm:$0xff]   ;;  %v5072_v33 = vld [vmem:[%s6681_s7 + $0x34] ss:$8 sps:$4 sm:$0xff]  }
  0xf1   : > { %2746 = vmatprep.subr.bf16.mxu0 %v4954_v34  ;;  %v5016_v34 = vld [vmem:[%s6678_s4 + $0x728] ss:$16 sps:$4 sm:$0xff]  }
  0xf3   : > { %4333 = vmatmul.mubr.msk.bf16.gmra.mrb[16].mxu0 %vm2533_vm0, %v4927_v13  ;;  %2342 = vmatpush1.bf16.msra.mxu1 %v4949_v35  ;;  %v5021_v35 = vld [vmem:[%s6678_s4 + $0x74c] ss:$16 sps:$4 sm:$0xff]  }
  0xf4   : > { %2747 = vmatpush1.bf16.msra.mxu0 %v4952_v36  ;;  %2343 = vmatprep.subr.bf16.mxu1 %v4957_v37  ;;  %v5070_v36 = vld [vmem:[%s6681_s7 + $0x30] ss:$8 sps:$4 sm:$0xff]   ;;  %v5075_v37 = vld [vmem:[%s6681_s7 + $0x44] ss:$8 sps:$4 sm:$0xff]  }
  0xf5   : > { %2748 = vmatprep.subr.bf16.mxu0 %v4960_v39  ;;  %2774 = vmatprep.mubr.bf16.mxu0 %v5213_v56  ;;  %v5019_v39 = vld [vmem:[%s6678_s4 + $0x748] ss:$16 sps:$4 sm:$0xff]  }
  0xf7   : > { %2344 = vmatpush1.bf16.msra.mxu1 %v4955_v41  ;;  %v5024_v41 = vld [vmem:[%s6678_s4 + $0x76c] ss:$16 sps:$4 sm:$0xff]  }
  0xf8   : > { %2749 = vmatpush1.bf16.msra.mxu0 %v4958_v42  ;;  %2345 = vmatprep.subr.bf16.mxu1 %v4963_v60  ;;  %v5073_v42 = vld [vmem:[%s6681_s7 + $0x40] ss:$8 sps:$4 sm:$0xff]   ;;  %v5078_v60 = vld [vmem:[%s6681_s7 + $0x54] ss:$8 sps:$4 sm:$0xff]  }
  0xf9   : > { %2964 = vmatprep.subr.bf16.mxu0 %v4967_v44  ;;  %v5022_v44 = vld [vmem:[%s6678_s4 + $0x768] ss:$16 sps:$4 sm:$0xff]  }
  0xfb   : > { %4352 = vmatmul.mubr.msk.bf16.vlgmr.msra.gmra.mrb[4].mxu0 %vm2533_vm0, %v6137_v45  ;;  %2346 = vmatpush1.bf16.msra.mxu1 %v4961_v21  ;;  %v5027_v21 = vld [vmem:[%s6678_s4 + $0x78c] ss:$16 sps:$4 sm:$0xff]  }
  0xfc   : > { %2965 = vmatpush1.bf16.msra.mxu0 %v4965_v22  ;;  %2347 = vmatprep.subr.bf16.mxu1 %v4970_v48  ;;  %v5076_v22 = vld [vmem:[%s6681_s7 + $0x50] ss:$8 sps:$4 sm:$0xff]   ;;  %v5081_v48 = vld [vmem:[%s6681_s7 + $0x64] ss:$8 sps:$4 sm:$0xff]  }
  0xfd   : > { %2966 = vmatprep.subr.bf16.mxu0 %v4973_v49  ;;  %2784 = vmatprep.mubr.bf16.mxu0 %v5213_v56  ;;  %v5025_v49 = vld [vmem:[%s6678_s4 + $0x788] ss:$16 sps:$4 sm:$0xff]  }
  0xff   : > { %2348 = vmatpush1.bf16.msra.mxu1 %v4968_v59  ;;  %v5030_v59 = vld [vmem:[%s6678_s4 + $0x7ac] ss:$16 sps:$4 sm:$0xff]  }
 0x100   : > { %2967 = vmatpush1.bf16.msra.mxu0 %v4971_v51  ;;  %2349 = vmatprep.subr.bf16.mxu1 %v4976_v52  ;;  %v5079_v51 = vld [vmem:[%s6681_s7 + $0x60] ss:$8 sps:$4 sm:$0xff]   ;;  %v5084_v52 = vld [vmem:[%s6681_s7 + $0x74] ss:$8 sps:$4 sm:$0xff]  }
 0x101   : > { %2968 = vmatprep.subr.bf16.mxu0 %v4980_v24  ;;  %v5028_v24 = vld [vmem:[%s6678_s4 + $0x7a8] ss:$16 sps:$4 sm:$0xff]  }
 0x103   : > { %4353 = vmatmul.mubr.msk.bf16.gmra.mrb[8].mxu0 %vm2533_vm0, %v6168_v53  ;;  %2350 = vmatpush1.bf16.msra.mxu1 %v4974_v54  ;;  %v5033_v54 = vld [vmem:[%s6678_s4 + $0x7cc] ss:$16 sps:$4 sm:$0xff]  }
 0x104   : > { %2969 = vmatpush1.bf16.msra.mxu0 %v4978_v55  ;;  %2351 = vmatprep.subr.bf16.mxu1 %v4983_v23  ;;  %v5082_v55 = vld [vmem:[%s6681_s7 + $0x70] ss:$8 sps:$4 sm:$0xff]   ;;  %v5087_v23 = vld [vmem:[%s6681_s7 + $0x84] ss:$8 sps:$4 sm:$0xff]  }
 0x105   : > { %2970 = vmatprep.subr.bf16.mxu0 %v4986_v57  ;;  %2996 = vmatprep.mubr.bf16.mxu0 %v5213_v56  ;;  %v5031_v57 = vld [vmem:[%s6678_s4 + $0x7c8] ss:$16 sps:$4 sm:$0xff]  }
 0x107   : > { %2352 = vmatpush1.bf16.msra.mxu1 %v4981_v58  ;;  %v5036_v58 = vld [vmem:[%s6678_s4 + $0x7ec] ss:$16 sps:$4 sm:$0xff]  }
 0x108   : > { %2971 = vmatpush1.bf16.msra.mxu0 %v4984_v61  ;;  %2362 = vmatprep.subr.bf16.mxu1 %v4989_v29  ;;  %v5085_v61 = vld [vmem:[%s6681_s7 + $0x80] ss:$8 sps:$4 sm:$0xff]   ;;  %v5090_v29 = vld [vmem:[%s6681_s7 + $0x94] ss:$8 sps:$4 sm:$0xff]  }
 0x109   : > { %3592 = vmatprep.subr.bf16.mxu0 %v5063_v19  ;;  %v5054_v19 = vld [vmem:[%s6679_s5 + $0x12c] ss:$16 sps:$4 sm:$0xff]  }
 0x10a   : > { %2354 = vmatmul.mubr.bf16.vlgmr.msra.gmra.mrb[4].mxu1 %v5748_v38  ;;  %v4994_v38 = vld [vmem:[%s6678_s4 + $0x648] ss:$16 sps:$4 sm:$0xff]  }
 0x10b   : > { %4374 = vmatmul.mubr.msk.bf16.vlgmr.msra.gmra.mrb[4].mxu0 %vm2533_vm0, %v6195_v62  ;;  %2363 = vmatpush1.bf16.msra.mxu1 %v4987_v63  ;;  %v5034_v63 = vld [vmem:[%s6678_s4 + $0x7e8] ss:$16 sps:$4 sm:$0xff]  }
 0x10c   : > { %3006 = vmatprep.mubr.bf16.mxu0 %v5213_v56  ;;  %2364 = vmatprep.subr.bf16.mxu1 %v4993_v0  ;;  %v5039_v0 = vld [vmem:[%s6679_s5 + $0xc] ss:$16 sps:$4 sm:$0xff]  }
 0x10d   : > { %2394 = vmatprep.mubr.bf16.mxu1 %v5764_v43  ;;  %v4998_v43 = vld [vmem:[%s6678_s4 + $0x668] ss:$16 sps:$4 sm:$0xff]   ;;  %3593 = vmatpush1.bf16.msra.mxu0 %v5061_v18 }
 0x10e   : > { %3594 = vmatprep.subr.bf16.mxu0 %v5066_v20  ;;  %v5049_v18 = vld [vmem:[%s6679_s5 + $0x108] ss:$16 sps:$4 sm:$0xff]  }
 0x10f   : > { %2365 = vmatpush1.bf16.msra.mxu1 %v4991_v1  ;;  %v5088_v1 = vld [vmem:[%s6681_s7 + $0x90] ss:$8 sps:$4 sm:$0xff]  }
 0x110   : > { %2366 = vmatprep.subr.bf16.mxu1 %v4996_v2  ;;  %v5093_v2 = vld [vmem:[%s6681_s7 + $0xa4] ss:$8 sps:$4 sm:$0xff]   ;;  %v5052_v20 = vld [vmem:[%s6679_s5 + $0x128] ss:$16 sps:$4 sm:$0xff]  }
 0x111   : > { %3595 = vmatpush1.bf16.msra.mxu0 %v5064_v27  ;;  %v5100_v27 = vld [vmem:[%s6681_s7 + $0xd0] ss:$8 sps:$4 sm:$0xff]  }
 0x112   : > { %3596 = vmatprep.subr.bf16.mxu0 %v5069_v28  ;;  %v5060_v28 = vld [vmem:[%s6679_s5 + $0x16c] ss:$16 sps:$4 sm:$0xff]  }
 0x113   : > { %4375 = vmatmul.mubr.msk.bf16.gmra.mrb[8].mxu0 %vm2533_vm0, %v6215_v3  ;;  %2367 = vmatpush1.bf16.msra.mxu1 %v4994_v38  ;;  %v5037_v38 = vld [vmem:[%s6679_s5 + $0x8] ss:$16 sps:$4 sm:$0xff]  }
 0x114   : > { %2368 = vmatprep.subr.bf16.mxu1 %v5000_v4  ;;  %v5042_v4 = vld [vmem:[%s6679_s5 + $0x2c] ss:$16 sps:$4 sm:$0xff]  }
 0x115   : > { %3597 = vmatpush1.bf16.msra.mxu0 %v5067_v32  ;;  %v5103_v32 = vld [vmem:[%s6681_s7 + $0xe0] ss:$8 sps:$4 sm:$0xff]  }
 0x116   : > { %3598 = vmatprep.subr.bf16.mxu0 %v5072_v33  ;;  %v5106_v33 = vld [vmem:[%s6681_s7 + $0xf0] ss:$8 sps:$4 sm:$0xff]  }
 0x117   : > { %2369 = vmatpush1.bf16.msra.mxu1 %v4998_v43  ;;  %v5091_v43 = vld [vmem:[%s6681_s7 + $0xa0] ss:$8 sps:$4 sm:$0xff]  }
 0x118   : > { %2370 = vmatprep.subr.bf16.mxu1 %v5003_v7  ;;  %v5096_v7 = vld [vmem:[%s6681_s7 + $0xb4] ss:$8 sps:$4 sm:$0xff]  }
 0x119   : > { %3599 = vmatpush1.bf16.msra.mxu0 %v5070_v36 }
 0x11a   : > { %3600 = vmatprep.subr.bf16.mxu0 %v5075_v37 }
 0x11b   : > { %2371 = vmatpush1.bf16.msra.mxu1 %v5001_v8  ;;  %v5040_v8 = vld [vmem:[%s6679_s5 + $0x28] ss:$16 sps:$4 sm:$0xff]  }
 0x11c   : > { %2372 = vmatprep.subr.bf16.mxu1 %v5006_v9  ;;  %v5045_v9 = vld [vmem:[%s6679_s5 + $0x4c] ss:$16 sps:$4 sm:$0xff]  }
 0x11d   : > { %v6243_v12 = vpop.f32.mrb[0].mxu1  ;;  %3601 = vmatpush1.bf16.msra.mxu0 %v5073_v42 }
 0x11e   : > { %v6245_v13 = vpop.f32.mrb[1].mxu1  ;;  %3602 = vmatprep.subr.bf16.mxu0 %v5078_v60 }
 0x11f   : > { %v2113_v14 = vpop.f32.mrb[2].mxu1  ;;  %2373 = vmatpush1.bf16.msra.mxu1 %v5004_v10  ;;  %v5094_v10 = vld [vmem:[%s6681_s7 + $0xb0] ss:$8 sps:$4 sm:$0xff]  }
 0x120   : > { %v2114_v16 = vpop.f32.mrb[3].mxu1  ;;  %2374 = vmatprep.subr.bf16.mxu1 %v5009_v11  ;;  %v5043_v11 = vld [vmem:[%s6679_s5 + $0x48] ss:$16 sps:$4 sm:$0xff]   ;;  %v5048_v14 = vld [vmem:[%s6679_s5 + $0x6c] ss:$16 sps:$4 sm:$0xff]  }
 0x121   : > { %3603 = vmatpush1.bf16.msra.mxu0 %v5076_v22  ;;  %v5046_v16 = vld [vmem:[%s6679_s5 + $0x68] ss:$16 sps:$4 sm:$0xff]  }
 0x122   : > { %3604 = vmatprep.subr.bf16.mxu0 %v5081_v48  ;;  %v5158_v48 = vld [vmem:[%s6683_s9] sm:$0xff]  }
 0x123   : > { %2375 = vmatpush1.bf16.msra.mxu1 %v5007_v15  ;;  %v5097_v15 = vld [vmem:[%s6681_s7 + $0xc0] ss:$8 sps:$4 sm:$0xff]  }
 0x124   : > { %2376 = vmatprep.subr.bf16.mxu1 %v5012_v17  ;;  %v5051_v17 = vld [vmem:[%s6679_s5 + $0x10c] ss:$16 sps:$4 sm:$0xff]  }
 0x125   : > { %3605 = vmatpush1.bf16.msra.mxu0 %v5079_v51  ;;  %v5160_v51 = vld [vmem:[%s6683_s9 + $0x8] sm:$0xff]  }
 0x126   : > { %3606 = vmatprep.subr.bf16.mxu0 %v5084_v52  ;;  %v5161_v52 = vld [vmem:[%s6683_s9 + $0x50] sm:$0xff]  }
 0x127   : > { %2377 = vmatpush1.bf16.msra.mxu1 %v5010_v25  ;;  %v5057_v25 = vld [vmem:[%s6679_s5 + $0x14c] ss:$16 sps:$4 sm:$0xff]  }
 0x128   : > { %2378 = vmatprep.subr.bf16.mxu1 %v5015_v26  ;;  %v5102_v26 = vld [vmem:[%s6681_s7 + $0xd4] ss:$8 sps:$4 sm:$0xff]  }
 0x129   : > { %3607 = vmatpush1.bf16.msra.mxu0 %v5082_v55 }
 0x12a   : > { %3608 = vmatprep.subr.bf16.mxu0 %v5087_v23 }
 0x12b   : > { %2379 = vmatpush1.bf16.msra.mxu1 %v5013_v30  ;;  %v5105_v30 = vld [vmem:[%s6681_s7 + $0xe4] ss:$8 sps:$4 sm:$0xff]  }
 0x12c   : > { %2380 = vmatprep.subr.bf16.mxu1 %v5018_v31  ;;  %v5058_v31 = vld [vmem:[%s6679_s5 + $0x168] ss:$16 sps:$4 sm:$0xff]  }
 0x12d   : > { %3609 = vmatpush1.bf16.msra.mxu0 %v5085_v61 }
 0x12e   : > { %3610 = vmatprep.subr.bf16.mxu0 %v5090_v29 }
 0x12f   : > { %2381 = vmatpush1.bf16.msra.mxu1 %v5016_v34  ;;  %v5111_v34 = vld [vmem:[%s6681_s7 + $0x104] ss:$8 sps:$4 sm:$0xff]  }
 0x130   : > { %2382 = vmatprep.subr.bf16.mxu1 %v5021_v35 }
 0x131   : > { %3611 = vmatpush1.bf16.msra.mxu0 %v5088_v1 }
 0x132   : > { %3612 = vmatprep.subr.bf16.mxu0 %v5093_v2 }
 0x133   : > { %2383 = vmatpush1.bf16.msra.mxu1 %v5019_v39 }
 0x134   : > { %2384 = vmatprep.subr.bf16.mxu1 %v5024_v41 }
 0x135   : > { %3613 = vmatpush1.bf16.msra.mxu0 %v5091_v43 }
 0x136   : > { %3614 = vmatprep.subr.bf16.mxu0 %v5096_v7 }
 0x137   : > { %2385 = vmatpush1.bf16.msra.mxu1 %v5022_v44 }
 0x138   : > { %2386 = vmatprep.subr.bf16.mxu1 %v5027_v21 }
 0x139   : > { %3615 = vmatpush1.bf16.msra.mxu0 %v5094_v10 }
 0x13b   : > { %2387 = vmatpush1.bf16.msra.mxu1 %v5025_v49  ;;  %v5159_v49 = vld [vmem:[%s6683_s9 + $0x48] sm:$0xff]  }
 0x13c   : > { %2388 = vmatprep.subr.bf16.mxu1 %v5030_v59  ;;  %v6494_v59 = vld [vmem:[%s6680_s6] sm:$0xf] }
 0x13f   : > { %2389 = vmatpush1.bf16.msra.mxu1 %v5028_v24 }
 0x140   : > { %2390 = vmatprep.subr.bf16.mxu1 %v5033_v54  ;;  %v3123_v54 = vrot.slane %v6494_v59, %v5506_v5 }
 0x143   : > { %2391 = vmatpush1.bf16.msra.mxu1 %v5031_v57  ;;  %v3127_v57 = vrot.slane %v6494_v59, %v5448_v46 }
 0x144   : > { %2392 = vmatprep.subr.bf16.mxu1 %v5036_v58  ;;  %v5162_v58 = vld [vmem:[%s6683_s9 + $0x10] sm:$0xff]  }
 0x147   : > { %2393 = vmatpush1.bf16.msra.mxu1 %v5034_v63  ;;  %v5163_v63 = vld [vmem:[%s6683_s9 + $0x58] sm:$0xff]  }
 0x148   : > { %2795 = vmatprep.subr.bf16.mxu1 %v5039_v0 }
 0x14a   : > { %2395 = vmatmul.mubr.bf16.vlgmr.msra.gmra.mrb[4].mxu1 %v5977_v50  ;;  %v5099_v50 = vld [vmem:[%s6681_s7 + $0xc4] ss:$8 sps:$4 sm:$0xff]  }
 0x14b   : > { %2796 = vmatpush1.bf16.msra.mxu1 %v5037_v38  ;;  %2827 = vmatprep.mubr.bf16.mxu1 %v5213_v56 }
 0x14c   : > { %2797 = vmatprep.subr.bf16.mxu1 %v5042_v4  ;;  %3616 = vmatprep.subr.bf16.mxu0 %v5099_v50  ;;  %v5165_v50 = vld [vmem:[%s6683_s9 + $0x60] sm:$0xff]  }
 0x14d   : > { %3617 = vmatpush1.bf16.msra.mxu0 %v5097_v15 }
 0x14e   : > { %3618 = vmatprep.subr.bf16.mxu0 %v5102_v26 }
 0x14f   : > { %2798 = vmatpush1.bf16.msra.mxu1 %v5040_v8  ;;  %v5164_v8 = vld [vmem:[%s6683_s9 + $0x18] sm:$0xff]  }
 0x150   : > { %2799 = vmatprep.subr.bf16.mxu1 %v5045_v9 }
 0x151   : > { %3619 = vmatpush1.bf16.msra.mxu0 %v5100_v27 }
 0x152   : > { %3620 = vmatprep.subr.bf16.mxu0 %v5105_v30 }
 0x153   : > { %2800 = vmatpush1.bf16.msra.mxu1 %v5043_v11 }
 0x154   : > { %2801 = vmatprep.subr.bf16.mxu1 %v5048_v14 }
 0x155   : > { %3621 = vmatpush1.bf16.msra.mxu0 %v5103_v32 }
 0x157   : > { %2802 = vmatpush1.bf16.msra.mxu1 %v5046_v16 }
 0x158   : > { %3017 = vmatprep.subr.bf16.mxu1 %v5051_v17 }
 0x15a   : > { %4354 = vmatmul.mubr.msk.bf16.vlgmr.msra.gmra.mrb[8].mxu1 %vm2533_vm0, %v6137_v45  ;;  %v5055_v45 = vld [vmem:[%s6679_s5 + $0x148] ss:$16 sps:$4 sm:$0xff]  }
 0x15b   : > { %3018 = vmatpush1.bf16.msra.mxu1 %v5049_v18  ;;  %2837 = vmatprep.mubr.bf16.mxu1 %v5213_v56  ;;  %v5166_v18 = vld [vmem:[%s6683_s9 + $0x20] sm:$0xff]  }
 0x15c   : > { %3019 = vmatprep.subr.bf16.mxu1 %v5054_v19 }
 0x15f   : > { %3020 = vmatpush1.bf16.msra.mxu1 %v5052_v20 }
 0x160   : > { %3021 = vmatprep.subr.bf16.mxu1 %v5057_v25 }
 0x162   : > { %4355 = vmatmul.mubr.msk.bf16.gmra.mrb[12].mxu1 %vm2533_vm0, %v6168_v53  ;;  %v5108_v53 = vld [vmem:[%s6681_s7 + $0xf4] ss:$8 sps:$4 sm:$0xff]  }
 0x163   : > { %3022 = vmatpush1.bf16.msra.mxu1 %v5055_v45  ;;  %3049 = vmatprep.mubr.bf16.mxu1 %v5213_v56 }
 0x164   : > { %3023 = vmatprep.subr.bf16.mxu1 %v5060_v28  ;;  %3622 = vmatprep.subr.bf16.mxu0 %v5108_v53 }
 0x165   : > { %3623 = vmatpush1.bf16.msra.mxu0 %v5106_v33 }
 0x166   : > { %3645 = vmatprep.subr.bf16.mxu0 %v5111_v34 }
 0x167   : > { %3024 = vmatpush1.bf16.msra.mxu1 %v5058_v31 }
 0x16a   : > { %4376 = vmatmul.mubr.msk.bf16.vlgmr.msra.gmra.mrb[8].mxu1 %vm2533_vm0, %v6195_v62 }
 0x16b   : > { %3059 = vmatprep.mubr.bf16.mxu1 %v5213_v56 }
 0x172   : > { %4377 = vmatmul.mubr.msk.bf16.gmra.mrb[12].mxu1 %vm2533_vm0, %v6215_v3 }
 0x19e   : > { %v2232_v35 = vpop.f32.mrb[0].mxu0 }
 0x19f   : > { %v4488_v36 = vadd.f32 %v2232_v35, %v6243_v12  ;;  %v2234_v37 = vpop.f32.mrb[1].mxu0 }
 0x1a0   : > { %v4489_v39 = vadd.f32 %v2234_v37, %v6245_v13  ;;  %v2236_v41 = vpop.f32.mrb[2].mxu0  ;;  %v5157_v13 = vld [vmem:[%s6683_s9 + $0x40] sm:$0xff]  }
 0x1a1   : > { %v2237_v42 = vpop.f32.mrb[3].mxu0  ;;  %4460 = vmatprep.subr.bf16.mxu1 %v5157_v13  ;;  %v3089_v24 = vrot.slane %v4488_v36, %v5506_v5  ;;  %v5109_v37 = vld [vmem:[%s6681_s7 + $0x100] ss:$8 sps:$4 sm:$0xff]  }
 0x1a2   : > { %4461 = vmatpush3.bf16.msra.mxu1 %v5158_v48  ;;  %v3093_v55 = vrot.slane %v4489_v39, %v5506_v5  ;;  %v5114_v42 = vld [vmem:[%s6681_s7 + $0x114] ss:$8 sps:$4 sm:$0xff]  }
 0x1a3   : > { %4462 = vmatprep.subr.bf16.mxu1 %v5159_v49 }
 0x1a6   : > { %4463 = vmatpush3.bf16.msra.mxu1 %v5160_v51 }
 0x1a7   : > { %4464 = vmatprep.subr.bf16.mxu1 %v5161_v52  ;;  %v5112_v52 = vld [vmem:[%s6681_s7 + $0x110] ss:$8 sps:$4 sm:$0xff]  }
 0x1aa   : > { %4465 = vmatpush3.bf16.msra.mxu1 %v5162_v58 }
 0x1ab   : > { %4466 = vmatprep.subr.bf16.mxu1 %v5163_v63  ;;  %v5120_v63 = vld [vmem:[%s6681_s7 + $0x134] ss:$8 sps:$4 sm:$0xff]  }
 0x1ae   : > { %4467 = vmatpush3.bf16.msra.mxu1 %v5164_v8  ;;  %v5132_v8 = vld [vmem:[%s6681_s7 + $0x174] ss:$8 sps:$4 sm:$0xff]  }
 0x1af   : > { %4468 = vmatprep.subr.bf16.mxu1 %v5165_v50  ;;  %v5133_v50 = vld [vmem:[%s6681_s7 + $0x180] ss:$8 sps:$4 sm:$0xff]  }
 0x1b2   : > { %4469 = vmatpush3.bf16.msra.mxu1 %v5166_v18  ;;  %v5142_v18 = vld [vmem:[%s6681_s7 + $0x1b0] ss:$8 sps:$4 sm:$0xff]  }
 0x1be   : > { %v6466_v60 = vpop.f32.mrb[12].mxu0 }
 0x1bf   : > { %v6468_v62 = vpop.f32.mrb[13].mxu0 }
 0x1c0   : > { %v6470_v56 = vpop.f32.mrb[14].mxu0 }
 0x1c1   : > { %v6472_v3 = vpop.f32.mrb[15].mxu0 }
 0x1c6   : > { %v6474_v44 = vpop.f32.mrb[16].mxu0 }
 0x1c7   : > { %v6476_v21 = vpop.f32.mrb[17].mxu0 }
 0x1c8   : > { %v6478_v22 = vpop.f32.mrb[18].mxu0 }
 0x1c9   : > { %v6480_v12 = vpop.f32.mrb[19].mxu0 }
 0x1de   : > { %v2998_v23 = vpop.f32.mrb[4].mxu0 }
 0x1df   : > { %v3102_v61 = vadd.f32 %v3089_v24, %v2998_v23  ;;  %v3000_v29 = vpop.f32.mrb[5].mxu0 }
 0x1e0   : > { %v3103_v0 = vadd.f32 %v3093_v55, %v3000_v29  ;;  %v3002_v1 = vpop.f32.mrb[6].mxu0  ;;  %v5115_v29 = vld [vmem:[%s6681_s7 + $0x120] ss:$8 sps:$4 sm:$0xff]  }
 0x1e1   : > { %v3140_v2 = vadd.f32 %v3123_v54, %v3102_v61  ;;  %v3106_v38 = vadd.f32 %v3089_v24, %v3002_v1  ;;  %v3004_v4 = vpop.f32.mrb[7].mxu0  ;;  %v5123_v1 = vld [vmem:[%s6681_s7 + $0x144] ss:$8 sps:$4 sm:$0xff]  }
 0x1e2   : > { %v3141_v43 = vadd.f32 %v3127_v57, %v3103_v0  ;;  %v3107_v7 = vadd.f32 %v3093_v55, %v3004_v4  ;;  %v5118_v0 = vld [vmem:[%s6681_s7 + $0x130] ss:$8 sps:$4 sm:$0xff]  }
 0x1e3   : > { %v3156_v9 = vmul.f32 0.2, %v3140_v2  ;;  %v3144_v10 = vadd.f32 %v3123_v54, %v3106_v38  ;;  %v5126_v38 = vld [vmem:[%s6681_s7 + $0x154] ss:$8 sps:$4 sm:$0xff]   ;;  %v5124_v4 = vld [vmem:[%s6681_s7 + $0x150] ss:$8 sps:$4 sm:$0xff]  }
 0x1e4   : > { %v3157_v11 = vmul.f32 0.2, %v3141_v43  ;;  %v3145_v14 = vadd.f32 %v3127_v57, %v3107_v7  ;;  %v5127_v7 = vld [vmem:[%s6681_s7 + $0x160] ss:$8 sps:$4 sm:$0xff]  }
 0x1e5   : > { %v3160_v15 = vmul.f32 0.2, %v3144_v10  ;;  %v3172_v19 = vmax.f32 %v3140_v2, %v3156_v9  ;;  %v5121_v2 = vld [vmem:[%s6681_s7 + $0x140] ss:$8 sps:$4 sm:$0xff]   ;;  %v5130_v9 = vld [vmem:[%s6681_s7 + $0x170] ss:$8 sps:$4 sm:$0xff]  }
 0x1e6   : > { %v3161_v16 = vmul.f32 0.2, %v3145_v14  ;;  %v3008_v17 = vpop.f32.mrb[8].mxu0  ;;  %v3173_v45 = vmax.f32 %v3141_v43, %v3157_v11  ;;  %v5129_v43 = vld [vmem:[%s6681_s7 + $0x164] ss:$8 sps:$4 sm:$0xff]  }
 0x1e7   : > { %v3176_v20 = vmax.f32 %v3144_v10, %v3160_v15  ;;  %v3110_v25 = vadd.f32 %v3089_v24, %v3008_v17  ;;  %v3010_v26 = vpop.f32.mrb[9].mxu0  ;;  %v5135_v10 = vld [vmem:[%s6681_s7 + $0x184] ss:$8 sps:$4 sm:$0xff]   ;;  %v5138_v11 = vld [vmem:[%s6681_s7 + $0x194] ss:$8 sps:$4 sm:$0xff]  }
 0x1e8   : > { %v3177_v27 = vmax.f32 %v3145_v14, %v3161_v16  ;;  %v3111_v28 = vadd.f32 %v3093_v55, %v3010_v26  ;;  %v3012_v30 = vpop.f32.mrb[10].mxu0  ;;  %v5136_v14 = vld [vmem:[%s6681_s7 + $0x190] ss:$8 sps:$4 sm:$0xff]   ;;  %v5141_v15 = vld [vmem:[%s6681_s7 + $0x1a4] ss:$8 sps:$4 sm:$0xff]  }
 0x1e9   : > { %v3252_v31 = vpack.c.bf16 %v3176_v20, %v3172_v19  ;;  %v3148_v32 = vadd.f32 %v3123_v54, %v3110_v25  ;;  %v3114_v53 = vadd.f32 %v3089_v24, %v3012_v30  ;;  %v3014_v33 = vpop.f32.mrb[11].mxu0  ;;  %v5139_v16 = vld [vmem:[%s6681_s7 + $0x1a0] ss:$8 sps:$4 sm:$0xff]   ;;  %v5144_v17 = vld [vmem:[%s6681_s7 + $0x1b4] ss:$8 sps:$4 sm:$0xff]  }
 0x1ea   : > { %v3149_v34 = vadd.f32 %v3127_v57, %v3111_v28  ;;  %v3115_v35 = vadd.f32 %v3093_v55, %v3014_v33  ;;  %v3253_v36 = vpack.c.bf16 %v3177_v27, %v3173_v45  ;;  %v5147_v19 = vld [vmem:[%s6681_s7 + $0x1c4] ss:$8 sps:$4 sm:$0xff]   ;;  %v5145_v20 = vld [vmem:[%s6681_s7 + $0x1c0] ss:$8 sps:$4 sm:$0xff]   ;;  %v5150_v25 = vld [vmem:[%s6681_s7 + $0x1d4] ss:$8 sps:$4 sm:$0xff]  }
 0x1eb   : > { %v3164_v39 = vmul.f32 0.2, %v3148_v32  ;;  %v3152_v41 = vadd.f32 %v3123_v54, %v3114_v53  ;;  %v5117_v54 = vld [vmem:[%s6681_s7 + $0x124] ss:$8 sps:$4 sm:$0xff]   ;;  %v5148_v45 = vld [vmem:[%s6681_s7 + $0x1d0] ss:$8 sps:$4 sm:$0xff]  }
 0x1ec   : > { %v3165_v13 = vmul.f32 0.2, %v3149_v34  ;;  %v3153_v48 = vadd.f32 %v3127_v57, %v3115_v35  ;;  %3624 = vmatprep.mubr.bf16.mxu0 %v3253_v36  ;;  %v5153_v28 = vld [vmem:[%s6681_s7 + $0x1e4] ss:$8 sps:$4 sm:$0xff]   ;;  %v5156_v53 = vld [vmem:[%s6681_s7 + $0x1f4] ss:$8 sps:$4 sm:$0xff]   ;;  %v3131_v35 = vrot.slane %v6494_v59, %v757_v6 }
 0x1ed   : > { %v3168_v49 = vmul.f32 0.2, %v3152_v41  ;;  %3625 = vmatmul.mubr.bf16.vlgmr.msra.gmra.mrb[20].mxu0 %v3252_v31  ;;  %v3180_v24 = vmax.f32 %v3148_v32, %v3164_v39  ;;  %v5151_v32 = vld [vmem:[%s6681_s7 + $0x1e0] ss:$8 sps:$4 sm:$0xff]   ;;  %v5154_v33 = vld [vmem:[%s6681_s7 + $0x1f0] ss:$8 sps:$4 sm:$0xff]  }
 0x1ee   : > { %v3169_v51 = vmul.f32 0.2, %v3153_v48  ;;  %3646 = vmatpush1.bf16.msra.mxu0 %v5109_v37  ;;  %v3181_v23 = vmax.f32 %v3149_v34, %v3165_v13 }
 0x1ef   : > { %v3184_v55 = vmax.f32 %v3152_v41, %v3168_v49  ;;  %3647 = vmatprep.subr.bf16.mxu0 %v5114_v42  ;;  %v3135_v41 = vrot.slane %v6494_v59, %v761_v47 }
 0x1f0   : > { %v3185_v58 = vmax.f32 %v3153_v48, %v3169_v51 }
 0x1f1   : > { %v3256_v61 = vpack.c.bf16 %v3184_v55, %v3180_v24 }
 0x1f2   : > { %v3257_v57 = vpack.c.bf16 %v3185_v58, %v3181_v23  ;;  %3648 = vmatpush1.bf16.msra.mxu0 %v5112_v52 }
 0x1f3   : > { %3649 = vmatprep.subr.bf16.mxu0 %v5117_v54 }
 0x1f4   : > { %3634 = vmatprep.mubr.bf16.mxu0 %v3257_v57 }
 0x1f5   : > { %3635 = vmatmul.mubr.bf16.gmra.mrb[24].mxu0 %v3256_v61 }
 0x1f6   : > { %3650 = vmatpush1.bf16.msra.mxu0 %v5115_v29 }
 0x1f7   : > { %3651 = vmatprep.subr.bf16.mxu0 %v5120_v63 }
 0x1fa   : > { %3652 = vmatpush1.bf16.msra.mxu0 %v5118_v0 }
 0x1fb   : > { %3653 = vmatprep.subr.bf16.mxu0 %v5123_v1 }
 0x1fe   : > { %3654 = vmatpush1.bf16.msra.mxu0 %v5121_v2 }
 0x1ff   : > { %3655 = vmatprep.subr.bf16.mxu0 %v5126_v38 }
 0x202   : > { %3656 = vmatpush1.bf16.msra.mxu0 %v5124_v4 }
 0x203   : > { %3657 = vmatprep.subr.bf16.mxu0 %v5129_v43 }
 0x206   : > { %3658 = vmatpush1.bf16.msra.mxu0 %v5127_v7 }
 0x207   : > { %3659 = vmatprep.subr.bf16.mxu0 %v5132_v8 }
 0x20a   : > { %3660 = vmatpush1.bf16.msra.mxu0 %v5130_v9 }
 0x20b   : > { %3661 = vmatprep.subr.bf16.mxu0 %v5135_v10 }
 0x20e   : > { %3662 = vmatpush1.bf16.msra.mxu0 %v5133_v50 }
 0x20f   : > { %3663 = vmatprep.subr.bf16.mxu0 %v5138_v11 }
 0x212   : > { %3664 = vmatpush1.bf16.msra.mxu0 %v5136_v14 }
 0x213   : > { %3665 = vmatprep.subr.bf16.mxu0 %v5141_v15 }
 0x216   : > { %3666 = vmatpush1.bf16.msra.mxu0 %v5139_v16 }
 0x217   : > { %3667 = vmatprep.subr.bf16.mxu0 %v5144_v17 }
 0x21a   : > { %3668 = vmatpush1.bf16.msra.mxu0 %v5142_v18 }
 0x21b   : > { %3669 = vmatprep.subr.bf16.mxu0 %v5147_v19 }
 0x21d   : > { %v2396_v26 = vpop.f32.mrb[4].mxu1 }
 0x21e   : > { %3670 = vmatpush1.bf16.msra.mxu0 %v5145_v20  ;;  %v2398_v27 = vpop.f32.mrb[5].mxu1  ;;  %v3097_v36 = vrot.slane %v2396_v26, %v5506_v5 }
 0x21f   : > { %3671 = vmatprep.subr.bf16.mxu0 %v5150_v25  ;;  %v2400_v30 = vpop.f32.mrb[6].mxu1  ;;  %v3101_v42 = vrot.slane %v2398_v27, %v5506_v5 }
 0x220   : > { %v2401_v31 = vpop.f32.mrb[7].mxu1  ;;  %v5168_v30 = vld [vmem:[%s6683_s9 + $0x28] sm:$0xff]  }
 0x221   : > { %v5169_v31 = vld [vmem:[%s6683_s9 + $0x70] sm:$0xff]  }
 0x222   : > { %3672 = vmatpush1.bf16.msra.mxu0 %v5148_v45 }
 0x223   : > { %3673 = vmatprep.subr.bf16.mxu0 %v5153_v28  ;;  %v5167_v28 = vld [vmem:[%s6683_s9 + $0x68] sm:$0xff]  }
 0x224   : > { %4470 = vmatprep.subr.bf16.mxu1 %v5167_v28 }
 0x225   : > { %4471 = vmatpush3.bf16.msra.mxu1 %v5168_v30 }
 0x226   : > { %3674 = vmatpush1.bf16.msra.mxu0 %v5151_v32  ;;  %v5170_v32 = vld [vmem:[%s6683_s9 + $0x30] sm:$0xff]   ;;  %4472 = vmatprep.subr.bf16.mxu1 %v5169_v31 }
 0x227   : > { %3675 = vmatprep.subr.bf16.mxu0 %v5156_v53  ;;  %v5171_v53 = vld [vmem:[%s6683_s9 + $0x78] sm:$0xff]  }
 0x229   : > { %4473 = vmatpush3.bf16.msra.mxu1 %v5170_v32 }
 0x22a   : > { %3676 = vmatpush1.bf16.msra.mxu0 %v5154_v33  ;;  %v5172_v33 = vld [vmem:[%s6683_s9 + $0x38] sm:$0xff]   ;;  %4474 = vmatprep.subr.bf16.mxu1 %v5171_v53 }
 0x22d   : > { %4475 = vmatpush3.bf16.msra.mxu1 %v5172_v33 }
 0x23d   : > { %v3051_v34 = vpop.f32.mrb[8].mxu1 }
 0x23e   : > { %v4490_v37 = vadd.f32 %v3051_v34, %v6466_v60  ;;  %v3053_v39 = vpop.f32.mrb[9].mxu1  ;;  %v3260_v34 = vld [vmem:[%s6682_s8] sm:$0x3] }
 0x23f   : > { %v4491_v13 = vadd.f32 %v3053_v39, %v6468_v62  ;;  %v3055_v48 = vpop.f32.mrb[10].mxu1 }
 0x240   : > { %v3104_v49 = vadd.f32 %v4490_v37, %v3097_v36  ;;  %v4492_v51 = vadd.f32 %v3055_v48, %v6470_v56  ;;  %v3057_v52 = vpop.f32.mrb[11].mxu1 }
 0x241   : > { %v3105_v24 = vadd.f32 %v4491_v13, %v3101_v42  ;;  %v4493_v6 = vadd.f32 %v3057_v52, %v6472_v3 }
 0x242   : > { %v3142_v55 = vadd.f32 %v3131_v35, %v3104_v49  ;;  %v3108_v54 = vadd.f32 %v4492_v51, %v3097_v36 }
 0x243   : > { %v3143_v60 = vadd.f32 %v3135_v41, %v3105_v24  ;;  %v3109_v23 = vadd.f32 %v4493_v6, %v3101_v42 }
 0x244   : > { %v3158_v58 = vmul.f32 0.2, %v3142_v55  ;;  %v3146_v40 = vadd.f32 %v3131_v35, %v3108_v54 }
 0x245   : > { %v3159_v61 = vmul.f32 0.2, %v3143_v60  ;;  %v3147_v47 = vadd.f32 %v3135_v41, %v3109_v23  ;;  %v3061_v59 = vpop.f32.mrb[12].mxu1 }
 0x246   : > { %v3162_v57 = vmul.f32 0.2, %v3146_v40  ;;  %v4494_v62 = vadd.f32 %v3061_v59, %v6474_v44  ;;  %v3063_v29 = vpop.f32.mrb[13].mxu1  ;;  %v3174_v1 = vmax.f32 %v3142_v55, %v3158_v58 }
 0x247   : > { %v3163_v63 = vmul.f32 0.2, %v3147_v47  ;;  %v4495_v56 = vadd.f32 %v3063_v29, %v6476_v21  ;;  %v3065_v0 = vpop.f32.mrb[14].mxu1  ;;  %v3175_v8 = vmax.f32 %v3143_v60, %v3159_v61 }
 0x248   : > { %v3178_v2 = vmax.f32 %v3146_v40, %v3162_v57  ;;  %v3112_v3 = vadd.f32 %v4494_v62, %v3097_v36  ;;  %v4496_v38 = vadd.f32 %v3065_v0, %v6478_v22  ;;  %v3067_v4 = vpop.f32.mrb[15].mxu1 }
 0x249   : > { %v3113_v43 = vadd.f32 %v4495_v56, %v3101_v42  ;;  %v4497_v7 = vadd.f32 %v3067_v4, %v6480_v12  ;;  %v3179_v9 = vmax.f32 %v3147_v47, %v3163_v63 }
 0x24a   : > { %v3254_v10 = vpack.c.bf16 %v3178_v2, %v3174_v1  ;;  %v3150_v50 = vadd.f32 %v3131_v35, %v3112_v3  ;;  %v3116_v11 = vadd.f32 %v4496_v38, %v3097_v36  ;;  %v3269_v36 = vrot.slane %v3260_v34, %v5448_v46 }
 0x24b   : > { %v3151_v44 = vadd.f32 %v3135_v41, %v3113_v43  ;;  %v3117_v14 = vadd.f32 %v4497_v7, %v3101_v42  ;;  %v3255_v15 = vpack.c.bf16 %v3179_v9, %v3175_v8 }
 0x24c   : > { %v3166_v16 = vmul.f32 0.2, %v3150_v50  ;;  %v3154_v21 = vadd.f32 %v3131_v35, %v3116_v11  ;;  %v3265_v35 = vrot.slane %v3260_v34, %v5506_v5 }
 0x24d   : > { %v3167_v17 = vmul.f32 0.2, %v3151_v44  ;;  %v3155_v18 = vadd.f32 %v3135_v41, %v3117_v14  ;;  %3677 = vmatprep.mubr.bf16.mxu0 %v3255_v15 }
 0x24e   : > { %v3170_v19 = vmul.f32 0.2, %v3154_v21  ;;  %3678 = vmatmul.mubr.bf16.vlgmr.msra.gmra.mrb[20].mxu0 %v3254_v10  ;;  %v3182_v20 = vmax.f32 %v3150_v50, %v3166_v16 }
 0x24f   : > { %v3171_v22 = vmul.f32 0.2, %v3155_v18  ;;  %v3183_v26 = vmax.f32 %v3151_v44, %v3167_v17 }
 0x250   : > { %v3186_v25 = vmax.f32 %v3154_v21, %v3170_v19 }
 0x251   : > { %v3187_v12 = vmax.f32 %v3155_v18, %v3171_v22 }
 0x252   : > { %v3258_v45 = vpack.c.bf16 %v3186_v25, %v3182_v20 }
 0x253   : > { %v3259_v27 = vpack.c.bf16 %v3187_v12, %v3183_v26 }
 0x255   : > { %3687 = vmatprep.mubr.bf16.mxu0 %v3259_v27 }
 0x256   : > { %3688 = vmatmul.mubr.bf16.gmra.mrb[24].mxu0 %v3258_v45 }
 0x321   : > { %v3679_v37 = vpop.f32.mrb[20].mxu0 }
 0x322   : > { %v4498_v39 = vadd.f32 %v3679_v37, %v3265_v35  ;;  %v3681_v41 = vpop.f32.mrb[21].mxu0 }
 0x323   : > { %v4499_v42 = vadd.f32 %v3681_v41, %v3269_v36  ;;  %v3683_v13 = vpop.f32.mrb[22].mxu0 }
 0x324   : > { %v3698_v48 = vmul.f32 0.2, %v4498_v39  ;;  %v4500_v49 = vadd.f32 %v3683_v13, %v3265_v35  ;;  %v3685_v51 = vpop.f32.mrb[23].mxu0 }
 0x325   : > { %v3699_v52 = vmul.f32 0.2, %v4499_v42  ;;  %v4501_v24 = vadd.f32 %v3685_v51, %v3269_v36 }
 0x326   : > { %v3700_v6 = vmul.f32 0.2, %v4500_v49  ;;  %v3706_v54 = vmax.f32 %v4498_v39, %v3698_v48 }
 0x327   : > { %v3701_v55 = vmul.f32 0.2, %v4501_v24  ;;  %v3707_v23 = vmax.f32 %v4499_v42, %v3699_v52 }
 0x328   : > { %v3708_v60 = vmax.f32 %v4500_v49, %v3700_v6 }
 0x329   : > { %v3709_v58 = vmax.f32 %v4501_v24, %v3701_v55  ;;  %v3689_v40 = vpop.f32.mrb[24].mxu0 }
 0x32a   : > { %v3746_v5 = vpack.c.bf16 %v3708_v60, %v3706_v54  ;;  %v4502_v61 = vadd.f32 %v3689_v40, %v3265_v35  ;;  %v3691_v46 = vpop.f32.mrb[25].mxu0 }
 0x32b   : > { %v4503_v47 = vadd.f32 %v3691_v46, %v3269_v36  ;;  %v3693_v59 = vpop.f32.mrb[26].mxu0  ;;  %v3747_v57 = vpack.c.bf16 %v3709_v58, %v3707_v23 }
 0x32c   : > { %v3702_v62 = vmul.f32 0.2, %v4502_v61  ;;  %v4504_v29 = vadd.f32 %v3693_v59, %v3265_v35  ;;  %v3695_v63 = vpop.f32.mrb[27].mxu0 }
 0x32d   : > { %v3703_v56 = vmul.f32 0.2, %v4503_v47  ;;  %v4505_v0 = vadd.f32 %v3695_v63, %v3269_v36  ;;  %3878 = vmatprep.mubr.bf16.mxu1 %v3747_v57 }
 0x32e   : > { %v3704_v1 = vmul.f32 0.2, %v4504_v29  ;;  %3879 = vmatmul.mubr.bf16.vlgmr.msra.gmra.mrb[16].mxu1 %v3746_v5  ;;  %v3710_v3 = vmax.f32 %v4502_v61, %v3702_v62 }
 0x32f   : > { %v3705_v2 = vmul.f32 0.2, %v4505_v0  ;;  %v3711_v4 = vmax.f32 %v4503_v47, %v3703_v56 }
 0x330   : > { %v3712_v38 = vmax.f32 %v4504_v29, %v3704_v1 }
 0x331   : > { %v3713_v43 = vmax.f32 %v4505_v0, %v3705_v2 }
 0x332   : > { %v3748_v7 = vpack.c.bf16 %v3712_v38, %v3710_v3 }
 0x333   : > { %v3749_v8 = vpack.c.bf16 %v3713_v43, %v3711_v4 }
 0x335   : > { %3886 = vmatprep.mubr.bf16.mxu1 %v3749_v8 }
 0x336   : > { %3887 = vmatmul.mubr.bf16.gmra.mrb[20].mxu1 %v3748_v7 }
 0x401   : > { %v4476_v9 = vpop.f32.mrb[16].mxu1 }
 0x402   : > { %v4477_v10 = vpop.f32.mrb[17].mxu1 }
 0x403   : > { %v4478_v50 = vadd.f32 %v4477_v10, %v4476_v9  ;;  %v4479_v11 = vpop.f32.mrb[18].mxu1 }
 0x404   : > { %v4480_v44 = vpop.f32.mrb[19].mxu1 }
 0x405   : > { %3896 = vst.msk [vmem:[%s486_s27] sm:$0xff] %vm3895_vm1, %v4478_v50  ;;  %v4481_v14 = vadd.f32 %v4480_v44, %v4479_v11 }
 0x407   : > { %3897 = vst.msk [vmem:[%s486_s27 + $0x8] sm:$0xff] %vm3895_vm1, %v4481_v14 }
 0x409   : > { %v4482_v15 = vpop.f32.mrb[20].mxu1 }
 0x40a   : > { %v4483_v16 = vpop.f32.mrb[21].mxu1 }
 0x40b   : > { %v4484_v21 = vadd.f32 %v4483_v16, %v4482_v15  ;;  %v4485_v17 = vpop.f32.mrb[22].mxu1 }
 0x40c   : > { %v4486_v18 = vpop.f32.mrb[23].mxu1 }
 0x40d   : > { %3898 = vst.msk [vmem:[%s486_s27 + $0x10] sm:$0xff] %vm3895_vm1, %v4484_v21  ;;  %v4487_v19 = vadd.f32 %v4486_v18, %v4485_v17 }
 0x40f   : > { %3899 = vst.msk [vmem:[%s486_s27 + $0x18] sm:$0xff] %vm3895_vm1, %v4487_v19 }
 0x410 PF: > { %s20_s17 = sadd.s32 1, %s5211_s17   ;;  %s6685_s13 = smov %s5203_s15 }
 0x411   : > { %p17_p7 = scmp.ge.s32.totalorder %s20_s17, 6   ;;  %s6686_s14 = smov %s5207_s16 }
 0x412   : > { %s6687_s15 = smov %s6690_s18  ;;  %s6688_s16 = smov %s6694_s19 }
 0x413   :  { %19 = sbr.rel (!%p17_p7) target bundleno = 3 (0x3), region = 99 }

</bundles_post_ra>
